<compile_context>
chip_gen: v5e
topology: v5e:2x2
jax: 0.10.0
libtpu: 0.0.40
codegen_flags: <defaults>
</compile_context>

<pallas_src>
import functools

import jax
import jax.numpy as jnp
from jax.experimental import pallas as pl
from jax.experimental.pallas import tpu as pltpu


# ----------------------------------------------------------------------------
# Pallas kernels
# ----------------------------------------------------------------------------
def _make_conv_mm_kernel(relu_out: bool):
    """Fused (im2col-patches @ weight + bias [+ ReLU]) row-tile kernel."""
    def kernel(x_ref, w_ref, b_ref, o_ref):
        y = jnp.dot(x_ref[...], w_ref[...], preferred_element_type=jnp.float32)
        y = y + b_ref[...]                      # [1, N] broadcasts over rows
        if relu_out:
            y = jnp.maximum(y, 0.0)
        o_ref[...] = y.astype(o_ref.dtype)
    return kernel


def _pick_row_tile(m, tile_max=1024):
    """Multiple-of-8 row tile, capped, and sized so the grid has >=2 steps
    (keeps both v7x TensorCores busy) whenever m allows it."""
    half = ((m + 15) // 16) * 8                 # round_up(ceil(m/2), 8)
    return max(8, min(tile_max, half))


def conv_mm(x, w, b2d, *, relu_out, tile_max=1024):
    """out = act(x @ w + b), row-tiled; ragged last block masked by Pallas."""
    M, K = x.shape
    _, N = w.shape
    tile = _pick_row_tile(M, tile_max)
    return pl.pallas_call(
        _make_conv_mm_kernel(relu_out),
        out_shape=jax.ShapeDtypeStruct((M, N), jnp.float32),
        grid=(pl.cdiv(M, tile),),
        in_specs=[
            pl.BlockSpec((tile, K), lambda i: (i, 0)),
            pl.BlockSpec((K, N), lambda i: (0, 0)),
            pl.BlockSpec((1, N), lambda i: (0, 0)),
        ],
        out_specs=pl.BlockSpec((tile, N), lambda i: (i, 0)),
        compiler_params=pltpu.CompilerParams(dimension_semantics=("parallel",)),
    )(x, w, b2d)


def _tail_kernel(p3_ref, w3_ref, b3_ref, wfp_ref, bf_ref, g_ref, be_ref,
                 wd_ref, bd_ref, o_ref, y3_s):
    """conv3 -> (NCHW flatten) -> ReLU -> Linear(1600,128) -> ReLU -> LN -> Linear(128,15).

    p3_ref rows are ordered (hw, b) (hw-major); the NCHW flatten is folded into
    wfp (wfp[hw, c, o] = wf[o, c*25 + hw]), so no in-kernel transpose is needed.
    """
    npos = wfp_ref.shape[0]                     # 25 spatial positions (5x5)
    D = wfp_ref.shape[2]                        # 128
    B = o_ref.shape[0]

    # Conv3 as one MXU matmul over all (hw, b) rows; ReLU (Flatten->ReLU is
    # elementwise, so applying it pre-flatten is identical).
    y3 = jnp.dot(p3_ref[...], w3_ref[...], preferred_element_type=jnp.float32)
    y3_s[...] = jnp.maximum(y3 + b3_ref[...], 0.0)          # [npos*B, 64]

    # Linear(1600 -> 128): 25 small accumulating dots, one per spatial pos.
    acc = jnp.zeros((B, D), jnp.float32)
    for hw in range(npos):                      # static unroll
        acc = acc + jnp.dot(y3_s[pl.ds(hw * B, B), :], wfp_ref[hw],
                            preferred_element_type=jnp.float32)
    h = jnp.maximum(acc + bf_ref[...], 0.0)     # head ReLU

    # LayerNorm(128), PyTorch semantics: biased var, eps inside rsqrt.
    mean = jnp.mean(h, axis=-1, keepdims=True)
    var = jnp.mean((h - mean) ** 2, axis=-1, keepdims=True)
    hn = (h - mean) * jax.lax.rsqrt(var + 1e-5)
    hn = hn * g_ref[...] + be_ref[...]

    # Linear(128 -> 15)
    y = jnp.dot(hn, wd_ref[...], preferred_element_type=jnp.float32) + bd_ref[...]
    o_ref[...] = y.astype(o_ref.dtype)


def tail_fused(p3_hwmajor, w3m, b3, wfp, bf, ln_g, ln_b, wdm, bd, *, batch):
    npos, c3, d = wfp.shape                     # 25, 64, 128
    k3 = w3m.shape[0]                           # 576
    n_out = wdm.shape[1]                        # 15
    # NOTE: single (batch*25)-row block; fine for small batch.  Tile over rows
    # before scaling batch into the hundreds.
    return pl.pallas_call(
        _tail_kernel,
        out_shape=jax.ShapeDtypeStruct((batch, n_out), jnp.float32),
        grid=(1,),
        in_specs=[
            pl.BlockSpec((npos * batch, k3), lambda i: (0, 0)),
            pl.BlockSpec((k3, c3), lambda i: (0, 0)),
            pl.BlockSpec((1, c3), lambda i: (0, 0)),
            pl.BlockSpec((npos, c3, d), lambda i: (0, 0, 0)),
            pl.BlockSpec((1, d), lambda i: (0, 0)),
            pl.BlockSpec((1, d), lambda i: (0, 0)),
            pl.BlockSpec((1, d), lambda i: (0, 0)),
            pl.BlockSpec((d, n_out), lambda i: (0, 0)),
            pl.BlockSpec((1, n_out), lambda i: (0, 0)),
        ],
        out_specs=pl.BlockSpec((batch, n_out), lambda i: (0, 0)),
        scratch_shapes=[pltpu.VMEM((npos * batch, c3), jnp.float32)],
        compiler_params=pltpu.CompilerParams(dimension_semantics=("arbitrary",)),
    )(p3_hwmajor, w3m, b3, wfp, bf, ln_g, ln_b, wdm, bd)


# ----------------------------------------------------------------------------
# Glue: im2col (strided slicing / stack only) + one-time param prep
# ----------------------------------------------------------------------------
def im2col_nhwc(x, k, s):
    """x: [B,H,W,C] -> patches [B, OH, OW, k*k, C], kernel taps in (ki,kj) order."""
    B, H, W, C = x.shape
    OH = (H - k) // s + 1
    OW = (W - k) // s + 1
    cols = []
    for i in range(k):
        for j in range(k):
            cols.append(x[:, i:i + s * (OH - 1) + 1:s, j:j + s * (OW - 1) + 1:s, :])
    return jnp.stack(cols, axis=3), OH, OW


def patches_rows_bmajor(p):
    B, OH, OW, KK, C = p.shape
    return p.reshape(B * OH * OW, KK * C)


def patches_rows_hwmajor(p):
    # rows ordered (oh, ow, b): row = (oh*OW + ow)*B + b
    B, OH, OW, KK, C = p.shape
    return jnp.transpose(p, (1, 2, 0, 3, 4)).reshape(OH * OW * B, KK * C)


def conv_weight_to_mat(w_ocij):
    """PyTorch conv weight [O, C, kh, kw] -> matmul weight [(ki,kj,c), O]."""
    O, C, kh, kw = w_ocij.shape
    return jnp.transpose(w_ocij, (2, 3, 1, 0)).reshape(kh * kw * C, O)


def prepare_params(params):
    """One-time layout prep (hoisted out of the forward pass)."""
    D = params["wf"].shape[0]                           # 128
    # Fold PyTorch NCHW flatten (idx = c*25 + hw) into the FC weight:
    # wfp[hw, c, o] = wf[o, c*25 + hw]
    wfp = jnp.transpose(params["wf"].reshape(D, 64, 25), (2, 1, 0))
    return {
        "w1m": conv_weight_to_mat(params["w1"]), "b1": params["b1"].reshape(1, -1),
        "w2m": conv_weight_to_mat(params["w2"]), "b2": params["b2"].reshape(1, -1),
        "w3m": conv_weight_to_mat(params["w3"]), "b3": params["b3"].reshape(1, -1),
        "wfp": wfp,                              "bf": params["bf"].reshape(1, -1),
        "ln_g": params["ln_g"].reshape(1, -1),   "ln_b": params["ln_b"].reshape(1, -1),
        "wdm": params["wd"].T,                   "bd": params["bd"].reshape(1, -1),
    }


# ----------------------------------------------------------------------------
# Parameters (deterministic synthetic init, PyTorch tensor shapes)
# ----------------------------------------------------------------------------
def init_params(key):
    ks = jax.random.split(key, 10)

    def nrm(k, shape, scale=0.05):
        return (scale * jax.random.normal(k, shape)).astype(jnp.float32)

    return {
        "w1": nrm(ks[0], (32, 3, 3, 3)),     "b1": nrm(ks[1], (32,)),
        "w2": nrm(ks[2], (64, 32, 3, 3)),    "b2": nrm(ks[3], (64,)),
        "w3": nrm(ks[4], (64, 64, 3, 3)),    "b3": nrm(ks[5], (64,)),
        "wf": nrm(ks[6], (128, 64 * 5 * 5)), "bf": nrm(ks[7], (128,)),
        "ln_g": jnp.ones((128,), jnp.float32),
        "ln_b": jnp.zeros((128,), jnp.float32),
        "wd": nrm(ks[8], (15, 128)),         "bd": nrm(ks[9], (15,)),
    }


# ----------------------------------------------------------------------------
# Forward pass (default path: contrastive=False, full_network=True -> self.d)
# ----------------------------------------------------------------------------
def coinrun_actor_forward(pp, x_nchw):
    B = x_nchw.shape[0]
    x = jnp.transpose(x_nchw, (0, 2, 3, 1))             # NCHW -> NHWC

    # f: Conv(3->32, k3, s2) + ReLU        (64 -> 31)
    p1, oh1, ow1 = im2col_nhwc(x, 3, 2)
    y1 = conv_mm(patches_rows_bmajor(p1), pp["w1m"], pp["b1"],
                 relu_out=True).reshape(B, oh1, ow1, 32)

    # f: Conv(32->64, k3, s2) + ReLU       (31 -> 15)
    p2, oh2, ow2 = im2col_nhwc(y1, 3, 2)
    y2 = conv_mm(patches_rows_bmajor(p2), pp["w2m"], pp["b2"],
                 relu_out=True).reshape(B, oh2, ow2, 64)

    # fused tail: Conv(64->64, k3, s3) -> Flatten(NCHW) -> ReLU ->
    #             Linear(1600,128) -> [d:] ReLU -> LayerNorm(128) -> Linear(128,15)
    p3, _, _ = im2col_nhwc(y2, 3, 3)                    # 15 -> 5
    p3r = patches_rows_hwmajor(p3)                      # [(5*5)*B, 9*64]
    return tail_fused(p3r, pp["w3m"], pp["b3"], pp["wfp"], pp["bf"],
                      pp["ln_g"], pp["ln_b"], pp["wdm"], pp["bd"], batch=B)


if __name__ == "__main__":
    key = jax.random.PRNGKey(0)
    pkey, xkey = jax.random.split(key)
    params = init_params(pkey)
    pp = prepare_params(params)                         # one-time layout prep
    # CoinRun observations: 3x64x64 (Linear(64*5*5) forces the 64x64 spatial).
    x = jax.random.uniform(xkey, (2, 3, 64, 64), dtype=jnp.float32)

    fwd = jax.jit(functools.partial(coinrun_actor_forward, pp))
    out = fwd(x)
    jax.block_until_ready(out)

    assert out.shape == (2, 15), out.shape
    assert out.dtype == jnp.float32
    assert bool(jnp.all(jnp.isfinite(out)))
    print("KERNEL_OK")
</pallas_src>

<mosaic_0001>
module attributes {stable_mosaic.version = 11 : i64} {
  func.func @kernel(%arg0: i32, %arg1: memref<968x27xf32, #tpu.memory_space<vmem>>, %arg2: memref<27x32xf32, #tpu.memory_space<vmem>>, %arg3: memref<1x32xf32, #tpu.memory_space<vmem>>, %arg4: memref<968x32xf32, #tpu.memory_space<vmem>>) attributes {dimension_semantics = [#tpu.dimension_semantics<parallel>], iteration_bounds = array<i64: 2>, scalar_prefetch = 0 : i64, scratch_operands = 0 : i64, tpu.core_type = #tpu.core_type<tc>, window_params = [{transform_indices = @transform_0, window_bounds = array<i64: 968, 27>}, {pipeline_mode = #tpu.pipeline_mode<synchronous>, transform_indices = @transform_1, window_bounds = array<i64: 27, 32>}, {pipeline_mode = #tpu.pipeline_mode<synchronous>, transform_indices = @transform_2, window_bounds = array<i64: 1, 32>}, {transform_indices = @transform_3, window_bounds = array<i64: 968, 32>}]} {
    %c0 = arith.constant 0 : index
    %c0_0 = arith.constant 0 : index
    %0 = vector.load %arg1[%c0, %c0_0] : memref<968x27xf32, #tpu.memory_space<vmem>>, vector<968x27xf32>
    %c0_1 = arith.constant 0 : index
    %c0_2 = arith.constant 0 : index
    %1 = vector.load %arg2[%c0_1, %c0_2] : memref<27x32xf32, #tpu.memory_space<vmem>>, vector<27x32xf32>
    %cst = arith.constant dense<0.000000e+00> : vector<968x32xf32>
    %2 = tpu.matmul %0, %1, %cst {dimension_numbers = #tpu.dot_dimension_numbers<[1], [0], [0], [1], [0, 0, 1, 1], [], []>} : vector<968x27xf32>, vector<27x32xf32>, vector<968x32xf32> -> vector<968x32xf32>
    %c0_3 = arith.constant 0 : index
    %c0_4 = arith.constant 0 : index
    %3 = vector.load %arg3[%c0_3, %c0_4] : memref<1x32xf32, #tpu.memory_space<vmem>>, vector<1x32xf32>
    %4 = vector.broadcast %3 : vector<1x32xf32> to vector<968x32xf32>
    %5 = arith.addf %2, %4 : vector<968x32xf32>
    %cst_5 = arith.constant 0.000000e+00 : f32
    %6 = vector.broadcast %cst_5 : f32 to vector<968x32xf32>
    %7 = arith.maximumf %5, %6 : vector<968x32xf32>
    %c0_6 = arith.constant 0 : index
    %c0_7 = arith.constant 0 : index
    %8 = vector.load %arg4[%c0_6, %c0_7] : memref<968x32xf32, #tpu.memory_space<vmem>>, vector<968x32xf32>
    tpu.vector_store %arg4[%c0_6, %c0_7], %7 {strides = array<i32>} : memref<968x32xf32, #tpu.memory_space<vmem>>, vector<968x32xf32>,
    return
  }
  func.func @transform_0(%arg0: i32) -> (i32, i32) {
    %c0_i32 = arith.constant 0 : i32
    %c0_i32_0 = arith.constant 0 : i32
    return %arg0, %c0_i32 : i32, i32
  }
  func.func @transform_1(%arg0: i32) -> (i32, i32) {
    %c0_i32 = arith.constant 0 : i32
    %c0_i32_0 = arith.constant 0 : i32
    %c0_i32_1 = arith.constant 0 : i32
    return %c0_i32, %c0_i32_0 : i32, i32
  }
  func.func @transform_2(%arg0: i32) -> (i32, i32) {
    %c0_i32 = arith.constant 0 : i32
    %c0_i32_0 = arith.constant 0 : i32
    %c0_i32_1 = arith.constant 0 : i32
    return %c0_i32, %c0_i32_0 : i32, i32
  }
  func.func @transform_3(%arg0: i32) -> (i32, i32) {
    %c0_i32 = arith.constant 0 : i32
    %c0_i32_0 = arith.constant 0 : i32
    return %arg0, %c0_i32 : i32, i32
  }
}

module attributes {stable_mosaic.version = 11 : i64} {
  func.func @kernel(%arg0: i32, %arg1: memref<232x288xf32, #tpu.memory_space<vmem>>, %arg2: memref<288x64xf32, #tpu.memory_space<vmem>>, %arg3: memref<1x64xf32, #tpu.memory_space<vmem>>, %arg4: memref<232x64xf32, #tpu.memory_space<vmem>>) attributes {dimension_semantics = [#tpu.dimension_semantics<parallel>], iteration_bounds = array<i64: 2>, scalar_prefetch = 0 : i64, scratch_operands = 0 : i64, tpu.core_type = #tpu.core_type<tc>, window_params = [{transform_indices = @transform_0, window_bounds = array<i64: 232, 288>}, {pipeline_mode = #tpu.pipeline_mode<synchronous>, transform_indices = @transform_1, window_bounds = array<i64: 288, 64>}, {pipeline_mode = #tpu.pipeline_mode<synchronous>, transform_indices = @transform_2, window_bounds = array<i64: 1, 64>}, {transform_indices = @transform_3, window_bounds = array<i64: 232, 64>}]} {
    %c0 = arith.constant 0 : index
    %c0_0 = arith.constant 0 : index
    %0 = vector.load %arg1[%c0, %c0_0] : memref<232x288xf32, #tpu.memory_space<vmem>>, vector<232x288xf32>
    %c0_1 = arith.constant 0 : index
    %c0_2 = arith.constant 0 : index
    %1 = vector.load %arg2[%c0_1, %c0_2] : memref<288x64xf32, #tpu.memory_space<vmem>>, vector<288x64xf32>
    %cst = arith.constant dense<0.000000e+00> : vector<232x64xf32>
    %2 = tpu.matmul %0, %1, %cst {dimension_numbers = #tpu.dot_dimension_numbers<[1], [0], [0], [1], [0, 0, 1, 1], [], []>} : vector<232x288xf32>, vector<288x64xf32>, vector<232x64xf32> -> vector<232x64xf32>
    %c0_3 = arith.constant 0 : index
    %c0_4 = arith.constant 0 : index
    %3 = vector.load %arg3[%c0_3, %c0_4] : memref<1x64xf32, #tpu.memory_space<vmem>>, vector<1x64xf32>
    %4 = vector.broadcast %3 : vector<1x64xf32> to vector<232x64xf32>
    %5 = arith.addf %2, %4 : vector<232x64xf32>
    %cst_5 = arith.constant 0.000000e+00 : f32
    %6 = vector.broadcast %cst_5 : f32 to vector<232x64xf32>
    %7 = arith.maximumf %5, %6 : vector<232x64xf32>
    %c0_6 = arith.constant 0 : index
    %c0_7 = arith.constant 0 : index
    %8 = vector.load %arg4[%c0_6, %c0_7] : memref<232x64xf32, #tpu.memory_space<vmem>>, vector<232x64xf32>
    tpu.vector_store %arg4[%c0_6, %c0_7], %7 {strides = array<i32>} : memref<232x64xf32, #tpu.memory_space<vmem>>, vector<232x64xf32>,
    return
  }
  func.func @transform_0(%arg0: i32) -> (i32, i32) {
    %c0_i32 = arith.constant 0 : i32
    %c0_i32_0 = arith.constant 0 : i32
    return %arg0, %c0_i32 : i32, i32
  }
  func.func @transform_1(%arg0: i32) -> (i32, i32) {
    %c0_i32 = arith.constant 0 : i32
    %c0_i32_0 = arith.constant 0 : i32
    %c0_i32_1 = arith.constant 0 : i32
    return %c0_i32, %c0_i32_0 : i32, i32
  }
  func.func @transform_2(%arg0: i32) -> (i32, i32) {
    %c0_i32 = arith.constant 0 : i32
    %c0_i32_0 = arith.constant 0 : i32
    %c0_i32_1 = arith.constant 0 : i32
    return %c0_i32, %c0_i32_0 : i32, i32
  }
  func.func @transform_3(%arg0: i32) -> (i32, i32) {
    %c0_i32 = arith.constant 0 : i32
    %c0_i32_0 = arith.constant 0 : i32
    return %arg0, %c0_i32 : i32, i32
  }
}

module attributes {stable_mosaic.version = 11 : i64} {
  func.func @_tail_kernel(%arg0: i32, %arg1: memref<50x576xf32, #tpu.memory_space<vmem>>, %arg2: memref<576x64xf32, #tpu.memory_space<vmem>>, %arg3: memref<1x64xf32, #tpu.memory_space<vmem>>, %arg4: memref<25x64x128xf32, #tpu.memory_space<vmem>>, %arg5: memref<1x128xf32, #tpu.memory_space<vmem>>, %arg6: memref<1x128xf32, #tpu.memory_space<vmem>>, %arg7: memref<1x128xf32, #tpu.memory_space<vmem>>, %arg8: memref<128x15xf32, #tpu.memory_space<vmem>>, %arg9: memref<1x15xf32, #tpu.memory_space<vmem>>, %arg10: memref<2x15xf32, #tpu.memory_space<vmem>>, %arg11: memref<50x64xf32, #tpu.memory_space<vmem>>) attributes {dimension_semantics = [#tpu.dimension_semantics<arbitrary>], iteration_bounds = array<i64: 1>, scalar_prefetch = 0 : i64, scratch_operands = 1 : i64, tpu.core_type = #tpu.core_type<tc>, window_params = [{pipeline_mode = #tpu.pipeline_mode<synchronous>, transform_indices = @transform_0, window_bounds = array<i64: 50, 576>}, {pipeline_mode = #tpu.pipeline_mode<synchronous>, transform_indices = @transform_1, window_bounds = array<i64: 576, 64>}, {pipeline_mode = #tpu.pipeline_mode<synchronous>, transform_indices = @transform_2, window_bounds = array<i64: 1, 64>}, {pipeline_mode = #tpu.pipeline_mode<synchronous>, transform_indices = @transform_3, window_bounds = array<i64: 25, 64, 128>}, {pipeline_mode = #tpu.pipeline_mode<synchronous>, transform_indices = @transform_4, window_bounds = array<i64: 1, 128>}, {pipeline_mode = #tpu.pipeline_mode<synchronous>, transform_indices = @transform_5, window_bounds = array<i64: 1, 128>}, {pipeline_mode = #tpu.pipeline_mode<synchronous>, transform_indices = @transform_6, window_bounds = array<i64: 1, 128>}, {pipeline_mode = #tpu.pipeline_mode<synchronous>, transform_indices = @transform_7, window_bounds = array<i64: 128, 15>}, {pipeline_mode = #tpu.pipeline_mode<synchronous>, transform_indices = @transform_8, window_bounds = array<i64: 1, 15>}, {pipeline_mode = #tpu.pipeline_mode<synchronous>, transform_indices = @transform_9, window_bounds = array<i64: 2, 15>}]} {
    %c0 = arith.constant 0 : index
    %c0_0 = arith.constant 0 : index
    %0 = vector.load %arg1[%c0, %c0_0] : memref<50x576xf32, #tpu.memory_space<vmem>>, vector<50x576xf32>
    %c0_1 = arith.constant 0 : index
    %c0_2 = arith.constant 0 : index
    %1 = vector.load %arg2[%c0_1, %c0_2] : memref<576x64xf32, #tpu.memory_space<vmem>>, vector<576x64xf32>
    %cst = arith.constant dense<0.000000e+00> : vector<50x64xf32>
    %2 = tpu.matmul %0, %1, %cst {dimension_numbers = #tpu.dot_dimension_numbers<[1], [0], [0], [1], [0, 0, 1, 1], [], []>} : vector<50x576xf32>, vector<576x64xf32>, vector<50x64xf32> -> vector<50x64xf32>
    %c0_3 = arith.constant 0 : index
    %c0_4 = arith.constant 0 : index
    %3 = vector.load %arg3[%c0_3, %c0_4] : memref<1x64xf32, #tpu.memory_space<vmem>>, vector<1x64xf32>
    %4 = vector.broadcast %3 : vector<1x64xf32> to vector<50x64xf32>
    %5 = arith.addf %2, %4 : vector<50x64xf32>
    %cst_5 = arith.constant 0.000000e+00 : f32
    %6 = vector.broadcast %cst_5 : f32 to vector<50x64xf32>
    %7 = arith.maximumf %5, %6 : vector<50x64xf32>
    %c0_6 = arith.constant 0 : index
    %c0_7 = arith.constant 0 : index
    %8 = vector.load %arg11[%c0_6, %c0_7] : memref<50x64xf32, #tpu.memory_space<vmem>>, vector<50x64xf32>
    tpu.vector_store %arg11[%c0_6, %c0_7], %7 {strides = array<i32>} : memref<50x64xf32, #tpu.memory_space<vmem>>, vector<50x64xf32>,
    %cst_8 = arith.constant 0.000000e+00 : f32
    %9 = vector.broadcast %cst_8 : f32 to vector<2x128xf32>
    %c0_9 = arith.constant 0 : index
    %c0_10 = arith.constant 0 : index
    %10 = vector.load %arg11[%c0_9, %c0_10] : memref<50x64xf32, #tpu.memory_space<vmem>>, vector<2x64xf32>
    %c0_11 = arith.constant 0 : index
    %c0_12 = arith.constant 0 : index
    %c0_13 = arith.constant 0 : index
    %11 = vector.load %arg4[%c0_11, %c0_12, %c0_13] : memref<25x64x128xf32, #tpu.memory_space<vmem>>, vector<1x64x128xf32>
    %12 = vector.shape_cast %11 : vector<1x64x128xf32> to vector<64x128xf32>
    %cst_14 = arith.constant dense<0.000000e+00> : vector<2x128xf32>
    %13 = tpu.matmul %10, %12, %cst_14 {dimension_numbers = #tpu.dot_dimension_numbers<[1], [0], [0], [1], [0, 0, 1, 1], [], []>} : vector<2x64xf32>, vector<64x128xf32>, vector<2x128xf32> -> vector<2x128xf32>
    %14 = arith.addf %9, %13 : vector<2x128xf32>
    %c2 = arith.constant 2 : index
    %c0_15 = arith.constant 0 : index
    %15 = vector.load %arg11[%c2, %c0_15] : memref<50x64xf32, #tpu.memory_space<vmem>>, vector<2x64xf32>
    %c1 = arith.constant 1 : index
    %c0_16 = arith.constant 0 : index
    %c0_17 = arith.constant 0 : index
    %16 = vector.load %arg4[%c1, %c0_16, %c0_17] : memref<25x64x128xf32, #tpu.memory_space<vmem>>, vector<1x64x128xf32>
    %17 = vector.shape_cast %16 : vector<1x64x128xf32> to vector<64x128xf32>
    %cst_18 = arith.constant dense<0.000000e+00> : vector<2x128xf32>
    %18 = tpu.matmul %15, %17, %cst_18 {dimension_numbers = #tpu.dot_dimension_numbers<[1], [0], [0], [1], [0, 0, 1, 1], [], []>} : vector<2x64xf32>, vector<64x128xf32>, vector<2x128xf32> -> vector<2x128xf32>
    %19 = arith.addf %14, %18 : vector<2x128xf32>
    %c4 = arith.constant 4 : index
    %c0_19 = arith.constant 0 : index
    %20 = vector.load %arg11[%c4, %c0_19] : memref<50x64xf32, #tpu.memory_space<vmem>>, vector<2x64xf32>
    %c2_20 = arith.constant 2 : index
    %c0_21 = arith.constant 0 : index
    %c0_22 = arith.constant 0 : index
    %21 = vector.load %arg4[%c2_20, %c0_21, %c0_22] : memref<25x64x128xf32, #tpu.memory_space<vmem>>, vector<1x64x128xf32>
    %22 = vector.shape_cast %21 : vector<1x64x128xf32> to vector<64x128xf32>
    %cst_23 = arith.constant dense<0.000000e+00> : vector<2x128xf32>
    %23 = tpu.matmul %20, %22, %cst_23 {dimension_numbers = #tpu.dot_dimension_numbers<[1], [0], [0], [1], [0, 0, 1, 1], [], []>} : vector<2x64xf32>, vector<64x128xf32>, vector<2x128xf32> -> vector<2x128xf32>
    %24 = arith.addf %19, %23 : vector<2x128xf32>
    %c6 = arith.constant 6 : index
    %c0_24 = arith.constant 0 : index
    %25 = vector.load %arg11[%c6, %c0_24] : memref<50x64xf32, #tpu.memory_space<vmem>>, vector<2x64xf32>
    %c3 = arith.constant 3 : index
    %c0_25 = arith.constant 0 : index
    %c0_26 = arith.constant 0 : index
    %26 = vector.load %arg4[%c3, %c0_25, %c0_26] : memref<25x64x128xf32, #tpu.memory_space<vmem>>, vector<1x64x128xf32>
    %27 = vector.shape_cast %26 : vector<1x64x128xf32> to vector<64x128xf32>
    %cst_27 = arith.constant dense<0.000000e+00> : vector<2x128xf32>
    %28 = tpu.matmul %25, %27, %cst_27 {dimension_numbers = #tpu.dot_dimension_numbers<[1], [0], [0], [1], [0, 0, 1, 1], [], []>} : vector<2x64xf32>, vector<64x128xf32>, vector<2x128xf32> -> vector<2x128xf32>
    %29 = arith.addf %24, %28 : vector<2x128xf32>
    %c8 = arith.constant 8 : index
    %c0_28 = arith.constant 0 : index
    %30 = vector.load %arg11[%c8, %c0_28] : memref<50x64xf32, #tpu.memory_space<vmem>>, vector<2x64xf32>
    %c4_29 = arith.constant 4 : index
    %c0_30 = arith.constant 0 : index
    %c0_31 = arith.constant 0 : index
    %31 = vector.load %arg4[%c4_29, %c0_30, %c0_31] : memref<25x64x128xf32, #tpu.memory_space<vmem>>, vector<1x64x128xf32>
    %32 = vector.shape_cast %31 : vector<1x64x128xf32> to vector<64x128xf32>
    %cst_32 = arith.constant dense<0.000000e+00> : vector<2x128xf32>
    %33 = tpu.matmul %30, %32, %cst_32 {dimension_numbers = #tpu.dot_dimension_numbers<[1], [0], [0], [1], [0, 0, 1, 1], [], []>} : vector<2x64xf32>, vector<64x128xf32>, vector<2x128xf32> -> vector<2x128xf32>
    %34 = arith.addf %29, %33 : vector<2x128xf32>
    %c10 = arith.constant 10 : index
    %c0_33 = arith.constant 0 : index
    %35 = vector.load %arg11[%c10, %c0_33] : memref<50x64xf32, #tpu.memory_space<vmem>>, vector<2x64xf32>
    %c5 = arith.constant 5 : index
    %c0_34 = arith.constant 0 : index
    %c0_35 = arith.constant 0 : index
    %36 = vector.load %arg4[%c5, %c0_34, %c0_35] : memref<25x64x128xf32, #tpu.memory_space<vmem>>, vector<1x64x128xf32>
    %37 = vector.shape_cast %36 : vector<1x64x128xf32> to vector<64x128xf32>
    %cst_36 = arith.constant dense<0.000000e+00> : vector<2x128xf32>
    %38 = tpu.matmul %35, %37, %cst_36 {dimension_numbers = #tpu.dot_dimension_numbers<[1], [0], [0], [1], [0, 0, 1, 1], [], []>} : vector<2x64xf32>, vector<64x128xf32>, vector<2x128xf32> -> vector<2x128xf32>
    %39 = arith.addf %34, %38 : vector<2x128xf32>
    %c12 = arith.constant 12 : index
    %c0_37 = arith.constant 0 : index
    %40 = vector.load %arg11[%c12, %c0_37] : memref<50x64xf32, #tpu.memory_space<vmem>>, vector<2x64xf32>
    %c6_38 = arith.constant 6 : index
    %c0_39 = arith.constant 0 : index
    %c0_40 = arith.constant 0 : index
    %41 = vector.load %arg4[%c6_38, %c0_39, %c0_40] : memref<25x64x128xf32, #tpu.memory_space<vmem>>, vector<1x64x128xf32>
    %42 = vector.shape_cast %41 : vector<1x64x128xf32> to vector<64x128xf32>
    %cst_41 = arith.constant dense<0.000000e+00> : vector<2x128xf32>
    %43 = tpu.matmul %40, %42, %cst_41 {dimension_numbers = #tpu.dot_dimension_numbers<[1], [0], [0], [1], [0, 0, 1, 1], [], []>} : vector<2x64xf32>, vector<64x128xf32>, vector<2x128xf32> -> vector<2x128xf32>
    %44 = arith.addf %39, %43 : vector<2x128xf32>
    %c14 = arith.constant 14 : index
    %c0_42 = arith.constant 0 : index
    %45 = vector.load %arg11[%c14, %c0_42] : memref<50x64xf32, #tpu.memory_space<vmem>>, vector<2x64xf32>
    %c7 = arith.constant 7 : index
    %c0_43 = arith.constant 0 : index
    %c0_44 = arith.constant 0 : index
    %46 = vector.load %arg4[%c7, %c0_43, %c0_44] : memref<25x64x128xf32, #tpu.memory_space<vmem>>, vector<1x64x128xf32>
    %47 = vector.shape_cast %46 : vector<1x64x128xf32> to vector<64x128xf32>
    %cst_45 = arith.constant dense<0.000000e+00> : vector<2x128xf32>
    %48 = tpu.matmul %45, %47, %cst_45 {dimension_numbers = #tpu.dot_dimension_numbers<[1], [0], [0], [1], [0, 0, 1, 1], [], []>} : vector<2x64xf32>, vector<64x128xf32>, vector<2x128xf32> -> vector<2x128xf32>
    %49 = arith.addf %44, %48 : vector<2x128xf32>
    %c16 = arith.constant 16 : index
    %c0_46 = arith.constant 0 : index
    %50 = vector.load %arg11[%c16, %c0_46] : memref<50x64xf32, #tpu.memory_space<vmem>>, vector<2x64xf32>
    %c8_47 = arith.constant 8 : index
    %c0_48 = arith.constant 0 : index
    %c0_49 = arith.constant 0 : index
    %51 = vector.load %arg4[%c8_47, %c0_48, %c0_49] : memref<25x64x128xf32, #tpu.memory_space<vmem>>, vector<1x64x128xf32>
    %52 = vector.shape_cast %51 : vector<1x64x128xf32> to vector<64x128xf32>
    %cst_50 = arith.constant dense<0.000000e+00> : vector<2x128xf32>
    %53 = tpu.matmul %50, %52, %cst_50 {dimension_numbers = #tpu.dot_dimension_numbers<[1], [0], [0], [1], [0, 0, 1, 1], [], []>} : vector<2x64xf32>, vector<64x128xf32>, vector<2x128xf32> -> vector<2x128xf32>
    %54 = arith.addf %49, %53 : vector<2x128xf32>
    %c18 = arith.constant 18 : index
    %c0_51 = arith.constant 0 : index
    %55 = vector.load %arg11[%c18, %c0_51] : memref<50x64xf32, #tpu.memory_space<vmem>>, vector<2x64xf32>
    %c9 = arith.constant 9 : index
    %c0_52 = arith.constant 0 : index
    %c0_53 = arith.constant 0 : index
    %56 = vector.load %arg4[%c9, %c0_52, %c0_53] : memref<25x64x128xf32, #tpu.memory_space<vmem>>, vector<1x64x128xf32>
    %57 = vector.shape_cast %56 : vector<1x64x128xf32> to vector<64x128xf32>
    %cst_54 = arith.constant dense<0.000000e+00> : vector<2x128xf32>
    %58 = tpu.matmul %55, %57, %cst_54 {dimension_numbers = #tpu.dot_dimension_numbers<[1], [0], [0], [1], [0, 0, 1, 1], [], []>} : vector<2x64xf32>, vector<64x128xf32>, vector<2x128xf32> -> vector<2x128xf32>
    %59 = arith.addf %54, %58 : vector<2x128xf32>
    %c20 = arith.constant 20 : index
    %c0_55 = arith.constant 0 : index
    %60 = vector.load %arg11[%c20, %c0_55] : memref<50x64xf32, #tpu.memory_space<vmem>>, vector<2x64xf32>
    %c10_56 = arith.constant 10 : index
    %c0_57 = arith.constant 0 : index
    %c0_58 = arith.constant 0 : index
    %61 = vector.load %arg4[%c10_56, %c0_57, %c0_58] : memref<25x64x128xf32, #tpu.memory_space<vmem>>, vector<1x64x128xf32>
    %62 = vector.shape_cast %61 : vector<1x64x128xf32> to vector<64x128xf32>
    %cst_59 = arith.constant dense<0.000000e+00> : vector<2x128xf32>
    %63 = tpu.matmul %60, %62, %cst_59 {dimension_numbers = #tpu.dot_dimension_numbers<[1], [0], [0], [1], [0, 0, 1, 1], [], []>} : vector<2x64xf32>, vector<64x128xf32>, vector<2x128xf32> -> vector<2x128xf32>
    %64 = arith.addf %59, %63 : vector<2x128xf32>
    %c22 = arith.constant 22 : index
    %c0_60 = arith.constant 0 : index
    %65 = vector.load %arg11[%c22, %c0_60] : memref<50x64xf32, #tpu.memory_space<vmem>>, vector<2x64xf32>
    %c11 = arith.constant 11 : index
    %c0_61 = arith.constant 0 : index
    %c0_62 = arith.constant 0 : index
    %66 = vector.load %arg4[%c11, %c0_61, %c0_62] : memref<25x64x128xf32, #tpu.memory_space<vmem>>, vector<1x64x128xf32>
    %67 = vector.shape_cast %66 : vector<1x64x128xf32> to vector<64x128xf32>
    %cst_63 = arith.constant dense<0.000000e+00> : vector<2x128xf32>
    %68 = tpu.matmul %65, %67, %cst_63 {dimension_numbers = #tpu.dot_dimension_numbers<[1], [0], [0], [1], [0, 0, 1, 1], [], []>} : vector<2x64xf32>, vector<64x128xf32>, vector<2x128xf32> -> vector<2x128xf32>
    %69 = arith.addf %64, %68 : vector<2x128xf32>
    %c24 = arith.constant 24 : index
    %c0_64 = arith.constant 0 : index
    %70 = vector.load %arg11[%c24, %c0_64] : memref<50x64xf32, #tpu.memory_space<vmem>>, vector<2x64xf32>
    %c12_65 = arith.constant 12 : index
    %c0_66 = arith.constant 0 : index
    %c0_67 = arith.constant 0 : index
    %71 = vector.load %arg4[%c12_65, %c0_66, %c0_67] : memref<25x64x128xf32, #tpu.memory_space<vmem>>, vector<1x64x128xf32>
    %72 = vector.shape_cast %71 : vector<1x64x128xf32> to vector<64x128xf32>
    %cst_68 = arith.constant dense<0.000000e+00> : vector<2x128xf32>
    %73 = tpu.matmul %70, %72, %cst_68 {dimension_numbers = #tpu.dot_dimension_numbers<[1], [0], [0], [1], [0, 0, 1, 1], [], []>} : vector<2x64xf32>, vector<64x128xf32>, vector<2x128xf32> -> vector<2x128xf32>
    %74 = arith.addf %69, %73 : vector<2x128xf32>
    %c26 = arith.constant 26 : index
    %c0_69 = arith.constant 0 : index
    %75 = vector.load %arg11[%c26, %c0_69] : memref<50x64xf32, #tpu.memory_space<vmem>>, vector<2x64xf32>
    %c13 = arith.constant 13 : index
    %c0_70 = arith.constant 0 : index
    %c0_71 = arith.constant 0 : index
    %76 = vector.load %arg4[%c13, %c0_70, %c0_71] : memref<25x64x128xf32, #tpu.memory_space<vmem>>, vector<1x64x128xf32>
    %77 = vector.shape_cast %76 : vector<1x64x128xf32> to vector<64x128xf32>
    %cst_72 = arith.constant dense<0.000000e+00> : vector<2x128xf32>
    %78 = tpu.matmul %75, %77, %cst_72 {dimension_numbers = #tpu.dot_dimension_numbers<[1], [0], [0], [1], [0, 0, 1, 1], [], []>} : vector<2x64xf32>, vector<64x128xf32>, vector<2x128xf32> -> vector<2x128xf32>
    %79 = arith.addf %74, %78 : vector<2x128xf32>
    %c28 = arith.constant 28 : index
    %c0_73 = arith.constant 0 : index
    %80 = vector.load %arg11[%c28, %c0_73] : memref<50x64xf32, #tpu.memory_space<vmem>>, vector<2x64xf32>
    %c14_74 = arith.constant 14 : index
    %c0_75 = arith.constant 0 : index
    %c0_76 = arith.constant 0 : index
    %81 = vector.load %arg4[%c14_74, %c0_75, %c0_76] : memref<25x64x128xf32, #tpu.memory_space<vmem>>, vector<1x64x128xf32>
    %82 = vector.shape_cast %81 : vector<1x64x128xf32> to vector<64x128xf32>
    %cst_77 = arith.constant dense<0.000000e+00> : vector<2x128xf32>
    %83 = tpu.matmul %80, %82, %cst_77 {dimension_numbers = #tpu.dot_dimension_numbers<[1], [0], [0], [1], [0, 0, 1, 1], [], []>} : vector<2x64xf32>, vector<64x128xf32>, vector<2x128xf32> -> vector<2x128xf32>
    %84 = arith.addf %79, %83 : vector<2x128xf32>
    %c30 = arith.constant 30 : index
    %c0_78 = arith.constant 0 : index
    %85 = vector.load %arg11[%c30, %c0_78] : memref<50x64xf32, #tpu.memory_space<vmem>>, vector<2x64xf32>
    %c15 = arith.constant 15 : index
    %c0_79 = arith.constant 0 : index
    %c0_80 = arith.constant 0 : index
    %86 = vector.load %arg4[%c15, %c0_79, %c0_80] : memref<25x64x128xf32, #tpu.memory_space<vmem>>, vector<1x64x128xf32>
    %87 = vector.shape_cast %86 : vector<1x64x128xf32> to vector<64x128xf32>
    %cst_81 = arith.constant dense<0.000000e+00> : vector<2x128xf32>
    %88 = tpu.matmul %85, %87, %cst_81 {dimension_numbers = #tpu.dot_dimension_numbers<[1], [0], [0], [1], [0, 0, 1, 1], [], []>} : vector<2x64xf32>, vector<64x128xf32>, vector<2x128xf32> -> vector<2x128xf32>
    %89 = arith.addf %84, %88 : vector<2x128xf32>
    %c32 = arith.constant 32 : index
    %c0_82 = arith.constant 0 : index
    %90 = vector.load %arg11[%c32, %c0_82] : memref<50x64xf32, #tpu.memory_space<vmem>>, vector<2x64xf32>
    %c16_83 = arith.constant 16 : index
    %c0_84 = arith.constant 0 : index
    %c0_85 = arith.constant 0 : index
    %91 = vector.load %arg4[%c16_83, %c0_84, %c0_85] : memref<25x64x128xf32, #tpu.memory_space<vmem>>, vector<1x64x128xf32>
    %92 = vector.shape_cast %91 : vector<1x64x128xf32> to vector<64x128xf32>
    %cst_86 = arith.constant dense<0.000000e+00> : vector<2x128xf32>
    %93 = tpu.matmul %90, %92, %cst_86 {dimension_numbers = #tpu.dot_dimension_numbers<[1], [0], [0], [1], [0, 0, 1, 1], [], []>} : vector<2x64xf32>, vector<64x128xf32>, vector<2x128xf32> -> vector<2x128xf32>
    %94 = arith.addf %89, %93 : vector<2x128xf32>
    %c34 = arith.constant 34 : index
    %c0_87 = arith.constant 0 : index
    %95 = vector.load %arg11[%c34, %c0_87] : memref<50x64xf32, #tpu.memory_space<vmem>>, vector<2x64xf32>
    %c17 = arith.constant 17 : index
    %c0_88 = arith.constant 0 : index
    %c0_89 = arith.constant 0 : index
    %96 = vector.load %arg4[%c17, %c0_88, %c0_89] : memref<25x64x128xf32, #tpu.memory_space<vmem>>, vector<1x64x128xf32>
    %97 = vector.shape_cast %96 : vector<1x64x128xf32> to vector<64x128xf32>
    %cst_90 = arith.constant dense<0.000000e+00> : vector<2x128xf32>
    %98 = tpu.matmul %95, %97, %cst_90 {dimension_numbers = #tpu.dot_dimension_numbers<[1], [0], [0], [1], [0, 0, 1, 1], [], []>} : vector<2x64xf32>, vector<64x128xf32>, vector<2x128xf32> -> vector<2x128xf32>
    %99 = arith.addf %94, %98 : vector<2x128xf32>
    %c36 = arith.constant 36 : index
    %c0_91 = arith.constant 0 : index
    %100 = vector.load %arg11[%c36, %c0_91] : memref<50x64xf32, #tpu.memory_space<vmem>>, vector<2x64xf32>
    %c18_92 = arith.constant 18 : index
    %c0_93 = arith.constant 0 : index
    %c0_94 = arith.constant 0 : index
    %101 = vector.load %arg4[%c18_92, %c0_93, %c0_94] : memref<25x64x128xf32, #tpu.memory_space<vmem>>, vector<1x64x128xf32>
    %102 = vector.shape_cast %101 : vector<1x64x128xf32> to vector<64x128xf32>
    %cst_95 = arith.constant dense<0.000000e+00> : vector<2x128xf32>
    %103 = tpu.matmul %100, %102, %cst_95 {dimension_numbers = #tpu.dot_dimension_numbers<[1], [0], [0], [1], [0, 0, 1, 1], [], []>} : vector<2x64xf32>, vector<64x128xf32>, vector<2x128xf32> -> vector<2x128xf32>
    %104 = arith.addf %99, %103 : vector<2x128xf32>
    %c38 = arith.constant 38 : index
    %c0_96 = arith.constant 0 : index
    %105 = vector.load %arg11[%c38, %c0_96] : memref<50x64xf32, #tpu.memory_space<vmem>>, vector<2x64xf32>
    %c19 = arith.constant 19 : index
    %c0_97 = arith.constant 0 : index
    %c0_98 = arith.constant 0 : index
    %106 = vector.load %arg4[%c19, %c0_97, %c0_98] : memref<25x64x128xf32, #tpu.memory_space<vmem>>, vector<1x64x128xf32>
    %107 = vector.shape_cast %106 : vector<1x64x128xf32> to vector<64x128xf32>
    %cst_99 = arith.constant dense<0.000000e+00> : vector<2x128xf32>
    %108 = tpu.matmul %105, %107, %cst_99 {dimension_numbers = #tpu.dot_dimension_numbers<[1], [0], [0], [1], [0, 0, 1, 1], [], []>} : vector<2x64xf32>, vector<64x128xf32>, vector<2x128xf32> -> vector<2x128xf32>
    %109 = arith.addf %104, %108 : vector<2x128xf32>
    %c40 = arith.constant 40 : index
    %c0_100 = arith.constant 0 : index
    %110 = vector.load %arg11[%c40, %c0_100] : memref<50x64xf32, #tpu.memory_space<vmem>>, vector<2x64xf32>
    %c20_101 = arith.constant 20 : index
    %c0_102 = arith.constant 0 : index
    %c0_103 = arith.constant 0 : index
    %111 = vector.load %arg4[%c20_101, %c0_102, %c0_103] : memref<25x64x128xf32, #tpu.memory_space<vmem>>, vector<1x64x128xf32>
    %112 = vector.shape_cast %111 : vector<1x64x128xf32> to vector<64x128xf32>
    %cst_104 = arith.constant dense<0.000000e+00> : vector<2x128xf32>
    %113 = tpu.matmul %110, %112, %cst_104 {dimension_numbers = #tpu.dot_dimension_numbers<[1], [0], [0], [1], [0, 0, 1, 1], [], []>} : vector<2x64xf32>, vector<64x128xf32>, vector<2x128xf32> -> vector<2x128xf32>
    %114 = arith.addf %109, %113 : vector<2x128xf32>
    %c42 = arith.constant 42 : index
    %c0_105 = arith.constant 0 : index
    %115 = vector.load %arg11[%c42, %c0_105] : memref<50x64xf32, #tpu.memory_space<vmem>>, vector<2x64xf32>
    %c21 = arith.constant 21 : index
    %c0_106 = arith.constant 0 : index
    %c0_107 = arith.constant 0 : index
    %116 = vector.load %arg4[%c21, %c0_106, %c0_107] : memref<25x64x128xf32, #tpu.memory_space<vmem>>, vector<1x64x128xf32>
    %117 = vector.shape_cast %116 : vector<1x64x128xf32> to vector<64x128xf32>
    %cst_108 = arith.constant dense<0.000000e+00> : vector<2x128xf32>
    %118 = tpu.matmul %115, %117, %cst_108 {dimension_numbers = #tpu.dot_dimension_numbers<[1], [0], [0], [1], [0, 0, 1, 1], [], []>} : vector<2x64xf32>, vector<64x128xf32>, vector<2x128xf32> -> vector<2x128xf32>
    %119 = arith.addf %114, %118 : vector<2x128xf32>
    %c44 = arith.constant 44 : index
    %c0_109 = arith.constant 0 : index
    %120 = vector.load %arg11[%c44, %c0_109] : memref<50x64xf32, #tpu.memory_space<vmem>>, vector<2x64xf32>
    %c22_110 = arith.constant 22 : index
    %c0_111 = arith.constant 0 : index
    %c0_112 = arith.constant 0 : index
    %121 = vector.load %arg4[%c22_110, %c0_111, %c0_112] : memref<25x64x128xf32, #tpu.memory_space<vmem>>, vector<1x64x128xf32>
    %122 = vector.shape_cast %121 : vector<1x64x128xf32> to vector<64x128xf32>
    %cst_113 = arith.constant dense<0.000000e+00> : vector<2x128xf32>
    %123 = tpu.matmul %120, %122, %cst_113 {dimension_numbers = #tpu.dot_dimension_numbers<[1], [0], [0], [1], [0, 0, 1, 1], [], []>} : vector<2x64xf32>, vector<64x128xf32>, vector<2x128xf32> -> vector<2x128xf32>
    %124 = arith.addf %119, %123 : vector<2x128xf32>
    %c46 = arith.constant 46 : index
    %c0_114 = arith.constant 0 : index
    %125 = vector.load %arg11[%c46, %c0_114] : memref<50x64xf32, #tpu.memory_space<vmem>>, vector<2x64xf32>
    %c23 = arith.constant 23 : index
    %c0_115 = arith.constant 0 : index
    %c0_116 = arith.constant 0 : index
    %126 = vector.load %arg4[%c23, %c0_115, %c0_116] : memref<25x64x128xf32, #tpu.memory_space<vmem>>, vector<1x64x128xf32>
    %127 = vector.shape_cast %126 : vector<1x64x128xf32> to vector<64x128xf32>
    %cst_117 = arith.constant dense<0.000000e+00> : vector<2x128xf32>
    %128 = tpu.matmul %125, %127, %cst_117 {dimension_numbers = #tpu.dot_dimension_numbers<[1], [0], [0], [1], [0, 0, 1, 1], [], []>} : vector<2x64xf32>, vector<64x128xf32>, vector<2x128xf32> -> vector<2x128xf32>
    %129 = arith.addf %124, %128 : vector<2x128xf32>
    %c48 = arith.constant 48 : index
    %c0_118 = arith.constant 0 : index
    %130 = vector.load %arg11[%c48, %c0_118] : memref<50x64xf32, #tpu.memory_space<vmem>>, vector<2x64xf32>
    %c24_119 = arith.constant 24 : index
    %c0_120 = arith.constant 0 : index
    %c0_121 = arith.constant 0 : index
    %131 = vector.load %arg4[%c24_119, %c0_120, %c0_121] : memref<25x64x128xf32, #tpu.memory_space<vmem>>, vector<1x64x128xf32>
    %132 = vector.shape_cast %131 : vector<1x64x128xf32> to vector<64x128xf32>
    %cst_122 = arith.constant dense<0.000000e+00> : vector<2x128xf32>
    %133 = tpu.matmul %130, %132, %cst_122 {dimension_numbers = #tpu.dot_dimension_numbers<[1], [0], [0], [1], [0, 0, 1, 1], [], []>} : vector<2x64xf32>, vector<64x128xf32>, vector<2x128xf32> -> vector<2x128xf32>
    %134 = arith.addf %129, %133 : vector<2x128xf32>
    %c0_123 = arith.constant 0 : index
    %c0_124 = arith.constant 0 : index
    %135 = vector.load %arg5[%c0_123, %c0_124] : memref<1x128xf32, #tpu.memory_space<vmem>>, vector<1x128xf32>
    %136 = vector.broadcast %135 : vector<1x128xf32> to vector<2x128xf32>
    %137 = arith.addf %134, %136 : vector<2x128xf32>
    %cst_125 = arith.constant 0.000000e+00 : f32
    %138 = vector.broadcast %cst_125 : f32 to vector<2x128xf32>
    %139 = arith.maximumf %137, %138 : vector<2x128xf32>
    %cst_126 = arith.constant dense<0.000000e+00> : vector<2xf32>
    %140 = vector.multi_reduction <add>, %139, %cst_126 [1] : vector<2x128xf32> to vector<2xf32>
    %141 = vector.shape_cast %140 : vector<2xf32> to vector<2x1xf32>
    %cst_127 = arith.constant 1.280000e+02 : f32
    %142 = vector.broadcast %cst_127 : f32 to vector<2x1xf32>
    %143 = arith.divf %141, %142 : vector<2x1xf32>
    %144 = vector.broadcast %143 : vector<2x1xf32> to vector<2x128xf32>
    %145 = arith.subf %139, %144 : vector<2x128xf32>
    %146 = arith.mulf %145, %145 : vector<2x128xf32>
    %cst_128 = arith.constant dense<0.000000e+00> : vector<2xf32>
    %147 = vector.multi_reduction <add>, %146, %cst_128 [1] : vector<2x128xf32> to vector<2xf32>
    %148 = vector.shape_cast %147 : vector<2xf32> to vector<2x1xf32>
    %cst_129 = arith.constant 1.280000e+02 : f32
    %149 = vector.broadcast %cst_129 : f32 to vector<2x1xf32>
    %150 = arith.divf %148, %149 : vector<2x1xf32>
    %151 = vector.broadcast %143 : vector<2x1xf32> to vector<2x128xf32>
    %152 = arith.subf %139, %151 : vector<2x128xf32>
    %cst_130 = arith.constant 9.99999974E-6 : f32
    %153 = vector.broadcast %cst_130 : f32 to vector<2x1xf32>
    %154 = arith.addf %150, %153 : vector<2x1xf32>
    %155 = math.rsqrt %154 : vector<2x1xf32>
    %156 = vector.broadcast %155 : vector<2x1xf32> to vector<2x128xf32>
    %157 = arith.mulf %152, %156 : vector<2x128xf32>
    %c0_131 = arith.constant 0 : index
    %c0_132 = arith.constant 0 : index
    %158 = vector.load %arg6[%c0_131, %c0_132] : memref<1x128xf32, #tpu.memory_space<vmem>>, vector<1x128xf32>
    %159 = vector.broadcast %158 : vector<1x128xf32> to vector<2x128xf32>
    %160 = arith.mulf %157, %159 : vector<2x128xf32>
    %c0_133 = arith.constant 0 : index
    %c0_134 = arith.constant 0 : index
    %161 = vector.load %arg7[%c0_133, %c0_134] : memref<1x128xf32, #tpu.memory_space<vmem>>, vector<1x128xf32>
    %162 = vector.broadcast %161 : vector<1x128xf32> to vector<2x128xf32>
    %163 = arith.addf %160, %162 : vector<2x128xf32>
    %c0_135 = arith.constant 0 : index
    %c0_136 = arith.constant 0 : index
    %164 = vector.load %arg8[%c0_135, %c0_136] : memref<128x15xf32, #tpu.memory_space<vmem>>, vector<128x15xf32>
    %cst_137 = arith.constant dense<0.000000e+00> : vector<2x15xf32>
    %165 = tpu.matmul %163, %164, %cst_137 {dimension_numbers = #tpu.dot_dimension_numbers<[1], [0], [0], [1], [0, 0, 1, 1], [], []>} : vector<2x128xf32>, vector<128x15xf32>, vector<2x15xf32> -> vector<2x15xf32>
    %c0_138 = arith.constant 0 : index
    %c0_139 = arith.constant 0 : index
    %166 = vector.load %arg9[%c0_138, %c0_139] : memref<1x15xf32, #tpu.memory_space<vmem>>, vector<1x15xf32>
    %167 = vector.broadcast %166 : vector<1x15xf32> to vector<2x15xf32>
    %168 = arith.addf %165, %167 : vector<2x15xf32>
    %c0_140 = arith.constant 0 : index
    %c0_141 = arith.constant 0 : index
    %169 = vector.load %arg10[%c0_140, %c0_141] : memref<2x15xf32, #tpu.memory_space<vmem>>, vector<2x15xf32>
    tpu.vector_store %arg10[%c0_140, %c0_141], %168 {strides = array<i32>} : memref<2x15xf32, #tpu.memory_space<vmem>>, vector<2x15xf32>,
    return
  }
  func.func @transform_0(%arg0: i32) -> (i32, i32) {
    %c0_i32 = arith.constant 0 : i32
    %c0_i32_0 = arith.constant 0 : i32
    %c0_i32_1 = arith.constant 0 : i32
    return %c0_i32, %c0_i32_0 : i32, i32
  }
  func.func @transform_1(%arg0: i32) -> (i32, i32) {
    %c0_i32 = arith.constant 0 : i32
    %c0_i32_0 = arith.constant 0 : i32
    %c0_i32_1 = arith.constant 0 : i32
    return %c0_i32, %c0_i32_0 : i32, i32
  }
  func.func @transform_2(%arg0: i32) -> (i32, i32) {
    %c0_i32 = arith.constant 0 : i32
    %c0_i32_0 = arith.constant 0 : i32
    %c0_i32_1 = arith.constant 0 : i32
    return %c0_i32, %c0_i32_0 : i32, i32
  }
  func.func @transform_3(%arg0: i32) -> (i32, i32, i32) {
    %c0_i32 = arith.constant 0 : i32
    %c0_i32_0 = arith.constant 0 : i32
    %c0_i32_1 = arith.constant 0 : i32
    %c0_i32_2 = arith.constant 0 : i32
    return %c0_i32, %c0_i32_0, %c0_i32_1 : i32, i32, i32
  }
  func.func @transform_4(%arg0: i32) -> (i32, i32) {
    %c0_i32 = arith.constant 0 : i32
    %c0_i32_0 = arith.constant 0 : i32
    %c0_i32_1 = arith.constant 0 : i32
    return %c0_i32, %c0_i32_0 : i32, i32
  }
  func.func @transform_5(%arg0: i32) -> (i32, i32) {
    %c0_i32 = arith.constant 0 : i32
    %c0_i32_0 = arith.constant 0 : i32
    %c0_i32_1 = arith.constant 0 : i32
    return %c0_i32, %c0_i32_0 : i32, i32
  }
  func.func @transform_6(%arg0: i32) -> (i32, i32) {
    %c0_i32 = arith.constant 0 : i32
    %c0_i32_0 = arith.constant 0 : i32
    %c0_i32_1 = arith.constant 0 : i32
    return %c0_i32, %c0_i32_0 : i32, i32
  }
  func.func @transform_7(%arg0: i32) -> (i32, i32) {
    %c0_i32 = arith.constant 0 : i32
    %c0_i32_0 = arith.constant 0 : i32
    %c0_i32_1 = arith.constant 0 : i32
    return %c0_i32, %c0_i32_0 : i32, i32
  }
  func.func @transform_8(%arg0: i32) -> (i32, i32) {
    %c0_i32 = arith.constant 0 : i32
    %c0_i32_0 = arith.constant 0 : i32
    %c0_i32_1 = arith.constant 0 : i32
    return %c0_i32, %c0_i32_0 : i32, i32
  }
  func.func @transform_9(%arg0: i32) -> (i32, i32) {
    %c0_i32 = arith.constant 0 : i32
    %c0_i32_0 = arith.constant 0 : i32
    %c0_i32_1 = arith.constant 0 : i32
    return %c0_i32, %c0_i32_0 : i32, i32
  }
}

</mosaic_0001>

<bundles_post_ra>
// kernel: coinrun_actor_forward.3
= control target key start
LH: loop header
LB: loop body
LE: loop exit
PB: predicated region body
PF: predicated region fallthrough
CT: control target
= control target key end

     0   :  { %s2008_s12 = smov 0   ;;  %s2010_s13 = smov 0   ;;  %s2819_s0 = inlined_call_operand.vmem [shape: f32[1922,27], index: 0, kind: input, shape index: {}]   ;;  %s2820_s1 = inlined_call_operand.vmem [shape: f32[27,32], index: 1, kind: input, shape index: {}]   ;;  %s2821_s2 = inlined_call_operand.vmem [shape: f32[1,32], index: 2, kind: input, shape index: {}]   ;;  %s2822_s3 = inlined_call_operand.vmem [shape: f32[1922,32], index: 3, kind: output, shape index: {}]  }
   0x1   :  { %s2012_s14 = smov 0  }
   0x2 LB: > { %s2021_s15 = sadd.s32 4294967295, %s1954_s14   ;;  %s2023_s16 = sadd.s32 1, %s1954_s14   ;;  %s1954_s14 = sphi %s2012_s14, %s2831_s14   ;;  %s1950_s13 = sphi %s2010_s13, %s2830_s13   ;;  %s1946_s12 = sphi %s2008_s12, %s2829_s12  }
   0x3   : > { %s85_s17 = ssub.s32 %s1954_s14, %s2023_s16  ;;  %s88_s18 = sadd.s32 1, %s1950_s13 }
   0x4   : > { %p86_p0 = scmp.eq.s32.totalorder %s85_s17, 0  ;;  %p98_p1 = scmp.ne.s32.totalorder %s1950_s13, %s1946_s12 }
   0x5   : > { %p99_p2 = scmp.eq.s32.totalorder %s2021_s15, 1  ;;  %p1655_p3 = scmp.ge.s32.totalorder %s1954_s14, 1 }
   0x6   : > { %s2031_s19 = scalar_select %p86_p0, %s1950_s13, %s88_s18  }
   0x7   : > { %p2033_p4 = por %p99_p2, %p98_p1  ;;  %p146_p5 = scmp.lt.s32.totalorder %s1954_s14, 3 }
   0x9   : > { %p147_p6 = pnand %p1655_p3, %p146_p5 }
   0xa   : > { %s2044_s25 = smul.u32 (!%p147_p6), 121, %s2021_s15  ;;  %s170_s8 = sand.u32 (!%p147_p6), 1, %s1946_s12  }
   0xb   : > { %150 = sbr.rel (%p147_p6) target bundleno = 466 (0x1d2), region = 32 }
   0xc   : > { %p178_p7 = scmp.lt.s32.totalorder (!%p147_p6), %s2044_s25, 240  ;;  %s1809_s11 = smul.u32 (!%p147_p6), 968, %s170_s8 }
   0xe   : > { %s2203_s12 = scalar_lea.vmem (!%p147_p6), [#allocation2], %s1809_s11  }
  0x10   : > { %v316_v0 = vld [vmem:[%s2820_s1 + $0x18] sm:$0x7]  ;;  %vm685_vm0 = vcmask 1042432   ;;  %v315_v1 = vld [vmem:[%s2820_s1 + $0x10] sm:$0xff]  ;;  %v314_v2 = vld [vmem:[%s2820_s1 + $0x8] sm:$0xff]  ;;  %s179_s30 = scalar_select %p178_p7, %s2044_s25, 240 }
  0x11   : > { %1798 = vmatpush.msk.msra.mxu2 %vm685_vm0, %v316_v0  ;;  %1799 = vmatpush.msk.msra.mxu3 %vm685_vm0, %v316_v0  ;;  %v313_v3 = vld [vmem:[%s2820_s1] sm:$0xff]  ;;  %vm321_vm1 = vcmask 220160   ;;  %vm1190_vm2 = vcmask 261120   ;;  %s1320_s18 = ssub.s32 (%p2033_p4), 241, %s2044_s25  ;;  %s1794_s21 = smul.u32 (%p2033_p4), 968, %s2021_s15 }
  0x12   : > { %1657 = vmatpush.msk.msra.mxu0 %vm685_vm0, %v316_v0  ;;  %1797 = vmatpush.msk.msra.mxu1 %vm685_vm0, %v316_v0  ;;  %s1656_s4 = sshll.u32 %s179_s30, 3  ;;  %p1321_p8 = scmp.lt.s32.totalorder (%p2033_p4), %s1320_s18, 121 }
  0x13   : > { %1801 = vmatpush.msra.mxu2 %v315_v1  ;;  %1802 = vmatpush.msra.mxu3 %v315_v1  ;;  %s2057_s7 = scalar_lea.vmem %s2819_s0, %s1656_s4  ;;  %s2684_s24 = scalar_lea.vmem (%p2033_p4), %s2822_s3, %s1794_s21  }
  0x14   : > { %702 = vmatpush.msra.mxu0 %v315_v1  ;;  %1800 = vmatpush.msra.mxu1 %v315_v1  ;;  %v252_v4 = vld [vmem:[%s2057_s7 + $0x1e0] sm:$0xff]  ;;  %v283_v5 = vld [vmem:[%s2057_s7 + $0x2d8] sm:$0xff]  ;;  %v222_v7 = vld [vmem:[%s2057_s7 + $0xf0] sm:$0xff] }
  0x15   : > { %1804 = vmatpush.msra.mxu2 %v314_v2  ;;  %1805 = vmatpush.msra.mxu3 %v314_v2  ;;  %v192_v6 = vld [vmem:[%s2057_s7] sm:$0xff]  ;;  %v253_v8 = vld [vmem:[%s2057_s7 + $0x1e8] sm:$0xff]  ;;  %v223_v11 = vld [vmem:[%s2057_s7 + $0xf8] sm:$0xff] }
  0x16   : > { %703 = vmatpush.msra.mxu0 %v314_v2  ;;  %1803 = vmatpush.msra.mxu1 %v314_v2  ;;  %v284_v9 = vld [vmem:[%s2057_s7 + $0x2e0] sm:$0xff]  ;;  %v193_v10 = vld [vmem:[%s2057_s7 + $0x8] sm:$0xff]  ;;  %v254_v12 = vld [vmem:[%s2057_s7 + $0x1f0] sm:$0xff] }
  0x17   : > { %1807 = vmatpush.msra.mxu2 %v313_v3  ;;  %1808 = vmatpush.msra.mxu3 %v313_v3  ;;  %v285_v13 = vld [vmem:[%s2057_s7 + $0x2e8] sm:$0xff]  ;;  %v194_v14 = vld [vmem:[%s2057_s7 + $0x10] sm:$0xff]  ;;  %v224_v15 = vld [vmem:[%s2057_s7 + $0x100] sm:$0xff] }
  0x18   : > { %704 = vmatpush.msra.mxu0 %v313_v3  ;;  %1806 = vmatpush.msra.mxu1 %v313_v3  ;;  %v255_v16 = vld [vmem:[%s2057_s7 + $0x1f8] sm:$0xff]  ;;  %v286_v17 = vld [vmem:[%s2057_s7 + $0x2f0] sm:$0xff]  ;;  %v225_v19 = vld [vmem:[%s2057_s7 + $0x108] sm:$0xff] }
  0x19   : > { %1718 = vmatmul.msk.f32.vlgmr.msra.gmra.mxu2 %vm321_vm1, %v252_v4  ;;  %1749 = vmatmul.msk.f32.vlgmr.msra.gmra.mxu3 %vm321_vm1, %v283_v5  ;;  %v195_v18 = vld [vmem:[%s2057_s7 + $0x18] sm:$0xff]  ;;  %v256_v20 = vld [vmem:[%s2057_s7 + $0x200] sm:$0xff]  ;;  %v226_v23 = vld [vmem:[%s2057_s7 + $0x110] sm:$0xff] }
  0x1a   : > { %1658 = vmatmul.msk.f32.vlgmr.msra.gmra.mxu0 %vm321_vm1, %v192_v6  ;;  %1688 = vmatmul.msk.f32.vlgmr.msra.gmra.mxu1 %vm321_vm1, %v222_v7  ;;  %v287_v21 = vld [vmem:[%s2057_s7 + $0x2f8] sm:$0xff]  ;;  %v196_v22 = vld [vmem:[%s2057_s7 + $0x20] sm:$0xff]  ;;  %v257_v24 = vld [vmem:[%s2057_s7 + $0x208] sm:$0xff] }
  0x1b   : > { %v288_v25 = vld [vmem:[%s2057_s7 + $0x300] sm:$0xff]  ;;  %v197_v26 = vld [vmem:[%s2057_s7 + $0x28] sm:$0xff]  ;;  %v227_v27 = vld [vmem:[%s2057_s7 + $0x118] sm:$0xff] }
  0x1c   : > { %v258_v28 = vld [vmem:[%s2057_s7 + $0x210] sm:$0xff]  ;;  %v289_v29 = vld [vmem:[%s2057_s7 + $0x308] sm:$0xff]  ;;  %v228_v31 = vld [vmem:[%s2057_s7 + $0x120] sm:$0xff] }
  0x1d   : > { %v198_v30 = vld [vmem:[%s2057_s7 + $0x30] sm:$0xff]  ;;  %v259_v32 = vld [vmem:[%s2057_s7 + $0x218] sm:$0xff]  ;;  %v229_v35 = vld [vmem:[%s2057_s7 + $0x128] sm:$0xff] }
  0x1e   : > { %v290_v33 = vld [vmem:[%s2057_s7 + $0x310] sm:$0xff]  ;;  %v199_v34 = vld [vmem:[%s2057_s7 + $0x38] sm:$0xff]  ;;  %v260_v36 = vld [vmem:[%s2057_s7 + $0x220] sm:$0xff] }
  0x1f   : > { %v291_v37 = vld [vmem:[%s2057_s7 + $0x318] sm:$0xff]  ;;  %v200_v38 = vld [vmem:[%s2057_s7 + $0x40] sm:$0xff]  ;;  %v230_v39 = vld [vmem:[%s2057_s7 + $0x130] sm:$0xff] }
  0x20   : > { %v261_v40 = vld [vmem:[%s2057_s7 + $0x228] sm:$0xff]  ;;  %v292_v41 = vld [vmem:[%s2057_s7 + $0x320] sm:$0xff]  ;;  %v231_v43 = vld [vmem:[%s2057_s7 + $0x138] sm:$0xff] }
  0x21   : > { %1719 = vmatmul.msk.f32.gmra.mxu2 %vm321_vm1, %v253_v8  ;;  %1750 = vmatmul.msk.f32.gmra.mxu3 %vm321_vm1, %v284_v9  ;;  %v201_v42 = vld [vmem:[%s2057_s7 + $0x48] sm:$0xff]  ;;  %v262_v44 = vld [vmem:[%s2057_s7 + $0x230] sm:$0xff]  ;;  %v232_v47 = vld [vmem:[%s2057_s7 + $0x140] sm:$0xff] }
  0x22   : > { %1659 = vmatmul.msk.f32.gmra.mxu0 %vm321_vm1, %v193_v10  ;;  %1689 = vmatmul.msk.f32.gmra.mxu1 %vm321_vm1, %v223_v11  ;;  %v293_v45 = vld [vmem:[%s2057_s7 + $0x328] sm:$0xff]  ;;  %v202_v46 = vld [vmem:[%s2057_s7 + $0x50] sm:$0xff]  ;;  %v263_v48 = vld [vmem:[%s2057_s7 + $0x238] sm:$0xff] }
  0x23   : > { %v294_v49 = vld [vmem:[%s2057_s7 + $0x330] sm:$0xff]  ;;  %v203_v50 = vld [vmem:[%s2057_s7 + $0x58] sm:$0xff]  ;;  %v233_v51 = vld [vmem:[%s2057_s7 + $0x148] sm:$0xff] }
  0x24   : > { %v264_v52 = vld [vmem:[%s2057_s7 + $0x240] sm:$0xff]  ;;  %v295_v53 = vld [vmem:[%s2057_s7 + $0x338] sm:$0xff]  ;;  %v234_v55 = vld [vmem:[%s2057_s7 + $0x150] sm:$0xff] }
  0x25   : > { %v204_v54 = vld [vmem:[%s2057_s7 + $0x60] sm:$0xff]  ;;  %v265_v56 = vld [vmem:[%s2057_s7 + $0x248] sm:$0xff]  ;;  %v235_v59 = vld [vmem:[%s2057_s7 + $0x158] sm:$0xff] }
  0x26   : > { %v296_v57 = vld [vmem:[%s2057_s7 + $0x340] sm:$0xff]  ;;  %v205_v58 = vld [vmem:[%s2057_s7 + $0x68] sm:$0xff]  ;;  %v266_v60 = vld [vmem:[%s2057_s7 + $0x250] sm:$0xff] }
  0x27   : > { %v297_v61 = vld [vmem:[%s2057_s7 + $0x348] sm:$0xff]  ;;  %v206_v62 = vld [vmem:[%s2057_s7 + $0x70] sm:$0xff]  ;;  %v236_v63 = vld [vmem:[%s2057_s7 + $0x160] sm:$0xff] }
  0x28   : > { %v267_v0 = vld [vmem:[%s2057_s7 + $0x258] sm:$0xff]  ;;  %v298_v1 = vld [vmem:[%s2057_s7 + $0x350] sm:$0xff]  ;;  %v237_v3 = vld [vmem:[%s2057_s7 + $0x168] sm:$0xff] }
  0x29   : > { %1720 = vmatmul.msk.f32.gmra.mxu2 %vm321_vm1, %v254_v12  ;;  %1751 = vmatmul.msk.f32.gmra.mxu3 %vm321_vm1, %v285_v13  ;;  %v207_v2 = vld [vmem:[%s2057_s7 + $0x78] sm:$0xff]  ;;  %v268_v4 = vld [vmem:[%s2057_s7 + $0x260] sm:$0xff]  ;;  %v238_v10 = vld [vmem:[%s2057_s7 + $0x170] sm:$0xff] }
  0x2a   : > { %1660 = vmatmul.msk.f32.gmra.mxu0 %vm321_vm1, %v194_v14  ;;  %1690 = vmatmul.msk.f32.gmra.mxu1 %vm321_vm1, %v224_v15  ;;  %v2192_v5 = vld [vmem:[%s2821_s2] ss:$0 sm:$0xff]  ;;  %v299_v6 = vld [vmem:[%s2057_s7 + $0x358] sm:$0xff] }
  0x2b   : > { %v208_v9 = vld [vmem:[%s2057_s7 + $0x80] sm:$0xff] }
  0x31   : > { %1721 = vmatmul.msk.f32.gmra.mxu2 %vm321_vm1, %v255_v16  ;;  %1752 = vmatmul.msk.f32.gmra.mxu3 %vm321_vm1, %v286_v17 }
  0x32   : > { %1661 = vmatmul.msk.f32.gmra.mxu0 %vm321_vm1, %v195_v18  ;;  %1691 = vmatmul.msk.f32.gmra.mxu1 %vm321_vm1, %v225_v19  ;;  %v269_v19 = vld [vmem:[%s2057_s7 + $0x268] sm:$0xff] }
  0x39   : > { %1722 = vmatmul.msk.f32.gmra.mxu2 %vm321_vm1, %v256_v20  ;;  %1753 = vmatmul.msk.f32.gmra.mxu3 %vm321_vm1, %v287_v21  ;;  %v300_v20 = vld [vmem:[%s2057_s7 + $0x360] sm:$0xff] }
  0x3a   : > { %1662 = vmatmul.msk.f32.gmra.mxu0 %vm321_vm1, %v196_v22  ;;  %1692 = vmatmul.msk.f32.gmra.mxu1 %vm321_vm1, %v226_v23 }
  0x41   : > { %1723 = vmatmul.msk.f32.gmra.mxu2 %vm321_vm1, %v257_v24  ;;  %1754 = vmatmul.msk.f32.gmra.mxu3 %vm321_vm1, %v288_v25  ;;  %v209_v25 = vld [vmem:[%s2057_s7 + $0x88] sm:$0xff] }
  0x42   : > { %1663 = vmatmul.msk.f32.gmra.mxu0 %vm321_vm1, %v197_v26  ;;  %1693 = vmatmul.msk.f32.gmra.mxu1 %vm321_vm1, %v227_v27  ;;  %v239_v26 = vld [vmem:[%s2057_s7 + $0x178] sm:$0xff] }
  0x49   : > { %1724 = vmatmul.msk.f32.gmra.mxu2 %vm321_vm1, %v258_v28  ;;  %1755 = vmatmul.msk.f32.gmra.mxu3 %vm321_vm1, %v289_v29 }
  0x4a   : > { %1664 = vmatmul.msk.f32.gmra.mxu0 %vm321_vm1, %v198_v30  ;;  %1694 = vmatmul.msk.f32.gmra.mxu1 %vm321_vm1, %v228_v31 }
  0x51   : > { %1725 = vmatmul.msk.f32.gmra.mxu2 %vm321_vm1, %v259_v32  ;;  %1756 = vmatmul.msk.f32.gmra.mxu3 %vm321_vm1, %v290_v33 }
  0x52   : > { %1665 = vmatmul.msk.f32.gmra.mxu0 %vm321_vm1, %v199_v34  ;;  %1695 = vmatmul.msk.f32.gmra.mxu1 %vm321_vm1, %v229_v35  ;;  %v270_v35 = vld [vmem:[%s2057_s7 + $0x270] sm:$0xff] }
  0x59   : > { %1726 = vmatmul.msk.f32.gmra.mxu2 %vm321_vm1, %v260_v36  ;;  %1757 = vmatmul.msk.f32.gmra.mxu3 %vm321_vm1, %v291_v37  ;;  %v301_v36 = vld [vmem:[%s2057_s7 + $0x368] sm:$0xff] }
  0x5a   : > { %1666 = vmatmul.msk.f32.gmra.mxu0 %vm321_vm1, %v200_v38  ;;  %1696 = vmatmul.msk.f32.gmra.mxu1 %vm321_vm1, %v230_v39 }
  0x61   : > { %1727 = vmatmul.msk.f32.gmra.mxu2 %vm321_vm1, %v261_v40  ;;  %1758 = vmatmul.msk.f32.gmra.mxu3 %vm321_vm1, %v292_v41  ;;  %v210_v41 = vld [vmem:[%s2057_s7 + $0x90] sm:$0xff] }
  0x62   : > { %1667 = vmatmul.msk.f32.gmra.mxu0 %vm321_vm1, %v201_v42  ;;  %1697 = vmatmul.msk.f32.gmra.mxu1 %vm321_vm1, %v231_v43  ;;  %v240_v42 = vld [vmem:[%s2057_s7 + $0x180] sm:$0xff] }
  0x69   : > { %1728 = vmatmul.msk.f32.gmra.mxu2 %vm321_vm1, %v262_v44  ;;  %1759 = vmatmul.msk.f32.gmra.mxu3 %vm321_vm1, %v293_v45 }
  0x6a   : > { %1668 = vmatmul.msk.f32.gmra.mxu0 %vm321_vm1, %v202_v46  ;;  %1698 = vmatmul.msk.f32.gmra.mxu1 %vm321_vm1, %v232_v47 }
  0x71   : > { %1729 = vmatmul.msk.f32.gmra.mxu2 %vm321_vm1, %v263_v48  ;;  %1760 = vmatmul.msk.f32.gmra.mxu3 %vm321_vm1, %v294_v49 }
  0x72   : > { %1669 = vmatmul.msk.f32.gmra.mxu0 %vm321_vm1, %v203_v50  ;;  %1699 = vmatmul.msk.f32.gmra.mxu1 %vm321_vm1, %v233_v51  ;;  %v271_v51 = vld [vmem:[%s2057_s7 + $0x278] sm:$0xff] }
  0x79   : > { %1730 = vmatmul.msk.f32.gmra.mxu2 %vm321_vm1, %v264_v52  ;;  %1761 = vmatmul.msk.f32.gmra.mxu3 %vm321_vm1, %v295_v53  ;;  %v302_v52 = vld [vmem:[%s2057_s7 + $0x370] sm:$0xff] }
  0x7a   : > { %1670 = vmatmul.msk.f32.gmra.mxu0 %vm321_vm1, %v204_v54  ;;  %1700 = vmatmul.msk.f32.gmra.mxu1 %vm321_vm1, %v234_v55 }
  0x81   : > { %1731 = vmatmul.msk.f32.gmra.mxu2 %vm321_vm1, %v265_v56  ;;  %1762 = vmatmul.msk.f32.gmra.mxu3 %vm321_vm1, %v296_v57  ;;  %v211_v57 = vld [vmem:[%s2057_s7 + $0x98] sm:$0xff] }
  0x82   : > { %1671 = vmatmul.msk.f32.gmra.mxu0 %vm321_vm1, %v205_v58  ;;  %1701 = vmatmul.msk.f32.gmra.mxu1 %vm321_vm1, %v235_v59  ;;  %v241_v58 = vld [vmem:[%s2057_s7 + $0x188] sm:$0xff] }
  0x89   : > { %1732 = vmatmul.msk.f32.gmra.mxu2 %vm321_vm1, %v266_v60  ;;  %1763 = vmatmul.msk.f32.gmra.mxu3 %vm321_vm1, %v297_v61 }
  0x8a   : > { %1672 = vmatmul.msk.f32.gmra.mxu0 %vm321_vm1, %v206_v62  ;;  %1702 = vmatmul.msk.f32.gmra.mxu1 %vm321_vm1, %v236_v63 }
  0x91   : > { %1733 = vmatmul.msk.f32.gmra.mxu2 %vm321_vm1, %v267_v0  ;;  %1764 = vmatmul.msk.f32.gmra.mxu3 %vm321_vm1, %v298_v1 }
  0x92   : > { %1673 = vmatmul.msk.f32.gmra.mxu0 %vm321_vm1, %v207_v2  ;;  %1703 = vmatmul.msk.f32.gmra.mxu1 %vm321_vm1, %v237_v3  ;;  %v272_v3 = vld [vmem:[%s2057_s7 + $0x280] sm:$0xff] }
  0x97   : > { %v706_v7 = vpop.f32.mrf.mxu0  ;;  %v796_v8 = vpop.f32.mrf.mxu1 }
  0x98   : > { %v707_v11 = vadd.f32 %v2192_v5, %v706_v7  ;;  %v797_v12 = vadd.f32 %v2192_v5, %v796_v8 }
  0x99   : > { %1734 = vmatmul.msk.f32.gmra.mxu2 %vm321_vm1, %v268_v4  ;;  %1765 = vmatmul.msk.f32.gmra.mxu3 %vm321_vm1, %v299_v6  ;;  %v303_v4 = vld [vmem:[%s2057_s7 + $0x378] sm:$0xff] }
  0x9a   : > { %v1069_v13 = vmax.f32 %v707_v11, 0.0  ;;  %v1099_v14 = vmax.f32 %v797_v12, 0.0  ;;  %1674 = vmatmul.msk.f32.gmra.mxu0 %vm321_vm1, %v208_v9  ;;  %1704 = vmatmul.msk.f32.gmra.mxu1 %vm321_vm1, %v238_v10  ;;  %v212_v10 = vld [vmem:[%s2057_s7 + $0xa0] sm:$0xff]  ;;  %v242_v11 = vld [vmem:[%s2057_s7 + $0x190] sm:$0xff] }
  0x9c   : > { %v886_v15 = vpop.f32.mrf.mxu2  ;;  %1191 = vst.msk [vmem:[%s2203_s12] sm:$0xff] %vm1190_vm2, %v1069_v13  ;;  %v979_v16 = vpop.f32.mrf.mxu3 }
  0x9d   : > { %v887_v17 = vadd.f32 %v2192_v5, %v886_v15  ;;  %1221 = vst.msk [vmem:[%s2203_s12 + $0xf0] sm:$0xff] %vm1190_vm2, %v1099_v14  ;;  %v980_v18 = vadd.f32 %v2192_v5, %v979_v16 }
  0x9f   : > { %v1129_v21 = vmax.f32 %v887_v17, 0.0  ;;  %v1160_v22 = vmax.f32 %v980_v18, 0.0  ;;  %v709_v23 = vpop.f32.mrf.mxu0  ;;  %v799_v24 = vpop.f32.mrf.mxu1 }
  0xa0   : > { %v710_v27 = vadd.f32 %v2192_v5, %v709_v23  ;;  %v800_v28 = vadd.f32 %v2192_v5, %v799_v24 }
  0xa1   : > { %1251 = vst.msk [vmem:[%s2203_s12 + $0x1e0] sm:$0xff] %vm1190_vm2, %v1129_v21  ;;  %1735 = vmatmul.msk.f32.gmra.mxu2 %vm321_vm1, %v269_v19  ;;  %1766 = vmatmul.msk.f32.gmra.mxu3 %vm321_vm1, %v300_v20  ;;  %v273_v20 = vld [vmem:[%s2057_s7 + $0x288] sm:$0xff]  ;;  %v304_v21 = vld [vmem:[%s2057_s7 + $0x380] sm:$0xff] }
  0xa2   : > { %1282 = vst.msk [vmem:[%s2203_s12 + $0x2d8] sm:$0xff] %vm1190_vm2, %v1160_v22  ;;  %v1070_v29 = vmax.f32 %v710_v27, 0.0  ;;  %v1100_v30 = vmax.f32 %v800_v28, 0.0  ;;  %1675 = vmatmul.msk.f32.gmra.mxu0 %vm321_vm1, %v209_v25  ;;  %1705 = vmatmul.msk.f32.gmra.mxu1 %vm321_vm1, %v239_v26  ;;  %v213_v26 = vld [vmem:[%s2057_s7 + $0xa8] sm:$0xff]  ;;  %v243_v27 = vld [vmem:[%s2057_s7 + $0x198] sm:$0xff] }
  0xa4   : > { %v889_v31 = vpop.f32.mrf.mxu2  ;;  %1192 = vst.msk [vmem:[%s2203_s12 + $0x8] sm:$0xff] %vm1190_vm2, %v1070_v29  ;;  %v982_v32 = vpop.f32.mrf.mxu3 }
  0xa5   : > { %v890_v33 = vadd.f32 %v2192_v5, %v889_v31  ;;  %1222 = vst.msk [vmem:[%s2203_s12 + $0xf8] sm:$0xff] %vm1190_vm2, %v1100_v30  ;;  %v983_v34 = vadd.f32 %v2192_v5, %v982_v32 }
  0xa7   : > { %v1130_v37 = vmax.f32 %v890_v33, 0.0  ;;  %v1161_v38 = vmax.f32 %v983_v34, 0.0  ;;  %v712_v39 = vpop.f32.mrf.mxu0  ;;  %v802_v40 = vpop.f32.mrf.mxu1 }
  0xa8   : > { %v713_v43 = vadd.f32 %v2192_v5, %v712_v39  ;;  %v803_v44 = vadd.f32 %v2192_v5, %v802_v40 }
  0xa9   : > { %1252 = vst.msk [vmem:[%s2203_s12 + $0x1e8] sm:$0xff] %vm1190_vm2, %v1130_v37  ;;  %1736 = vmatmul.msk.f32.gmra.mxu2 %vm321_vm1, %v270_v35  ;;  %1767 = vmatmul.msk.f32.gmra.mxu3 %vm321_vm1, %v301_v36  ;;  %v274_v36 = vld [vmem:[%s2057_s7 + $0x290] sm:$0xff]  ;;  %v305_v37 = vld [vmem:[%s2057_s7 + $0x388] sm:$0xff] }
  0xaa   : > { %1283 = vst.msk [vmem:[%s2203_s12 + $0x2e0] sm:$0xff] %vm1190_vm2, %v1161_v38  ;;  %v1071_v45 = vmax.f32 %v713_v43, 0.0  ;;  %v1101_v46 = vmax.f32 %v803_v44, 0.0  ;;  %1676 = vmatmul.msk.f32.gmra.mxu0 %vm321_vm1, %v210_v41  ;;  %1706 = vmatmul.msk.f32.gmra.mxu1 %vm321_vm1, %v240_v42  ;;  %v214_v42 = vld [vmem:[%s2057_s7 + $0xb0] sm:$0xff]  ;;  %v244_v43 = vld [vmem:[%s2057_s7 + $0x1a0] sm:$0xff] }
  0xac   : > { %v892_v47 = vpop.f32.mrf.mxu2  ;;  %1193 = vst.msk [vmem:[%s2203_s12 + $0x10] sm:$0xff] %vm1190_vm2, %v1071_v45  ;;  %v985_v48 = vpop.f32.mrf.mxu3 }
  0xad   : > { %v893_v49 = vadd.f32 %v2192_v5, %v892_v47  ;;  %1223 = vst.msk [vmem:[%s2203_s12 + $0x100] sm:$0xff] %vm1190_vm2, %v1101_v46  ;;  %v986_v50 = vadd.f32 %v2192_v5, %v985_v48 }
  0xaf   : > { %v1131_v53 = vmax.f32 %v893_v49, 0.0  ;;  %v1162_v54 = vmax.f32 %v986_v50, 0.0  ;;  %v715_v55 = vpop.f32.mrf.mxu0  ;;  %v805_v56 = vpop.f32.mrf.mxu1 }
  0xb0   : > { %v716_v59 = vadd.f32 %v2192_v5, %v715_v55  ;;  %v806_v60 = vadd.f32 %v2192_v5, %v805_v56 }
  0xb1   : > { %1253 = vst.msk [vmem:[%s2203_s12 + $0x1f0] sm:$0xff] %vm1190_vm2, %v1131_v53  ;;  %1737 = vmatmul.msk.f32.gmra.mxu2 %vm321_vm1, %v271_v51  ;;  %1768 = vmatmul.msk.f32.gmra.mxu3 %vm321_vm1, %v302_v52  ;;  %v275_v52 = vld [vmem:[%s2057_s7 + $0x298] sm:$0xff]  ;;  %v306_v53 = vld [vmem:[%s2057_s7 + $0x390] sm:$0xff] }
  0xb2   : > { %1284 = vst.msk [vmem:[%s2203_s12 + $0x2e8] sm:$0xff] %vm1190_vm2, %v1162_v54  ;;  %v1072_v61 = vmax.f32 %v716_v59, 0.0  ;;  %v1102_v62 = vmax.f32 %v806_v60, 0.0  ;;  %1677 = vmatmul.msk.f32.gmra.mxu0 %vm321_vm1, %v211_v57  ;;  %1707 = vmatmul.msk.f32.gmra.mxu1 %vm321_vm1, %v241_v58  ;;  %v215_v58 = vld [vmem:[%s2057_s7 + $0xb8] sm:$0xff]  ;;  %v245_v59 = vld [vmem:[%s2057_s7 + $0x1a8] sm:$0xff] }
  0xb4   : > { %v895_v63 = vpop.f32.mrf.mxu2  ;;  %1194 = vst.msk [vmem:[%s2203_s12 + $0x18] sm:$0xff] %vm1190_vm2, %v1072_v61  ;;  %v988_v0 = vpop.f32.mrf.mxu3 }
  0xb5   : > { %v896_v1 = vadd.f32 %v2192_v5, %v895_v63  ;;  %1224 = vst.msk [vmem:[%s2203_s12 + $0x108] sm:$0xff] %vm1190_vm2, %v1102_v62  ;;  %v989_v2 = vadd.f32 %v2192_v5, %v988_v0 }
  0xb7   : > { %v1132_v6 = vmax.f32 %v896_v1, 0.0  ;;  %v1163_v7 = vmax.f32 %v989_v2, 0.0  ;;  %v718_v8 = vpop.f32.mrf.mxu0  ;;  %v808_v9 = vpop.f32.mrf.mxu1 }
  0xb8   : > { %v719_v12 = vadd.f32 %v2192_v5, %v718_v8  ;;  %v809_v13 = vadd.f32 %v2192_v5, %v808_v9 }
  0xb9   : > { %1254 = vst.msk [vmem:[%s2203_s12 + $0x1f8] sm:$0xff] %vm1190_vm2, %v1132_v6  ;;  %1738 = vmatmul.msk.f32.gmra.mxu2 %vm321_vm1, %v272_v3  ;;  %1769 = vmatmul.msk.f32.gmra.mxu3 %vm321_vm1, %v303_v4  ;;  %v276_v4 = vld [vmem:[%s2057_s7 + $0x2a0] sm:$0xff]  ;;  %v307_v6 = vld [vmem:[%s2057_s7 + $0x398] sm:$0xff] }
  0xba   : > { %1285 = vst.msk [vmem:[%s2203_s12 + $0x2f0] sm:$0xff] %vm1190_vm2, %v1163_v7  ;;  %v1073_v14 = vmax.f32 %v719_v12, 0.0  ;;  %v1103_v15 = vmax.f32 %v809_v13, 0.0  ;;  %1678 = vmatmul.msk.f32.gmra.mxu0 %vm321_vm1, %v212_v10  ;;  %1708 = vmatmul.msk.f32.gmra.mxu1 %vm321_vm1, %v242_v11  ;;  %v216_v11 = vld [vmem:[%s2057_s7 + $0xc0] sm:$0xff]  ;;  %v246_v12 = vld [vmem:[%s2057_s7 + $0x1b0] sm:$0xff] }
  0xbc   : > { %v898_v16 = vpop.f32.mrf.mxu2  ;;  %1195 = vst.msk [vmem:[%s2203_s12 + $0x20] sm:$0xff] %vm1190_vm2, %v1073_v14  ;;  %v991_v17 = vpop.f32.mrf.mxu3 }
  0xbd   : > { %v899_v18 = vadd.f32 %v2192_v5, %v898_v16  ;;  %1225 = vst.msk [vmem:[%s2203_s12 + $0x110] sm:$0xff] %vm1190_vm2, %v1103_v15  ;;  %v992_v19 = vadd.f32 %v2192_v5, %v991_v17 }
  0xbf   : > { %v1133_v22 = vmax.f32 %v899_v18, 0.0  ;;  %v1164_v23 = vmax.f32 %v992_v19, 0.0  ;;  %v721_v24 = vpop.f32.mrf.mxu0  ;;  %v811_v25 = vpop.f32.mrf.mxu1 }
  0xc0   : > { %v722_v28 = vadd.f32 %v2192_v5, %v721_v24  ;;  %v812_v29 = vadd.f32 %v2192_v5, %v811_v25 }
  0xc1   : > { %1255 = vst.msk [vmem:[%s2203_s12 + $0x200] sm:$0xff] %vm1190_vm2, %v1133_v22  ;;  %1739 = vmatmul.msk.f32.gmra.mxu2 %vm321_vm1, %v273_v20  ;;  %1770 = vmatmul.msk.f32.gmra.mxu3 %vm321_vm1, %v304_v21  ;;  %v277_v21 = vld [vmem:[%s2057_s7 + $0x2a8] sm:$0xff]  ;;  %v308_v22 = vld [vmem:[%s2057_s7 + $0x3a0] sm:$0xff] }
  0xc2   : > { %1286 = vst.msk [vmem:[%s2203_s12 + $0x2f8] sm:$0xff] %vm1190_vm2, %v1164_v23  ;;  %v1074_v30 = vmax.f32 %v722_v28, 0.0  ;;  %v1104_v31 = vmax.f32 %v812_v29, 0.0  ;;  %1679 = vmatmul.msk.f32.gmra.mxu0 %vm321_vm1, %v213_v26  ;;  %1709 = vmatmul.msk.f32.gmra.mxu1 %vm321_vm1, %v243_v27  ;;  %v217_v27 = vld [vmem:[%s2057_s7 + $0xc8] sm:$0xff]  ;;  %v247_v28 = vld [vmem:[%s2057_s7 + $0x1b8] sm:$0xff] }
  0xc4   : > { %v901_v32 = vpop.f32.mrf.mxu2  ;;  %1196 = vst.msk [vmem:[%s2203_s12 + $0x28] sm:$0xff] %vm1190_vm2, %v1074_v30  ;;  %v994_v33 = vpop.f32.mrf.mxu3 }
  0xc5   : > { %v902_v34 = vadd.f32 %v2192_v5, %v901_v32  ;;  %1226 = vst.msk [vmem:[%s2203_s12 + $0x118] sm:$0xff] %vm1190_vm2, %v1104_v31  ;;  %v995_v35 = vadd.f32 %v2192_v5, %v994_v33 }
  0xc7   : > { %v1134_v38 = vmax.f32 %v902_v34, 0.0  ;;  %v1165_v39 = vmax.f32 %v995_v35, 0.0  ;;  %v724_v40 = vpop.f32.mrf.mxu0  ;;  %v814_v41 = vpop.f32.mrf.mxu1 }
  0xc8   : > { %v725_v44 = vadd.f32 %v2192_v5, %v724_v40  ;;  %v815_v45 = vadd.f32 %v2192_v5, %v814_v41 }
  0xc9   : > { %1256 = vst.msk [vmem:[%s2203_s12 + $0x208] sm:$0xff] %vm1190_vm2, %v1134_v38  ;;  %1740 = vmatmul.msk.f32.gmra.mxu2 %vm321_vm1, %v274_v36  ;;  %1771 = vmatmul.msk.f32.gmra.mxu3 %vm321_vm1, %v305_v37  ;;  %v278_v37 = vld [vmem:[%s2057_s7 + $0x2b0] sm:$0xff]  ;;  %v309_v38 = vld [vmem:[%s2057_s7 + $0x3a8] sm:$0xff] }
  0xca   : > { %1287 = vst.msk [vmem:[%s2203_s12 + $0x300] sm:$0xff] %vm1190_vm2, %v1165_v39  ;;  %v1075_v46 = vmax.f32 %v725_v44, 0.0  ;;  %v1105_v47 = vmax.f32 %v815_v45, 0.0  ;;  %1680 = vmatmul.msk.f32.gmra.mxu0 %vm321_vm1, %v214_v42  ;;  %1710 = vmatmul.msk.f32.gmra.mxu1 %vm321_vm1, %v244_v43  ;;  %v218_v43 = vld [vmem:[%s2057_s7 + $0xd0] sm:$0xff]  ;;  %v248_v44 = vld [vmem:[%s2057_s7 + $0x1c0] sm:$0xff] }
  0xcc   : > { %v904_v48 = vpop.f32.mrf.mxu2  ;;  %1197 = vst.msk [vmem:[%s2203_s12 + $0x30] sm:$0xff] %vm1190_vm2, %v1075_v46  ;;  %v997_v49 = vpop.f32.mrf.mxu3 }
  0xcd   : > { %v905_v50 = vadd.f32 %v2192_v5, %v904_v48  ;;  %1227 = vst.msk [vmem:[%s2203_s12 + $0x120] sm:$0xff] %vm1190_vm2, %v1105_v47  ;;  %v998_v51 = vadd.f32 %v2192_v5, %v997_v49 }
  0xcf   : > { %v1135_v54 = vmax.f32 %v905_v50, 0.0  ;;  %v1166_v55 = vmax.f32 %v998_v51, 0.0  ;;  %v727_v56 = vpop.f32.mrf.mxu0  ;;  %v817_v57 = vpop.f32.mrf.mxu1 }
  0xd0   : > { %v728_v60 = vadd.f32 %v2192_v5, %v727_v56  ;;  %v818_v61 = vadd.f32 %v2192_v5, %v817_v57 }
  0xd1   : > { %1257 = vst.msk [vmem:[%s2203_s12 + $0x210] sm:$0xff] %vm1190_vm2, %v1135_v54  ;;  %1741 = vmatmul.msk.f32.gmra.mxu2 %vm321_vm1, %v275_v52  ;;  %1772 = vmatmul.msk.f32.gmra.mxu3 %vm321_vm1, %v306_v53  ;;  %v279_v53 = vld [vmem:[%s2057_s7 + $0x2b8] sm:$0xff]  ;;  %v310_v54 = vld [vmem:[%s2057_s7 + $0x3b0] sm:$0xff] }
  0xd2   : > { %1288 = vst.msk [vmem:[%s2203_s12 + $0x308] sm:$0xff] %vm1190_vm2, %v1166_v55  ;;  %v1076_v62 = vmax.f32 %v728_v60, 0.0  ;;  %v1106_v63 = vmax.f32 %v818_v61, 0.0  ;;  %1681 = vmatmul.msk.f32.gmra.mxu0 %vm321_vm1, %v215_v58  ;;  %1711 = vmatmul.msk.f32.gmra.mxu1 %vm321_vm1, %v245_v59  ;;  %v219_v59 = vld [vmem:[%s2057_s7 + $0xd8] sm:$0xff]  ;;  %v249_v60 = vld [vmem:[%s2057_s7 + $0x1c8] sm:$0xff] }
  0xd4   : > { %v907_v0 = vpop.f32.mrf.mxu2  ;;  %1198 = vst.msk [vmem:[%s2203_s12 + $0x38] sm:$0xff] %vm1190_vm2, %v1076_v62  ;;  %v1000_v1 = vpop.f32.mrf.mxu3 }
  0xd5   : > { %v908_v2 = vadd.f32 %v2192_v5, %v907_v0  ;;  %1228 = vst.msk [vmem:[%s2203_s12 + $0x128] sm:$0xff] %vm1190_vm2, %v1106_v63  ;;  %v1001_v3 = vadd.f32 %v2192_v5, %v1000_v1 }
  0xd7   : > { %v1136_v7 = vmax.f32 %v908_v2, 0.0  ;;  %v1167_v8 = vmax.f32 %v1001_v3, 0.0  ;;  %v730_v9 = vpop.f32.mrf.mxu0  ;;  %v820_v10 = vpop.f32.mrf.mxu1 }
  0xd8   : > { %v731_v13 = vadd.f32 %v2192_v5, %v730_v9  ;;  %v821_v14 = vadd.f32 %v2192_v5, %v820_v10 }
  0xd9   : > { %1258 = vst.msk [vmem:[%s2203_s12 + $0x218] sm:$0xff] %vm1190_vm2, %v1136_v7  ;;  %1742 = vmatmul.msk.f32.gmra.mxu2 %vm321_vm1, %v276_v4  ;;  %1773 = vmatmul.msk.f32.gmra.mxu3 %vm321_vm1, %v307_v6  ;;  %v280_v6 = vld [vmem:[%s2057_s7 + $0x2c0] sm:$0xff]  ;;  %v311_v7 = vld [vmem:[%s2057_s7 + $0x3b8] sm:$0xff] }
  0xda   : > { %1289 = vst.msk [vmem:[%s2203_s12 + $0x310] sm:$0xff] %vm1190_vm2, %v1167_v8  ;;  %v1077_v15 = vmax.f32 %v731_v13, 0.0  ;;  %v1107_v16 = vmax.f32 %v821_v14, 0.0  ;;  %1682 = vmatmul.msk.f32.gmra.mxu0 %vm321_vm1, %v216_v11  ;;  %1712 = vmatmul.msk.f32.gmra.mxu1 %vm321_vm1, %v246_v12  ;;  %v220_v12 = vld [vmem:[%s2057_s7 + $0xe0] sm:$0xff]  ;;  %v250_v13 = vld [vmem:[%s2057_s7 + $0x1d0] sm:$0xff] }
  0xdc   : > { %v910_v17 = vpop.f32.mrf.mxu2  ;;  %1199 = vst.msk [vmem:[%s2203_s12 + $0x40] sm:$0xff] %vm1190_vm2, %v1077_v15  ;;  %v1003_v18 = vpop.f32.mrf.mxu3 }
  0xdd   : > { %v911_v19 = vadd.f32 %v2192_v5, %v910_v17  ;;  %1229 = vst.msk [vmem:[%s2203_s12 + $0x130] sm:$0xff] %vm1190_vm2, %v1107_v16  ;;  %v1004_v20 = vadd.f32 %v2192_v5, %v1003_v18 }
  0xdf   : > { %v1137_v23 = vmax.f32 %v911_v19, 0.0  ;;  %v1168_v24 = vmax.f32 %v1004_v20, 0.0  ;;  %v733_v25 = vpop.f32.mrf.mxu0  ;;  %v823_v26 = vpop.f32.mrf.mxu1 }
  0xe0   : > { %v734_v29 = vadd.f32 %v2192_v5, %v733_v25  ;;  %v824_v30 = vadd.f32 %v2192_v5, %v823_v26 }
  0xe1   : > { %1259 = vst.msk [vmem:[%s2203_s12 + $0x220] sm:$0xff] %vm1190_vm2, %v1137_v23  ;;  %1743 = vmatmul.msk.f32.gmra.mxu2 %vm321_vm1, %v277_v21  ;;  %1774 = vmatmul.msk.f32.gmra.mxu3 %vm321_vm1, %v308_v22  ;;  %v281_v22 = vld [vmem:[%s2057_s7 + $0x2c8] sm:$0xff]  ;;  %v312_v23 = vld [vmem:[%s2057_s7 + $0x3c0] sm:$0xff] }
  0xe2   : > { %1290 = vst.msk [vmem:[%s2203_s12 + $0x318] sm:$0xff] %vm1190_vm2, %v1168_v24  ;;  %v1078_v31 = vmax.f32 %v734_v29, 0.0  ;;  %v1108_v32 = vmax.f32 %v824_v30, 0.0  ;;  %1683 = vmatmul.msk.f32.gmra.mxu0 %vm321_vm1, %v217_v27  ;;  %1713 = vmatmul.msk.f32.gmra.mxu1 %vm321_vm1, %v247_v28  ;;  %v221_v28 = vld [vmem:[%s2057_s7 + $0xe8] sm:$0xff]  ;;  %v251_v29 = vld [vmem:[%s2057_s7 + $0x1d8] sm:$0xff] }
  0xe4   : > { %v913_v33 = vpop.f32.mrf.mxu2  ;;  %1200 = vst.msk [vmem:[%s2203_s12 + $0x48] sm:$0xff] %vm1190_vm2, %v1078_v31  ;;  %v1006_v34 = vpop.f32.mrf.mxu3 }
  0xe5   : > { %v914_v35 = vadd.f32 %v2192_v5, %v913_v33  ;;  %1230 = vst.msk [vmem:[%s2203_s12 + $0x138] sm:$0xff] %vm1190_vm2, %v1108_v32  ;;  %v1007_v36 = vadd.f32 %v2192_v5, %v1006_v34 }
  0xe7   : > { %v1138_v39 = vmax.f32 %v914_v35, 0.0  ;;  %v1169_v40 = vmax.f32 %v1007_v36, 0.0  ;;  %v736_v41 = vpop.f32.mrf.mxu0  ;;  %v826_v42 = vpop.f32.mrf.mxu1 }
  0xe8   : > { %v737_v45 = vadd.f32 %v2192_v5, %v736_v41  ;;  %v827_v46 = vadd.f32 %v2192_v5, %v826_v42 }
  0xe9   : > { %1260 = vst.msk [vmem:[%s2203_s12 + $0x228] sm:$0xff] %vm1190_vm2, %v1138_v39  ;;  %1744 = vmatmul.msk.f32.gmra.mxu2 %vm321_vm1, %v278_v37  ;;  %1775 = vmatmul.msk.f32.gmra.mxu3 %vm321_vm1, %v309_v38  ;;  %v282_v38 = vld [vmem:[%s2057_s7 + $0x2d0] sm:$0xff] }
  0xea   : > { %1291 = vst.msk [vmem:[%s2203_s12 + $0x320] sm:$0xff] %vm1190_vm2, %v1169_v40  ;;  %v1079_v47 = vmax.f32 %v737_v45, 0.0  ;;  %v1109_v48 = vmax.f32 %v827_v46, 0.0  ;;  %1684 = vmatmul.msk.f32.gmra.mxu0 %vm321_vm1, %v218_v43  ;;  %1714 = vmatmul.msk.f32.gmra.mxu1 %vm321_vm1, %v248_v44 }
  0xec   : > { %v916_v49 = vpop.f32.mrf.mxu2  ;;  %1201 = vst.msk [vmem:[%s2203_s12 + $0x50] sm:$0xff] %vm1190_vm2, %v1079_v47  ;;  %v1009_v50 = vpop.f32.mrf.mxu3 }
  0xed   : > { %v917_v51 = vadd.f32 %v2192_v5, %v916_v49  ;;  %1231 = vst.msk [vmem:[%s2203_s12 + $0x140] sm:$0xff] %vm1190_vm2, %v1109_v48  ;;  %v1010_v52 = vadd.f32 %v2192_v5, %v1009_v50 }
  0xef   : > { %v1139_v55 = vmax.f32 %v917_v51, 0.0  ;;  %v1170_v56 = vmax.f32 %v1010_v52, 0.0  ;;  %v739_v57 = vpop.f32.mrf.mxu0  ;;  %v829_v58 = vpop.f32.mrf.mxu1 }
  0xf0   : > { %v740_v61 = vadd.f32 %v2192_v5, %v739_v57  ;;  %v830_v62 = vadd.f32 %v2192_v5, %v829_v58 }
  0xf1   : > { %1261 = vst.msk [vmem:[%s2203_s12 + $0x230] sm:$0xff] %vm1190_vm2, %v1139_v55  ;;  %1745 = vmatmul.msk.f32.gmra.mxu2 %vm321_vm1, %v279_v53  ;;  %1776 = vmatmul.msk.f32.gmra.mxu3 %vm321_vm1, %v310_v54 }
  0xf2   : > { %1292 = vst.msk [vmem:[%s2203_s12 + $0x328] sm:$0xff] %vm1190_vm2, %v1170_v56  ;;  %v1080_v63 = vmax.f32 %v740_v61, 0.0  ;;  %v1110_v0 = vmax.f32 %v830_v62, 0.0  ;;  %1685 = vmatmul.msk.f32.gmra.mxu0 %vm321_vm1, %v219_v59  ;;  %1715 = vmatmul.msk.f32.gmra.mxu1 %vm321_vm1, %v249_v60 }
  0xf4   : > { %v919_v1 = vpop.f32.mrf.mxu2  ;;  %1202 = vst.msk [vmem:[%s2203_s12 + $0x58] sm:$0xff] %vm1190_vm2, %v1080_v63  ;;  %v1012_v2 = vpop.f32.mrf.mxu3 }
  0xf5   : > { %v920_v3 = vadd.f32 %v2192_v5, %v919_v1  ;;  %1232 = vst.msk [vmem:[%s2203_s12 + $0x148] sm:$0xff] %vm1190_vm2, %v1110_v0  ;;  %v1013_v4 = vadd.f32 %v2192_v5, %v1012_v2 }
  0xf7   : > { %v1140_v8 = vmax.f32 %v920_v3, 0.0  ;;  %v1171_v9 = vmax.f32 %v1013_v4, 0.0  ;;  %v742_v10 = vpop.f32.mrf.mxu0  ;;  %v832_v11 = vpop.f32.mrf.mxu1 }
  0xf8   : > { %v743_v14 = vadd.f32 %v2192_v5, %v742_v10  ;;  %v833_v15 = vadd.f32 %v2192_v5, %v832_v11 }
  0xf9   : > { %1262 = vst.msk [vmem:[%s2203_s12 + $0x238] sm:$0xff] %vm1190_vm2, %v1140_v8  ;;  %1746 = vmatmul.msk.f32.gmra.mxu2 %vm321_vm1, %v280_v6  ;;  %1777 = vmatmul.msk.f32.gmra.mxu3 %vm321_vm1, %v311_v7 }
  0xfa   : > { %1293 = vst.msk [vmem:[%s2203_s12 + $0x330] sm:$0xff] %vm1190_vm2, %v1171_v9  ;;  %v1081_v16 = vmax.f32 %v743_v14, 0.0  ;;  %v1111_v17 = vmax.f32 %v833_v15, 0.0  ;;  %1686 = vmatmul.msk.f32.gmra.mxu0 %vm321_vm1, %v220_v12  ;;  %1716 = vmatmul.msk.f32.gmra.mxu1 %vm321_vm1, %v250_v13 }
  0xfc   : > { %v922_v18 = vpop.f32.mrf.mxu2  ;;  %1203 = vst.msk [vmem:[%s2203_s12 + $0x60] sm:$0xff] %vm1190_vm2, %v1081_v16  ;;  %v1015_v19 = vpop.f32.mrf.mxu3 }
  0xfd   : > { %v923_v20 = vadd.f32 %v2192_v5, %v922_v18  ;;  %1233 = vst.msk [vmem:[%s2203_s12 + $0x150] sm:$0xff] %vm1190_vm2, %v1111_v17  ;;  %v1016_v21 = vadd.f32 %v2192_v5, %v1015_v19 }
  0xff   : > { %v1141_v24 = vmax.f32 %v923_v20, 0.0  ;;  %v1172_v25 = vmax.f32 %v1016_v21, 0.0  ;;  %v745_v26 = vpop.f32.mrf.mxu0  ;;  %v835_v27 = vpop.f32.mrf.mxu1 }
 0x100   : > { %v746_v30 = vadd.f32 %v2192_v5, %v745_v26  ;;  %v836_v31 = vadd.f32 %v2192_v5, %v835_v27 }
 0x101   : > { %1263 = vst.msk [vmem:[%s2203_s12 + $0x240] sm:$0xff] %vm1190_vm2, %v1141_v24  ;;  %1747 = vmatmul.msk.f32.gmra.mxu2 %vm321_vm1, %v281_v22  ;;  %1778 = vmatmul.msk.f32.gmra.mxu3 %vm321_vm1, %v312_v23 }
 0x102   : > { %1294 = vst.msk [vmem:[%s2203_s12 + $0x338] sm:$0xff] %vm1190_vm2, %v1172_v25  ;;  %v1082_v32 = vmax.f32 %v746_v30, 0.0  ;;  %v1112_v33 = vmax.f32 %v836_v31, 0.0  ;;  %1687 = vmatmul.msk.f32.gmra.mxu0 %vm321_vm1, %v221_v28  ;;  %1717 = vmatmul.msk.f32.gmra.mxu1 %vm321_vm1, %v251_v29 }
 0x104   : > { %v925_v34 = vpop.f32.mrf.mxu2  ;;  %1204 = vst.msk [vmem:[%s2203_s12 + $0x68] sm:$0xff] %vm1190_vm2, %v1082_v32  ;;  %v1018_v35 = vpop.f32.mrf.mxu3 }
 0x105   : > { %v926_v36 = vadd.f32 %v2192_v5, %v925_v34  ;;  %1234 = vst.msk [vmem:[%s2203_s12 + $0x158] sm:$0xff] %vm1190_vm2, %v1112_v33  ;;  %v1019_v37 = vadd.f32 %v2192_v5, %v1018_v35 }
 0x107   : > { %v1142_v39 = vmax.f32 %v926_v36, 0.0  ;;  %v1173_v40 = vmax.f32 %v1019_v37, 0.0  ;;  %v748_v41 = vpop.f32.mrf.mxu0  ;;  %v838_v42 = vpop.f32.mrf.mxu1 }
 0x108   : > { %v749_v43 = vadd.f32 %v2192_v5, %v748_v41  ;;  %v839_v44 = vadd.f32 %v2192_v5, %v838_v42 }
 0x109   : > { %1264 = vst.msk [vmem:[%s2203_s12 + $0x248] sm:$0xff] %vm1190_vm2, %v1142_v39  ;;  %1748 = vmatmul.msk.f32.gmra.mxu2 %vm321_vm1, %v282_v38 }
 0x10a   : > { %1295 = vst.msk [vmem:[%s2203_s12 + $0x340] sm:$0xff] %vm1190_vm2, %v1173_v40  ;;  %v1083_v45 = vmax.f32 %v749_v43, 0.0  ;;  %v1113_v46 = vmax.f32 %v839_v44, 0.0 }
 0x10c   : > { %v928_v47 = vpop.f32.mrf.mxu2  ;;  %1205 = vst.msk [vmem:[%s2203_s12 + $0x70] sm:$0xff] %vm1190_vm2, %v1083_v45  ;;  %v1021_v48 = vpop.f32.mrf.mxu3 }
 0x10d   : > { %v929_v49 = vadd.f32 %v2192_v5, %v928_v47  ;;  %1235 = vst.msk [vmem:[%s2203_s12 + $0x160] sm:$0xff] %vm1190_vm2, %v1113_v46  ;;  %v1022_v50 = vadd.f32 %v2192_v5, %v1021_v48 }
 0x10f   : > { %v1143_v51 = vmax.f32 %v929_v49, 0.0  ;;  %v1174_v52 = vmax.f32 %v1022_v50, 0.0  ;;  %v751_v53 = vpop.f32.mrf.mxu0  ;;  %v841_v54 = vpop.f32.mrf.mxu1 }
 0x110   : > { %v752_v55 = vadd.f32 %v2192_v5, %v751_v53  ;;  %v842_v56 = vadd.f32 %v2192_v5, %v841_v54 }
 0x111   : > { %1265 = vst.msk [vmem:[%s2203_s12 + $0x250] sm:$0xff] %vm1190_vm2, %v1143_v51 }
 0x112   : > { %1296 = vst.msk [vmem:[%s2203_s12 + $0x348] sm:$0xff] %vm1190_vm2, %v1174_v52  ;;  %v1084_v57 = vmax.f32 %v752_v55, 0.0  ;;  %v1114_v58 = vmax.f32 %v842_v56, 0.0 }
 0x114   : > { %v931_v59 = vpop.f32.mrf.mxu2  ;;  %1206 = vst.msk [vmem:[%s2203_s12 + $0x78] sm:$0xff] %vm1190_vm2, %v1084_v57  ;;  %v1024_v60 = vpop.f32.mrf.mxu3 }
 0x115   : > { %v932_v61 = vadd.f32 %v2192_v5, %v931_v59  ;;  %1236 = vst.msk [vmem:[%s2203_s12 + $0x168] sm:$0xff] %vm1190_vm2, %v1114_v58  ;;  %v1025_v62 = vadd.f32 %v2192_v5, %v1024_v60 }
 0x117   : > { %v1144_v63 = vmax.f32 %v932_v61, 0.0  ;;  %v1175_v0 = vmax.f32 %v1025_v62, 0.0  ;;  %v754_v1 = vpop.f32.mrf.mxu0  ;;  %v844_v2 = vpop.f32.mrf.mxu1 }
 0x118   : > { %v755_v3 = vadd.f32 %v2192_v5, %v754_v1  ;;  %v845_v4 = vadd.f32 %v2192_v5, %v844_v2 }
 0x119   : > { %1266 = vst.msk [vmem:[%s2203_s12 + $0x258] sm:$0xff] %vm1190_vm2, %v1144_v63 }
 0x11a   : > { %1297 = vst.msk [vmem:[%s2203_s12 + $0x350] sm:$0xff] %vm1190_vm2, %v1175_v0  ;;  %v1085_v6 = vmax.f32 %v755_v3, 0.0  ;;  %v1115_v7 = vmax.f32 %v845_v4, 0.0 }
 0x11c   : > { %v934_v8 = vpop.f32.mrf.mxu2  ;;  %1207 = vst.msk [vmem:[%s2203_s12 + $0x80] sm:$0xff] %vm1190_vm2, %v1085_v6  ;;  %v1027_v9 = vpop.f32.mrf.mxu3 }
 0x11d   : > { %v935_v10 = vadd.f32 %v2192_v5, %v934_v8  ;;  %1237 = vst.msk [vmem:[%s2203_s12 + $0x170] sm:$0xff] %vm1190_vm2, %v1115_v7  ;;  %v1028_v11 = vadd.f32 %v2192_v5, %v1027_v9 }
 0x11f   : > { %v1145_v12 = vmax.f32 %v935_v10, 0.0  ;;  %v1176_v13 = vmax.f32 %v1028_v11, 0.0  ;;  %v757_v14 = vpop.f32.mrf.mxu0  ;;  %v847_v15 = vpop.f32.mrf.mxu1 }
 0x120   : > { %v758_v16 = vadd.f32 %v2192_v5, %v757_v14  ;;  %v848_v17 = vadd.f32 %v2192_v5, %v847_v15 }
 0x121   : > { %1267 = vst.msk [vmem:[%s2203_s12 + $0x260] sm:$0xff] %vm1190_vm2, %v1145_v12 }
 0x122   : > { %1298 = vst.msk [vmem:[%s2203_s12 + $0x358] sm:$0xff] %vm1190_vm2, %v1176_v13  ;;  %v1086_v18 = vmax.f32 %v758_v16, 0.0  ;;  %v1116_v19 = vmax.f32 %v848_v17, 0.0 }
 0x124   : > { %v937_v20 = vpop.f32.mrf.mxu2  ;;  %1208 = vst.msk [vmem:[%s2203_s12 + $0x88] sm:$0xff] %vm1190_vm2, %v1086_v18  ;;  %v1030_v21 = vpop.f32.mrf.mxu3 }
 0x125   : > { %v938_v22 = vadd.f32 %v2192_v5, %v937_v20  ;;  %1238 = vst.msk [vmem:[%s2203_s12 + $0x178] sm:$0xff] %vm1190_vm2, %v1116_v19  ;;  %v1031_v23 = vadd.f32 %v2192_v5, %v1030_v21 }
 0x127   : > { %v1146_v24 = vmax.f32 %v938_v22, 0.0  ;;  %v1177_v25 = vmax.f32 %v1031_v23, 0.0  ;;  %v760_v26 = vpop.f32.mrf.mxu0  ;;  %v850_v27 = vpop.f32.mrf.mxu1 }
 0x128   : > { %v761_v28 = vadd.f32 %v2192_v5, %v760_v26  ;;  %v851_v29 = vadd.f32 %v2192_v5, %v850_v27 }
 0x129   : > { %1268 = vst.msk [vmem:[%s2203_s12 + $0x268] sm:$0xff] %vm1190_vm2, %v1146_v24 }
 0x12a   : > { %1299 = vst.msk [vmem:[%s2203_s12 + $0x360] sm:$0xff] %vm1190_vm2, %v1177_v25  ;;  %v1087_v30 = vmax.f32 %v761_v28, 0.0  ;;  %v1117_v31 = vmax.f32 %v851_v29, 0.0 }
 0x12c   : > { %v940_v32 = vpop.f32.mrf.mxu2  ;;  %1209 = vst.msk [vmem:[%s2203_s12 + $0x90] sm:$0xff] %vm1190_vm2, %v1087_v30  ;;  %v1033_v33 = vpop.f32.mrf.mxu3 }
 0x12d   : > { %v941_v34 = vadd.f32 %v2192_v5, %v940_v32  ;;  %1239 = vst.msk [vmem:[%s2203_s12 + $0x180] sm:$0xff] %vm1190_vm2, %v1117_v31  ;;  %v1034_v35 = vadd.f32 %v2192_v5, %v1033_v33 }
 0x12f   : > { %v1147_v36 = vmax.f32 %v941_v34, 0.0  ;;  %v1178_v37 = vmax.f32 %v1034_v35, 0.0  ;;  %v763_v38 = vpop.f32.mrf.mxu0  ;;  %v853_v39 = vpop.f32.mrf.mxu1 }
 0x130   : > { %v764_v40 = vadd.f32 %v2192_v5, %v763_v38  ;;  %v854_v41 = vadd.f32 %v2192_v5, %v853_v39 }
 0x131   : > { %1269 = vst.msk [vmem:[%s2203_s12 + $0x270] sm:$0xff] %vm1190_vm2, %v1147_v36 }
 0x132   : > { %1300 = vst.msk [vmem:[%s2203_s12 + $0x368] sm:$0xff] %vm1190_vm2, %v1178_v37  ;;  %v1088_v42 = vmax.f32 %v764_v40, 0.0  ;;  %v1118_v43 = vmax.f32 %v854_v41, 0.0 }
 0x134   : > { %v943_v44 = vpop.f32.mrf.mxu2  ;;  %1210 = vst.msk [vmem:[%s2203_s12 + $0x98] sm:$0xff] %vm1190_vm2, %v1088_v42  ;;  %v1036_v45 = vpop.f32.mrf.mxu3 }
 0x135   : > { %v944_v46 = vadd.f32 %v2192_v5, %v943_v44  ;;  %1240 = vst.msk [vmem:[%s2203_s12 + $0x188] sm:$0xff] %vm1190_vm2, %v1118_v43  ;;  %v1037_v47 = vadd.f32 %v2192_v5, %v1036_v45  ;;  %v2607_v44 = vld [vmem:[%s2821_s2] ss:$0 sm:$0xff] }
 0x137   : > { %v1148_v48 = vmax.f32 %v944_v46, 0.0  ;;  %v1179_v49 = vmax.f32 %v1037_v47, 0.0  ;;  %v766_v50 = vpop.f32.mrf.mxu0  ;;  %v856_v51 = vpop.f32.mrf.mxu1 }
 0x138   : > { %v767_v52 = vadd.f32 %v2192_v5, %v766_v50  ;;  %v857_v53 = vadd.f32 %v2192_v5, %v856_v51 }
 0x139   : > { %1270 = vst.msk [vmem:[%s2203_s12 + $0x278] sm:$0xff] %vm1190_vm2, %v1148_v48 }
 0x13a   : > { %1301 = vst.msk [vmem:[%s2203_s12 + $0x370] sm:$0xff] %vm1190_vm2, %v1179_v49  ;;  %v1089_v54 = vmax.f32 %v767_v52, 0.0  ;;  %v1119_v55 = vmax.f32 %v857_v53, 0.0 }
 0x13c   : > { %v946_v56 = vpop.f32.mrf.mxu2  ;;  %1211 = vst.msk [vmem:[%s2203_s12 + $0xa0] sm:$0xff] %vm1190_vm2, %v1089_v54  ;;  %v1039_v57 = vpop.f32.mrf.mxu3 }
 0x13d   : > { %v947_v58 = vadd.f32 %v2192_v5, %v946_v56  ;;  %1241 = vst.msk [vmem:[%s2203_s12 + $0x190] sm:$0xff] %vm1190_vm2, %v1119_v55  ;;  %v1040_v59 = vadd.f32 %v2192_v5, %v1039_v57 }
 0x13f   : > { %v1149_v60 = vmax.f32 %v947_v58, 0.0  ;;  %v1180_v61 = vmax.f32 %v1040_v59, 0.0  ;;  %v769_v62 = vpop.f32.mrf.mxu0  ;;  %v859_v63 = vpop.f32.mrf.mxu1 }
 0x140   : > { %v770_v0 = vadd.f32 %v2192_v5, %v769_v62  ;;  %v860_v1 = vadd.f32 %v2192_v5, %v859_v63 }
 0x141   : > { %1271 = vst.msk [vmem:[%s2203_s12 + $0x280] sm:$0xff] %vm1190_vm2, %v1149_v60 }
 0x142   : > { %1302 = vst.msk [vmem:[%s2203_s12 + $0x378] sm:$0xff] %vm1190_vm2, %v1180_v61  ;;  %v1090_v2 = vmax.f32 %v770_v0, 0.0  ;;  %v1120_v3 = vmax.f32 %v860_v1, 0.0 }
 0x144   : > { %v949_v4 = vpop.f32.mrf.mxu2  ;;  %1212 = vst.msk [vmem:[%s2203_s12 + $0xa8] sm:$0xff] %vm1190_vm2, %v1090_v2  ;;  %v1042_v6 = vpop.f32.mrf.mxu3 }
 0x145   : > { %v950_v7 = vadd.f32 %v2192_v5, %v949_v4  ;;  %1242 = vst.msk [vmem:[%s2203_s12 + $0x198] sm:$0xff] %vm1190_vm2, %v1120_v3  ;;  %v1043_v8 = vadd.f32 %v2192_v5, %v1042_v6 }
 0x147   : > { %v1150_v9 = vmax.f32 %v950_v7, 0.0  ;;  %v1181_v10 = vmax.f32 %v1043_v8, 0.0  ;;  %v772_v11 = vpop.f32.mrf.mxu0  ;;  %v862_v12 = vpop.f32.mrf.mxu1 }
 0x148   : > { %v773_v13 = vadd.f32 %v2192_v5, %v772_v11  ;;  %v863_v14 = vadd.f32 %v2192_v5, %v862_v12 }
 0x149   : > { %1272 = vst.msk [vmem:[%s2203_s12 + $0x288] sm:$0xff] %vm1190_vm2, %v1150_v9 }
 0x14a   : > { %1303 = vst.msk [vmem:[%s2203_s12 + $0x380] sm:$0xff] %vm1190_vm2, %v1181_v10  ;;  %v1091_v15 = vmax.f32 %v773_v13, 0.0  ;;  %v1121_v16 = vmax.f32 %v863_v14, 0.0 }
 0x14c   : > { %v952_v17 = vpop.f32.mrf.mxu2  ;;  %1213 = vst.msk [vmem:[%s2203_s12 + $0xb0] sm:$0xff] %vm1190_vm2, %v1091_v15  ;;  %v1045_v18 = vpop.f32.mrf.mxu3 }
 0x14d   : > { %v953_v19 = vadd.f32 %v2192_v5, %v952_v17  ;;  %1243 = vst.msk [vmem:[%s2203_s12 + $0x1a0] sm:$0xff] %vm1190_vm2, %v1121_v16  ;;  %v1046_v20 = vadd.f32 %v2192_v5, %v1045_v18 }
 0x14f   : > { %v1151_v21 = vmax.f32 %v953_v19, 0.0  ;;  %v1182_v22 = vmax.f32 %v1046_v20, 0.0  ;;  %v775_v23 = vpop.f32.mrf.mxu0  ;;  %v865_v24 = vpop.f32.mrf.mxu1 }
 0x150   : > { %v776_v25 = vadd.f32 %v2192_v5, %v775_v23  ;;  %v866_v26 = vadd.f32 %v2192_v5, %v865_v24 }
 0x151   : > { %1273 = vst.msk [vmem:[%s2203_s12 + $0x290] sm:$0xff] %vm1190_vm2, %v1151_v21 }
 0x152   : > { %1304 = vst.msk [vmem:[%s2203_s12 + $0x388] sm:$0xff] %vm1190_vm2, %v1182_v22  ;;  %v1092_v27 = vmax.f32 %v776_v25, 0.0  ;;  %v1122_v28 = vmax.f32 %v866_v26, 0.0 }
 0x154   : > { %v955_v29 = vpop.f32.mrf.mxu2  ;;  %1214 = vst.msk [vmem:[%s2203_s12 + $0xb8] sm:$0xff] %vm1190_vm2, %v1092_v27  ;;  %v1048_v30 = vpop.f32.mrf.mxu3 }
 0x155   : > { %v956_v31 = vadd.f32 %v2192_v5, %v955_v29  ;;  %1244 = vst.msk [vmem:[%s2203_s12 + $0x1a8] sm:$0xff] %vm1190_vm2, %v1122_v28  ;;  %v1049_v32 = vadd.f32 %v2192_v5, %v1048_v30 }
 0x157   : > { %v1152_v33 = vmax.f32 %v956_v31, 0.0  ;;  %v1183_v34 = vmax.f32 %v1049_v32, 0.0  ;;  %v778_v35 = vpop.f32.mrf.mxu0  ;;  %v868_v36 = vpop.f32.mrf.mxu1 }
 0x158   : > { %v779_v37 = vadd.f32 %v2192_v5, %v778_v35  ;;  %v869_v38 = vadd.f32 %v2192_v5, %v868_v36 }
 0x159   : > { %1274 = vst.msk [vmem:[%s2203_s12 + $0x298] sm:$0xff] %vm1190_vm2, %v1152_v33 }
 0x15a   : > { %1305 = vst.msk [vmem:[%s2203_s12 + $0x390] sm:$0xff] %vm1190_vm2, %v1183_v34  ;;  %v1093_v39 = vmax.f32 %v779_v37, 0.0  ;;  %v1123_v40 = vmax.f32 %v869_v38, 0.0 }
 0x15c   : > { %v958_v41 = vpop.f32.mrf.mxu2  ;;  %1215 = vst.msk [vmem:[%s2203_s12 + $0xc0] sm:$0xff] %vm1190_vm2, %v1093_v39  ;;  %v1051_v42 = vpop.f32.mrf.mxu3 }
 0x15d   : > { %v959_v43 = vadd.f32 %v2192_v5, %v958_v41  ;;  %1245 = vst.msk [vmem:[%s2203_s12 + $0x1b0] sm:$0xff] %vm1190_vm2, %v1123_v40  ;;  %v1052_v45 = vadd.f32 %v2607_v44, %v1051_v42 }
 0x15f   : > { %v1153_v46 = vmax.f32 %v959_v43, 0.0  ;;  %v1184_v47 = vmax.f32 %v1052_v45, 0.0  ;;  %v781_v48 = vpop.f32.mrf.mxu0  ;;  %v871_v49 = vpop.f32.mrf.mxu1 }
 0x160   : > { %v782_v50 = vadd.f32 %v2607_v44, %v781_v48  ;;  %v872_v51 = vadd.f32 %v2607_v44, %v871_v49 }
 0x161   : > { %1275 = vst.msk [vmem:[%s2203_s12 + $0x2a0] sm:$0xff] %vm1190_vm2, %v1153_v46 }
 0x162   : > { %1306 = vst.msk [vmem:[%s2203_s12 + $0x398] sm:$0xff] %vm1190_vm2, %v1184_v47  ;;  %v1094_v5 = vmax.f32 %v782_v50, 0.0  ;;  %v1124_v52 = vmax.f32 %v872_v51, 0.0 }
 0x164   : > { %v961_v53 = vpop.f32.mrf.mxu2  ;;  %1216 = vst.msk [vmem:[%s2203_s12 + $0xc8] sm:$0xff] %vm1190_vm2, %v1094_v5  ;;  %v1054_v54 = vpop.f32.mrf.mxu3 }
 0x165   : > { %v962_v55 = vadd.f32 %v2607_v44, %v961_v53  ;;  %1246 = vst.msk [vmem:[%s2203_s12 + $0x1b8] sm:$0xff] %vm1190_vm2, %v1124_v52  ;;  %v1055_v56 = vadd.f32 %v2607_v44, %v1054_v54 }
 0x167   : > { %v1154_v57 = vmax.f32 %v962_v55, 0.0  ;;  %v1185_v58 = vmax.f32 %v1055_v56, 0.0  ;;  %v784_v59 = vpop.f32.mrf.mxu0  ;;  %v874_v60 = vpop.f32.mrf.mxu1 }
 0x168   : > { %v785_v61 = vadd.f32 %v2607_v44, %v784_v59  ;;  %v875_v62 = vadd.f32 %v2607_v44, %v874_v60 }
 0x169   : > { %1276 = vst.msk [vmem:[%s2203_s12 + $0x2a8] sm:$0xff] %vm1190_vm2, %v1154_v57 }
 0x16a   : > { %1307 = vst.msk [vmem:[%s2203_s12 + $0x3a0] sm:$0xff] %vm1190_vm2, %v1185_v58  ;;  %v1095_v63 = vmax.f32 %v785_v61, 0.0  ;;  %v1125_v0 = vmax.f32 %v875_v62, 0.0 }
 0x16c   : > { %v964_v1 = vpop.f32.mrf.mxu2  ;;  %1217 = vst.msk [vmem:[%s2203_s12 + $0xd0] sm:$0xff] %vm1190_vm2, %v1095_v63  ;;  %v1057_v2 = vpop.f32.mrf.mxu3 }
 0x16d   : > { %v965_v3 = vadd.f32 %v2607_v44, %v964_v1  ;;  %1247 = vst.msk [vmem:[%s2203_s12 + $0x1c0] sm:$0xff] %vm1190_vm2, %v1125_v0  ;;  %v1058_v4 = vadd.f32 %v2607_v44, %v1057_v2 }
 0x16f   : > { %v1155_v6 = vmax.f32 %v965_v3, 0.0  ;;  %v1186_v7 = vmax.f32 %v1058_v4, 0.0  ;;  %v787_v8 = vpop.f32.mrf.mxu0  ;;  %v877_v9 = vpop.f32.mrf.mxu1 }
 0x170   : > { %v788_v10 = vadd.f32 %v2607_v44, %v787_v8  ;;  %v878_v11 = vadd.f32 %v2607_v44, %v877_v9 }
 0x171   : > { %1277 = vst.msk [vmem:[%s2203_s12 + $0x2b0] sm:$0xff] %vm1190_vm2, %v1155_v6 }
 0x172   : > { %1308 = vst.msk [vmem:[%s2203_s12 + $0x3a8] sm:$0xff] %vm1190_vm2, %v1186_v7  ;;  %v1096_v12 = vmax.f32 %v788_v10, 0.0  ;;  %v1126_v13 = vmax.f32 %v878_v11, 0.0 }
 0x174   : > { %v967_v14 = vpop.f32.mrf.mxu2  ;;  %1218 = vst.msk [vmem:[%s2203_s12 + $0xd8] sm:$0xff] %vm1190_vm2, %v1096_v12  ;;  %v1060_v15 = vpop.f32.mrf.mxu3 }
 0x175   : > { %v968_v16 = vadd.f32 %v2607_v44, %v967_v14  ;;  %1248 = vst.msk [vmem:[%s2203_s12 + $0x1c8] sm:$0xff] %vm1190_vm2, %v1126_v13  ;;  %v1061_v17 = vadd.f32 %v2607_v44, %v1060_v15 }
 0x177   : > { %v1156_v18 = vmax.f32 %v968_v16, 0.0  ;;  %v1187_v19 = vmax.f32 %v1061_v17, 0.0  ;;  %v790_v20 = vpop.f32.mrf.mxu0  ;;  %v880_v21 = vpop.f32.mrf.mxu1 }
 0x178   : > { %v791_v22 = vadd.f32 %v2607_v44, %v790_v20  ;;  %v881_v23 = vadd.f32 %v2607_v44, %v880_v21 }
 0x179   : > { %1278 = vst.msk [vmem:[%s2203_s12 + $0x2b8] sm:$0xff] %vm1190_vm2, %v1156_v18 }
 0x17a   : > { %1309 = vst.msk [vmem:[%s2203_s12 + $0x3b0] sm:$0xff] %vm1190_vm2, %v1187_v19  ;;  %v1097_v24 = vmax.f32 %v791_v22, 0.0  ;;  %v1127_v25 = vmax.f32 %v881_v23, 0.0 }
 0x17c   : > { %v970_v26 = vpop.f32.mrf.mxu2  ;;  %1219 = vst.msk [vmem:[%s2203_s12 + $0xe0] sm:$0xff] %vm1190_vm2, %v1097_v24  ;;  %v1063_v27 = vpop.f32.mrf.mxu3 }
 0x17d   : > { %v971_v28 = vadd.f32 %v2607_v44, %v970_v26  ;;  %1249 = vst.msk [vmem:[%s2203_s12 + $0x1d0] sm:$0xff] %vm1190_vm2, %v1127_v25  ;;  %v1064_v29 = vadd.f32 %v2607_v44, %v1063_v27 }
 0x17f   : > { %v1157_v30 = vmax.f32 %v971_v28, 0.0  ;;  %v1188_v31 = vmax.f32 %v1064_v29, 0.0  ;;  %v793_v32 = vpop.f32.mrf.mxu0  ;;  %v883_v33 = vpop.f32.mrf.mxu1 }
 0x180   : > { %v794_v34 = vadd.f32 %v2607_v44, %v793_v32  ;;  %v884_v35 = vadd.f32 %v2607_v44, %v883_v33 }
 0x181   : > { %1279 = vst.msk [vmem:[%s2203_s12 + $0x2c0] sm:$0xff] %vm1190_vm2, %v1157_v30 }
 0x182   : > { %1310 = vst.msk [vmem:[%s2203_s12 + $0x3b8] sm:$0xff] %vm1190_vm2, %v1188_v31  ;;  %v1098_v36 = vmax.f32 %v794_v34, 0.0  ;;  %v1128_v37 = vmax.f32 %v884_v35, 0.0 }
 0x184   : > { %v973_v38 = vpop.f32.mrf.mxu2  ;;  %1220 = vst.msk [vmem:[%s2203_s12 + $0xe8] sm:$0xff] %vm1190_vm2, %v1098_v36  ;;  %v1066_v39 = vpop.f32.mrf.mxu3 }
 0x185   : > { %v974_v40 = vadd.f32 %v2607_v44, %v973_v38  ;;  %1250 = vst.msk [vmem:[%s2203_s12 + $0x1d8] sm:$0xff] %vm1190_vm2, %v1128_v37  ;;  %v1067_v41 = vadd.f32 %v2607_v44, %v1066_v39 }
 0x187   : > { %v1158_v42 = vmax.f32 %v974_v40, 0.0  ;;  %v1189_v43 = vmax.f32 %v1067_v41, 0.0 }
 0x189   : > { %1280 = vst.msk [vmem:[%s2203_s12 + $0x2c8] sm:$0xff] %vm1190_vm2, %v1158_v42 }
 0x18a   : > { %1311 = vst.msk [vmem:[%s2203_s12 + $0x3c0] sm:$0xff] %vm1190_vm2, %v1189_v43 }
 0x18c   : > { %v976_v45 = vpop.f32.mrf.mxu2 }
 0x18d   : > { %v977_v46 = vadd.f32 %v2607_v44, %v976_v45  ;;  %1318 = sbr.rel (!%p2033_p4) target bundleno = 466 (0x1d2), region = 36 }
 0x18f   : > { %v1159_v47 = vmax.f32 %v977_v46, 0.0 }
 0x191   : > { %1281 = vst.msk [vmem:[%s2203_s12 + $0x2d0] sm:$0xff] %vm1190_vm2, %v1159_v47 }
 0x192   : > { %s2833_s18 = smov (!%p1321_p8, %s1320_s18), 121 }
 0x193   : > { %s1779_s26 = sshll.u32 %s2833_s18, 3 }
 0x194   : > { %p1782_p9 = scmp.eq.s32.totalorder %s1779_s26, 0 }
 0x195   : > { %s2690_s27 = sshrl.u32 (!%p1782_p9), %s2833_s18, 5 }
 0x196   : > { %1329 = sbr.rel (%p1782_p9) target bundleno = 466 (0x1d2), region = 40  ;;  %p1783_p10 = scmp.le.s32.totalorder (!%p1782_p9), %s2690_s27, 0 }
 0x19b   : > { %1608 = sbr.rel (%p1783_p10) target bundleno = 449 (0x1c1), region = 116  ;;  %s2824_s15 = smov (!%p1783_p10), %s2684_s24 }
 0x19c   : > { %s2825_s20 = smov (!%p1783_p10), %s2203_s12  ;;  %s2699_s25 = smov (!%p1783_p10), 0  }
 0x19d   : > { %s2701_s28 = smov (!%p1783_p10), 0  }
 0x1a0 LB: >> { %v1454_v44 = vld [vmem:[%s1962_s20] sm:$0xff]  ;;  %v1456_v48 = vld [vmem:[%s1962_s20 + $0x8] sm:$0xff]  ;;  %v1458_v49 = vld [vmem:[%s1962_s20 + $0x10] sm:$0xff]  ;;  %s1518_s29 = sadd.s32 1, %s1966_s25  ;;  %s1448_s28 = sadd.s32 1, %s1970_s28   ;;  %s1970_s28 = sphi %s2701_s28, %s1448_s28   ;;  %s1966_s25 = sphi %s2699_s25, %s2828_s25   ;;  %s1962_s20 = sphi %s2825_s20, %s2827_s20   ;;  %s1958_s15 = sphi %s2824_s15, %s2826_s15  }
 0x1a1   : >> { %1455 = vst [vmem:[%s1958_s15] sm:$0xff] %v1454_v44  ;;  %v1460_v50 = vld [vmem:[%s1962_s20 + $0x18] sm:$0xff]  ;;  %p1519_p11 = scmp.ge.s32.totalorder %s1518_s29, %s2690_s27  ;;  %v1462_v51 = vld [vmem:[%s1962_s20 + $0x20] sm:$0xff]  ;;  %v1464_v5 = vld [vmem:[%s1962_s20 + $0x28] sm:$0xff]  ;;  %p1447_p12 = scmp.ge.s32.totalorder %s1448_s28, %s2690_s27 }
 0x1a2   : >> { %1457 = vst [vmem:[%s1958_s15 + $0x8] sm:$0xff] %v1456_v48  ;;  %v1466_v52 = vld [vmem:[%s1962_s20 + $0x30] sm:$0xff]  ;;  %v1468_v53 = vld [vmem:[%s1962_s20 + $0x38] sm:$0xff]  ;;  %v1470_v54 = vld [vmem:[%s1962_s20 + $0x40] sm:$0xff] }
 0x1a3   : >> { %1459 = vst [vmem:[%s1958_s15 + $0x10] sm:$0xff] %v1458_v49  ;;  %s2835_s29 = smov (%p1519_p11, %s1518_s29), 0  ;;  %v1472_v55 = vld [vmem:[%s1962_s20 + $0x48] sm:$0xff]  ;;  %v1474_v56 = vld [vmem:[%s1962_s20 + $0x50] sm:$0xff]  ;;  %v1476_v57 = vld [vmem:[%s1962_s20 + $0x58] sm:$0xff] }
 0x1a4   : >> { %1461 = vst [vmem:[%s1958_s15 + $0x18] sm:$0xff] %v1460_v50  ;;  %s1784_s30 = sshll.u32 %s2835_s29, 8  ;;  %v1478_v58 = vld [vmem:[%s1962_s20 + $0x60] sm:$0xff]  ;;  %v1480_v59 = vld [vmem:[%s1962_s20 + $0x68] sm:$0xff]  ;;  %v1482_v60 = vld [vmem:[%s1962_s20 + $0x70] sm:$0xff]  ;;  %s2828_s25 = smov %s2835_s29 }
 0x1a5   : >> { %1463 = vst [vmem:[%s1958_s15 + $0x20] sm:$0xff] %v1462_v51  ;;  %s2733_s4 = scalar_lea.vmem %s2203_s12, %s1784_s30 [#allocation2]   ;;  %s2736_s5 = scalar_lea.vmem %s2684_s24, %s1784_s30   ;;  %v1484_v61 = vld [vmem:[%s1962_s20 + $0x78] sm:$0xff]  ;;  %v1486_v62 = vld [vmem:[%s1962_s20 + $0x80] sm:$0xff]  ;;  %v1488_v63 = vld [vmem:[%s1962_s20 + $0x88] sm:$0xff] }
 0x1a6   : >> { %1465 = vst [vmem:[%s1958_s15 + $0x28] sm:$0xff] %v1464_v5  ;;  %v1490_v0 = vld [vmem:[%s1962_s20 + $0x90] sm:$0xff]  ;;  %v1492_v1 = vld [vmem:[%s1962_s20 + $0x98] sm:$0xff]  ;;  %v1494_v2 = vld [vmem:[%s1962_s20 + $0xa0] sm:$0xff] }
 0x1a7   : >> { %1467 = vst [vmem:[%s1958_s15 + $0x30] sm:$0xff] %v1466_v52  ;;  %v1496_v3 = vld [vmem:[%s1962_s20 + $0xa8] sm:$0xff]  ;;  %v1498_v4 = vld [vmem:[%s1962_s20 + $0xb0] sm:$0xff]  ;;  %v1500_v6 = vld [vmem:[%s1962_s20 + $0xb8] sm:$0xff] }
 0x1a8   : >> { %1469 = vst [vmem:[%s1958_s15 + $0x38] sm:$0xff] %v1468_v53  ;;  %v1502_v7 = vld [vmem:[%s1962_s20 + $0xc0] sm:$0xff]  ;;  %v1504_v8 = vld [vmem:[%s1962_s20 + $0xc8] sm:$0xff]  ;;  %v1506_v9 = vld [vmem:[%s1962_s20 + $0xd0] sm:$0xff] }
 0x1a9   : >> { %1471 = vst [vmem:[%s1958_s15 + $0x40] sm:$0xff] %v1470_v54  ;;  %v1508_v10 = vld [vmem:[%s1962_s20 + $0xd8] sm:$0xff]  ;;  %v1510_v11 = vld [vmem:[%s1962_s20 + $0xe0] sm:$0xff]  ;;  %v1512_v12 = vld [vmem:[%s1962_s20 + $0xe8] sm:$0xff] }
 0x1aa   : >> { %1473 = vst [vmem:[%s1958_s15 + $0x48] sm:$0xff] %v1472_v55  ;;  %v1514_v13 = vld [vmem:[%s1962_s20 + $0xf0] sm:$0xff]  ;;  %v1516_v14 = vld [vmem:[%s1962_s20 + $0xf8] sm:$0xff]  ;;  %s2827_s20 = smov %s2733_s4 }
 0x1ab   : >> { %1475 = vst [vmem:[%s1958_s15 + $0x50] sm:$0xff] %v1474_v56 }
 0x1ac   : >> { %1477 = vst [vmem:[%s1958_s15 + $0x58] sm:$0xff] %v1476_v57 }
 0x1ad   : >> { %1479 = vst [vmem:[%s1958_s15 + $0x60] sm:$0xff] %v1478_v58 }
 0x1ae   : >> { %1481 = vst [vmem:[%s1958_s15 + $0x68] sm:$0xff] %v1480_v59 }
 0x1af   : >> { %1483 = vst [vmem:[%s1958_s15 + $0x70] sm:$0xff] %v1482_v60 }
 0x1b0   : >> { %1485 = vst [vmem:[%s1958_s15 + $0x78] sm:$0xff] %v1484_v61 }
 0x1b1   : >> { %1487 = vst [vmem:[%s1958_s15 + $0x80] sm:$0xff] %v1486_v62 }
 0x1b2   : >> { %1489 = vst [vmem:[%s1958_s15 + $0x88] sm:$0xff] %v1488_v63 }
 0x1b3   : >> { %1491 = vst [vmem:[%s1958_s15 + $0x90] sm:$0xff] %v1490_v0 }
 0x1b4   : >> { %1493 = vst [vmem:[%s1958_s15 + $0x98] sm:$0xff] %v1492_v1 }
 0x1b5   : >> { %1495 = vst [vmem:[%s1958_s15 + $0xa0] sm:$0xff] %v1494_v2 }
 0x1b6   : >> { %1497 = vst [vmem:[%s1958_s15 + $0xa8] sm:$0xff] %v1496_v3 }
 0x1b7   : >> { %1499 = vst [vmem:[%s1958_s15 + $0xb0] sm:$0xff] %v1498_v4 }
 0x1b8   : >> { %1501 = vst [vmem:[%s1958_s15 + $0xb8] sm:$0xff] %v1500_v6 }
 0x1b9   : >> { %1503 = vst [vmem:[%s1958_s15 + $0xc0] sm:$0xff] %v1502_v7 }
 0x1ba   : >> { %1505 = vst [vmem:[%s1958_s15 + $0xc8] sm:$0xff] %v1504_v8 }
 0x1bb   : >> { %1507 = vst [vmem:[%s1958_s15 + $0xd0] sm:$0xff] %v1506_v9 }
 0x1bc   : >> { %1509 = vst [vmem:[%s1958_s15 + $0xd8] sm:$0xff] %v1508_v10  ;;  %1450 = sbr.rel (!%p1447_p12) target bundleno = 416 (0x1a0), region = 122 }
 0x1bd   : >> { %1511 = vst [vmem:[%s1958_s15 + $0xe0] sm:$0xff] %v1510_v11 }
 0x1be   : >> { %1513 = vst [vmem:[%s1958_s15 + $0xe8] sm:$0xff] %v1512_v12 }
 0x1bf   : >> { %1515 = vst [vmem:[%s1958_s15 + $0xf0] sm:$0xff] %v1514_v13 }
 0x1c0   : >> { %1517 = vst [vmem:[%s1958_s15 + $0xf8] sm:$0xff] %v1516_v14  ;;  %s2826_s15 = smov %s2736_s5 }
 0x1c1 PF: > { %s2801_s6 = sand.u32 31, %s2833_s18   ;;  %s1795_s7 = sshll.u32 %s2690_s27, 8 }
 0x1c2   : > { %s1529_s8 = scalar_lea.vmem %s2203_s12, %s1795_s7 [#allocation2]   ;;  %s1531_s9 = scalar_lea.vmem %s2684_s24, %s1795_s7  }
 0x1c3   : > { %p1789_p13 = scmp.le.s32.totalorder %s2801_s6, 0 }
 0x1c4   : > { %s1972_s10 = smov (!%p1789_p13), %s1531_s9   ;;  %s1976_s11 = smov (!%p1789_p13), %s1529_s8  }
 0x1c5   : > { %1622 = sbr.rel (%p1789_p13) target bundleno = 466 (0x1d2), region = 127  ;;  %s1980_s14 = smov (!%p1789_p13), 0  }
 0x1c6   : > { %s1984_s17 = smov (!%p1789_p13), 0  }
 0x1ca LB: >> { %v1541_v15 = vld [vmem:[%s1978_s11] sm:$0xff]  ;;  %s1543_s18 = sadd.s32 1, %s1982_s14  ;;  %s1535_s17 = sadd.s32 1, %s1986_s17   ;;  %s1986_s17 = sphi %s1984_s17, %s1535_s17   ;;  %s1982_s14 = sphi %s1980_s14, %s1981_s14   ;;  %s1978_s11 = sphi %s1976_s11, %s1548_s11   ;;  %s1974_s10 = sphi %s1972_s10, %s1549_s10  }
 0x1cb   : >> { %1542 = vst [vmem:[%s1974_s10] sm:$0xff] %v1541_v15  ;;  %p1544_p0 = scmp.ge.s32.totalorder %s1543_s18, %s2801_s6  ;;  %p1534_p1 = scmp.ge.s32.totalorder %s1535_s17, %s2801_s6 }
 0x1cd   : >> { %s2837_s18 = smov (%p1544_p0, %s1543_s18), 0  ;;  %1537 = sbr.rel (!%p1534_p1) target bundleno = 458 (0x1ca), region = 133 }
 0x1ce   : >> { %s1790_s12 = sshll.u32 %s2837_s18, 3  ;;  %s1981_s14 = smov %s2837_s18  }
 0x1cf   : >> { %s1548_s11 = scalar_lea.vmem %s1529_s8, %s1790_s12 [#allocation2]   ;;  %s1549_s10 = scalar_lea.vmem %s1531_s9, %s1790_s12  }
 0x1d2 PF: > { %p10_p2 = scmp.ge.s32.totalorder %s2023_s16, 4   ;;  %s2829_s12 = smov %s1950_s13 }
 0x1d3   : > { %s2830_s13 = smov %s2031_s19  ;;  %s2831_s14 = smov %s2023_s16 }
 0x1d4   :  { %12 = sbr.rel (!%p10_p2) target bundleno = 2 (0x2), region = 144 }

// kernel: coinrun_actor_forward.4
= control target key start
LH: loop header
LB: loop body
LE: loop exit
PB: predicated region body
PF: predicated region fallthrough
CT: control target
= control target key end

     0   :  { %s1405_s12 = smov 0   ;;  %s1407_s13 = smov 0   ;;  %s1998_s0 = inlined_call_operand.vmem [shape: f32[450,288], index: 0, kind: input, shape index: {}]   ;;  %s1999_s1 = inlined_call_operand.vmem [shape: f32[288,64], index: 1, kind: input, shape index: {}]   ;;  %s2000_s2 = inlined_call_operand.vmem [shape: f32[1,64], index: 2, kind: input, shape index: {}]   ;;  %s2001_s3 = inlined_call_operand.vmem [shape: f32[450,64], index: 3, kind: output, shape index: {}]  }
   0x1   :  { %s1409_s14 = smov 0  }
   0x2 LB: > { %s1418_s15 = sadd.s32 4294967295, %s1351_s14   ;;  %s1420_s16 = sadd.s32 1, %s1351_s14   ;;  %s1351_s14 = sphi %s1409_s14, %s2010_s14   ;;  %s1347_s13 = sphi %s1407_s13, %s2009_s13   ;;  %s1343_s12 = sphi %s1405_s12, %s2008_s12  }
   0x3   : > { %s85_s17 = ssub.s32 %s1351_s14, %s1420_s16  ;;  %s88_s18 = sadd.s32 1, %s1347_s13 }
   0x4   : > { %p86_p0 = scmp.eq.s32.totalorder %s85_s17, 0  ;;  %p98_p1 = scmp.ne.s32.totalorder %s1347_s13, %s1343_s12 }
   0x5   : > { %p99_p2 = scmp.eq.s32.totalorder %s1418_s15, 1  ;;  %p1119_p3 = scmp.ge.s32.totalorder %s1351_s14, 1 }
   0x6   : > { %s1428_s19 = scalar_select %p86_p0, %s1347_s13, %s88_s18  }
   0x7   : > { %p1430_p4 = por %p99_p2, %p98_p1  ;;  %p149_p5 = scmp.lt.s32.totalorder %s1351_s14, 3 }
   0x9   : > { %p150_p6 = pnand %p1119_p3, %p149_p5 }
   0xa   : > { %s1446_s27 = smul.u32 (!%p150_p6), 29, %s1418_s15  ;;  %s175_s22 = sand.u32 (!%p150_p6), 1, %s1343_s12  }
   0xb   : > { %153 = sbr.rel (%p150_p6) target bundleno = 424 (0x1a8), region = 32 }
   0xc   : > { %p184_p7 = scmp.lt.s32.totalorder (!%p150_p6), %s1446_s27, 56  ;;  %s1199_s23 = smul.u32 (!%p150_p6), 232, %s175_s22 }
   0xe   : > { %s1719_s12 = scalar_lea.vmem (!%p150_p6), [#allocation2], %s1199_s23  }
  0x10   : > { %v302_v0 = vld [vmem:[%s1999_s1 + $0x78] sm:$0xff]  ;;  %v301_v1 = vld [vmem:[%s1999_s1 + $0x70] sm:$0xff]  ;;  %v300_v5 = vld [vmem:[%s1999_s1 + $0x68] sm:$0xff]  ;;  %s185_s21 = scalar_select %p184_p7, %s1446_s27, 56  ;;  %vm327_vm0 = vcmask 261120   ;;  %vm756_vm1 = vcmask 523264  }
  0x11   : > { %v1443_v2 = vld [vmem:[%s1999_s1 + $0xf8] sm:$0xff]  ;;  %415 = vmatpush.msra.mxu0 %v302_v0  ;;  %1163 = vmatpush.msra.mxu3 %v302_v0  ;;  %v1456_v4 = vld [vmem:[%s1999_s1 + $0xf0] sm:$0xff]  ;;  %v1472_v7 = vld [vmem:[%s1999_s1 + $0xe8] sm:$0xff]  ;;  %s1162_s24 = smul.u32 (%p1430_p4), 232, %s1418_s15 }
  0x12   : > { %v1451_v3 = vld [vmem:[%s1999_s1 + $0x118] sm:$0xff]  ;;  %519 = vmatpush.msra.mxu1 %v1443_v2  ;;  %v1466_v6 = vld [vmem:[%s1999_s1 + $0x110] sm:$0xff]  ;;  %v1477_v8 = vld [vmem:[%s1999_s1 + $0x108] sm:$0xff]  ;;  %s1200_s29 = smul.u32 24, %s185_s21 }
  0x13   : > { %635 = vmatpush.msra.mxu2 %v1451_v3  ;;  %416 = vmatpush.msra.mxu0 %v301_v1  ;;  %v299_v9 = vld [vmem:[%s1999_s1 + $0x60] sm:$0xff]  ;;  %v298_v12 = vld [vmem:[%s1999_s1 + $0x58] sm:$0xff]  ;;  %v297_v14 = vld [vmem:[%s1999_s1 + $0x50] sm:$0xff]  ;;  %s1870_s28 = scalar_lea.vmem (%p1430_p4), %s2001_s3, %s1162_s24  }
  0x14   : > { %1164 = vmatpush.msra.mxu3 %v301_v1  ;;  %520 = vmatpush.msra.mxu1 %v1456_v4  ;;  %v1488_v10 = vld [vmem:[%s1999_s1 + $0xe0] sm:$0xff]  ;;  %v1503_v13 = vld [vmem:[%s1999_s1 + $0xd8] sm:$0xff]  ;;  %s1510_s7 = scalar_lea.vmem %s1998_s0, %s1200_s29  ;;  %v1519_v16 = vld [vmem:[%s1999_s1 + $0xd0] sm:$0xff] }
  0x15   : > { %636 = vmatpush.msra.mxu2 %v1466_v6  ;;  %417 = vmatpush.msra.mxu0 %v300_v5  ;;  %v1493_v11 = vld [vmem:[%s1999_s1 + $0x100] sm:$0xff]  ;;  %v202_v15 = vld [vmem:[%s1510_s7 + $0x10] sm:$0xff]  ;;  %v296_v17 = vld [vmem:[%s1999_s1 + $0x48] sm:$0xff] }
  0x16   : > { %1165 = vmatpush.msra.mxu3 %v300_v5  ;;  %521 = vmatpush.msra.mxu1 %v1472_v7  ;;  %v1529_v18 = vld [vmem:[%s1999_s1 + $0xc8] sm:$0xff]  ;;  %v295_v19 = vld [vmem:[%s1999_s1 + $0x40] sm:$0xff]  ;;  %v294_v21 = vld [vmem:[%s1999_s1 + $0x38] sm:$0xff] }
  0x17   : > { %637 = vmatpush.msra.mxu2 %v1477_v8  ;;  %418 = vmatpush.msra.mxu0 %v299_v9  ;;  %v1538_v20 = vld [vmem:[%s1999_s1 + $0xc0] sm:$0xff]  ;;  %v205_v22 = vld [vmem:[%s1510_s7 + $0x28] sm:$0xff]  ;;  %v1548_v23 = vld [vmem:[%s1999_s1 + $0xb8] sm:$0xff] }
  0x18   : > { %1166 = vmatpush.msra.mxu3 %v299_v9  ;;  %522 = vmatpush.msra.mxu1 %v1488_v10  ;;  %v293_v24 = vld [vmem:[%s1999_s1 + $0x30] sm:$0xff]  ;;  %v292_v26 = vld [vmem:[%s1999_s1 + $0x28] sm:$0xff]  ;;  %v291_v28 = vld [vmem:[%s1999_s1 + $0x20] sm:$0xff] }
  0x19   : > { %638 = vmatpush.msra.mxu2 %v1493_v11  ;;  %419 = vmatpush.msra.mxu0 %v298_v12  ;;  %v1557_v25 = vld [vmem:[%s1999_s1 + $0xb0] sm:$0xff]  ;;  %v1567_v27 = vld [vmem:[%s1999_s1 + $0xa8] sm:$0xff]  ;;  %v1576_v29 = vld [vmem:[%s1999_s1 + $0xa0] sm:$0xff] }
  0x1a   : > { %1167 = vmatpush.msra.mxu3 %v298_v12  ;;  %1121 = vmatmul.msk.f32.vlgmr.msra.gmra.mxu2 %vm327_vm0, %v202_v15  ;;  %v290_v30 = vld [vmem:[%s1999_s1 + $0x18] sm:$0xff]  ;;  %v208_v31 = vld [vmem:[%s1510_s7 + $0x40] sm:$0xff]  ;;  %v289_v33 = vld [vmem:[%s1999_s1 + $0x10] sm:$0xff] }
  0x1b   : > { %523 = vmatpush.msra.mxu1 %v1503_v13  ;;  %420 = vmatpush.msra.mxu0 %v297_v14  ;;  %v306_v32 = vld [vmem:[%s1999_s1 + $0x98] sm:$0xff]  ;;  %v305_v34 = vld [vmem:[%s1999_s1 + $0x90] sm:$0xff]  ;;  %v288_v35 = vld [vmem:[%s1999_s1 + $0x8] sm:$0xff] }
  0x1c   : > { %1168 = vmatpush.msra.mxu3 %v297_v14  ;;  %v304_v36 = vld [vmem:[%s1999_s1 + $0x88] sm:$0xff]  ;;  %v287_v37 = vld [vmem:[%s1999_s1] sm:$0xff]  ;;  %v263_v39 = vld [vmem:[%s1510_s7 + $0x1f8] sm:$0xff] }
  0x1d   : > { %524 = vmatpush.msra.mxu1 %v1519_v16  ;;  %421 = vmatpush.msra.mxu0 %v296_v17  ;;  %v200_v38 = vld [vmem:[%s1510_s7] sm:$0xff]  ;;  %v201_v41 = vld [vmem:[%s1510_s7 + $0x8] sm:$0xff]  ;;  %v211_v42 = vld [vmem:[%s1510_s7 + $0x58] sm:$0xff] }
  0x1e   : > { %1169 = vmatpush.msra.mxu3 %v296_v17  ;;  %v303_v40 = vld [vmem:[%s1999_s1 + $0x80] sm:$0xff]  ;;  %v203_v43 = vld [vmem:[%s1510_s7 + $0x18] sm:$0xff]  ;;  %v266_v44 = vld [vmem:[%s1510_s7 + $0x210] sm:$0xff] }
  0x1f   : > { %525 = vmatpush.msra.mxu1 %v1529_v18  ;;  %422 = vmatpush.msra.mxu0 %v295_v19  ;;  %v204_v45 = vld [vmem:[%s1510_s7 + $0x20] sm:$0xff]  ;;  %v214_v46 = vld [vmem:[%s1510_s7 + $0x70] sm:$0xff]  ;;  %v269_v48 = vld [vmem:[%s1510_s7 + $0x228] sm:$0xff] }
  0x20   : > { %1170 = vmatpush.msra.mxu3 %v295_v19  ;;  %v206_v47 = vld [vmem:[%s1510_s7 + $0x30] sm:$0xff]  ;;  %v207_v49 = vld [vmem:[%s1510_s7 + $0x38] sm:$0xff]  ;;  %v217_v50 = vld [vmem:[%s1510_s7 + $0x88] sm:$0xff] }
  0x21   : > { %526 = vmatpush.msra.mxu1 %v1538_v20  ;;  %423 = vmatpush.msra.mxu0 %v294_v21  ;;  %v209_v51 = vld [vmem:[%s1510_s7 + $0x48] sm:$0xff]  ;;  %v272_v52 = vld [vmem:[%s1510_s7 + $0x240] sm:$0xff]  ;;  %v210_v53 = vld [vmem:[%s1510_s7 + $0x50] sm:$0xff] }
  0x22   : > { %1171 = vmatpush.msra.mxu3 %v294_v21  ;;  %1122 = vmatmul.msk.f32.gmra.mxu2 %vm327_vm0, %v205_v22  ;;  %v220_v54 = vld [vmem:[%s1510_s7 + $0xa0] sm:$0xff]  ;;  %v275_v56 = vld [vmem:[%s1510_s7 + $0x258] sm:$0xff]  ;;  %v213_v57 = vld [vmem:[%s1510_s7 + $0x68] sm:$0xff] }
  0x23   : > { %527 = vmatpush.msra.mxu1 %v1548_v23  ;;  %424 = vmatpush.msra.mxu0 %v293_v24  ;;  %v212_v55 = vld [vmem:[%s1510_s7 + $0x60] sm:$0xff]  ;;  %v223_v58 = vld [vmem:[%s1510_s7 + $0xb8] sm:$0xff]  ;;  %v278_v60 = vld [vmem:[%s1510_s7 + $0x270] sm:$0xff] }
  0x24   : > { %1172 = vmatpush.msra.mxu3 %v293_v24  ;;  %v215_v59 = vld [vmem:[%s1510_s7 + $0x78] sm:$0xff]  ;;  %v216_v61 = vld [vmem:[%s1510_s7 + $0x80] sm:$0xff]  ;;  %v226_v62 = vld [vmem:[%s1510_s7 + $0xd0] sm:$0xff] }
  0x25   : > { %528 = vmatpush.msra.mxu1 %v1557_v25  ;;  %425 = vmatpush.msra.mxu0 %v292_v26  ;;  %v218_v63 = vld [vmem:[%s1510_s7 + $0x90] sm:$0xff]  ;;  %v281_v0 = vld [vmem:[%s1510_s7 + $0x288] sm:$0xff]  ;;  %v219_v1 = vld [vmem:[%s1510_s7 + $0x98] sm:$0xff] }
  0x26   : > { %1173 = vmatpush.msra.mxu3 %v292_v26  ;;  %v222_v5 = vld [vmem:[%s1510_s7 + $0xb0] sm:$0xff]  ;;  %v225_v9 = vld [vmem:[%s1510_s7 + $0xc8] sm:$0xff]  ;;  %v267_v12 = vld [vmem:[%s1510_s7 + $0x218] sm:$0xff] }
  0x27   : > { %529 = vmatpush.msra.mxu1 %v1567_v27  ;;  %426 = vmatpush.msra.mxu0 %v291_v28  ;;  %v238_v14 = vld [vmem:[%s1510_s7 + $0x130] sm:$0xff]  ;;  %v231_v17 = vld [vmem:[%s1510_s7 + $0xf8] sm:$0xff]  ;;  %v233_v19 = vld [vmem:[%s1510_s7 + $0x108] sm:$0xff] }
  0x28   : > { %1174 = vmatpush.msra.mxu3 %v291_v28  ;;  %v230_v15 = vld [vmem:[%s1510_s7 + $0xf0] sm:$0xff]  ;;  %v244_v22 = vld [vmem:[%s1510_s7 + $0x160] sm:$0xff]  ;;  %v247_v26 = vld [vmem:[%s1510_s7 + $0x178] sm:$0xff] }
  0x29   : > { %530 = vmatpush.msra.mxu1 %v1576_v29  ;;  %427 = vmatpush.msra.mxu0 %v290_v30  ;;  %v234_v21 = vld [vmem:[%s1510_s7 + $0x110] sm:$0xff]  ;;  %v276_v24 = vld [vmem:[%s1510_s7 + $0x260] sm:$0xff]  ;;  %v279_v28 = vld [vmem:[%s1510_s7 + $0x278] sm:$0xff] }
  0x2a   : > { %1175 = vmatpush.msra.mxu3 %v290_v30  ;;  %1123 = vmatmul.msk.f32.gmra.mxu2 %vm327_vm0, %v208_v31  ;;  %v250_v30 = vld [vmem:[%s1510_s7 + $0x190] sm:$0xff] }
  0x2b   : > { %531 = vmatpush.msra.mxu1 %v306_v32  ;;  %428 = vmatpush.msra.mxu0 %v289_v33 }
  0x2c   : > { %1176 = vmatpush.msra.mxu3 %v289_v33  ;;  %v282_v33 = vld [vmem:[%s1510_s7 + $0x290] sm:$0xff] }
  0x2d   : > { %532 = vmatpush.msra.mxu1 %v305_v34  ;;  %429 = vmatpush.msra.mxu0 %v288_v35 }
  0x2e   : > { %1177 = vmatpush.msra.mxu3 %v288_v35  ;;  %v253_v35 = vld [vmem:[%s1510_s7 + $0x1a8] sm:$0xff] }
  0x2f   : > { %533 = vmatpush.msra.mxu1 %v304_v36  ;;  %430 = vmatpush.msra.mxu0 %v287_v37 }
  0x30   : > { %1178 = vmatpush.msra.mxu3 %v287_v37  ;;  %431 = vmatmul.f32.vlgmr.msra.gmra.mxu0 %v200_v38  ;;  %v245_v37 = vld [vmem:[%s1510_s7 + $0x168] sm:$0xff] }
  0x31   : > { %494 = vmatmul.f32.vlgmr.msra.gmra.mxu3 %v263_v39  ;;  %534 = vmatpush.msra.mxu1 %v303_v40  ;;  %v285_v38 = vld [vmem:[%s1510_s7 + $0x2a8] sm:$0xff]  ;;  %v246_v39 = vld [vmem:[%s1510_s7 + $0x170] sm:$0xff] }
  0x32   : > { %1179 = vmatpush.msrb.mxu3 %v1443_v2  ;;  %535 = vmatmul.f32.vlgmr.msra.gmra.mxu1 %v201_v41  ;;  %v229_v2 = vld [vmem:[%s1510_s7 + $0xe8] sm:$0xff]  ;;  %v1705_v41 = vld [vmem:[%s2000_s2] ss:$0 sm:$0xff] }
  0x33   : > { %1124 = vmatmul.msk.f32.gmra.mxu2 %vm327_vm0, %v211_v42 }
  0x34   : > { %1180 = vmatpush.msrb.mxu3 %v1456_v4  ;;  %v284_v4 = vld [vmem:[%s1510_s7 + $0x2a0] sm:$0xff] }
  0x36   : > { %1181 = vmatpush.msrb.mxu3 %v1472_v7  ;;  %v224_v7 = vld [vmem:[%s1510_s7 + $0xc0] sm:$0xff] }
  0x38   : > { %1182 = vmatpush.msrb.mxu3 %v1488_v10  ;;  %434 = vmatmul.f32.gmra.mxu0 %v203_v43  ;;  %v235_v10 = vld [vmem:[%s1510_s7 + $0x118] sm:$0xff] }
  0x39   : > { %497 = vmatmul.f32.gmra.mxu3 %v266_v44  ;;  %v248_v44 = vld [vmem:[%s1510_s7 + $0x180] sm:$0xff] }
  0x3a   : > { %1183 = vmatpush.msrb.mxu3 %v1503_v13  ;;  %538 = vmatmul.f32.gmra.mxu1 %v204_v45  ;;  %v228_v13 = vld [vmem:[%s1510_s7 + $0xe0] sm:$0xff]  ;;  %v274_v45 = vld [vmem:[%s1510_s7 + $0x250] sm:$0xff] }
  0x3b   : > { %1125 = vmatmul.msk.f32.gmra.mxu2 %vm327_vm0, %v214_v46 }
  0x3c   : > { %1184 = vmatpush.msrb.mxu3 %v1519_v16  ;;  %v270_v16 = vld [vmem:[%s1510_s7 + $0x230] sm:$0xff] }
  0x3e   : > { %1185 = vmatpush.msrb.mxu3 %v1529_v18  ;;  %v241_v18 = vld [vmem:[%s1510_s7 + $0x148] sm:$0xff] }
  0x40   : > { %1186 = vmatpush.msrb.mxu3 %v1538_v20  ;;  %437 = vmatmul.f32.gmra.mxu0 %v206_v47  ;;  %v273_v20 = vld [vmem:[%s1510_s7 + $0x248] sm:$0xff] }
  0x41   : > { %500 = vmatmul.f32.gmra.mxu3 %v269_v48  ;;  %v249_v48 = vld [vmem:[%s1510_s7 + $0x188] sm:$0xff] }
  0x42   : > { %1187 = vmatpush.msrb.mxu3 %v1548_v23  ;;  %541 = vmatmul.f32.gmra.mxu1 %v207_v49  ;;  %v236_v23 = vld [vmem:[%s1510_s7 + $0x120] sm:$0xff]  ;;  %v259_v49 = vld [vmem:[%s1510_s7 + $0x1d8] sm:$0xff] }
  0x43   : > { %1126 = vmatmul.msk.f32.gmra.mxu2 %vm327_vm0, %v217_v50 }
  0x44   : > { %1188 = vmatpush.msrb.mxu3 %v1557_v25  ;;  %v237_v25 = vld [vmem:[%s1510_s7 + $0x128] sm:$0xff] }
  0x46   : > { %1189 = vmatpush.msrb.mxu3 %v1567_v27  ;;  %v239_v27 = vld [vmem:[%s1510_s7 + $0x138] sm:$0xff] }
  0x48   : > { %1190 = vmatpush.msrb.mxu3 %v1576_v29  ;;  %440 = vmatmul.f32.gmra.mxu0 %v209_v51  ;;  %v240_v29 = vld [vmem:[%s1510_s7 + $0x140] sm:$0xff] }
  0x49   : > { %503 = vmatmul.f32.gmra.mxu3 %v272_v52 }
  0x4a   : > { %1191 = vmatpush.msrb.mxu3 %v306_v32  ;;  %544 = vmatmul.f32.gmra.mxu1 %v210_v53  ;;  %v242_v32 = vld [vmem:[%s1510_s7 + $0x150] sm:$0xff] }
  0x4b   : > { %1127 = vmatmul.msk.f32.gmra.mxu2 %vm327_vm0, %v220_v54 }
  0x4c   : > { %1192 = vmatpush.msrb.mxu3 %v305_v34  ;;  %v243_v34 = vld [vmem:[%s1510_s7 + $0x158] sm:$0xff] }
  0x4e   : > { %1193 = vmatpush.msrb.mxu3 %v304_v36 }
  0x50   : > { %1194 = vmatpush.msrb.mxu3 %v303_v40  ;;  %443 = vmatmul.f32.gmra.mxu0 %v212_v55  ;;  %v256_v40 = vld [vmem:[%s1510_s7 + $0x1c0] sm:$0xff] }
  0x51   : > { %506 = vmatmul.f32.gmra.mxu3 %v275_v56  ;;  %v251_v56 = vld [vmem:[%s1510_s7 + $0x198] sm:$0xff] }
  0x52   : > { %1195 = vmatpush.msra.mxu3 %v1451_v3  ;;  %547 = vmatmul.f32.gmra.mxu1 %v213_v57  ;;  %v221_v3 = vld [vmem:[%s1510_s7 + $0xa8] sm:$0xff] }
  0x53   : > { %1128 = vmatmul.msk.f32.gmra.mxu2 %vm327_vm0, %v223_v58  ;;  %v277_v57 = vld [vmem:[%s1510_s7 + $0x268] sm:$0xff] }
  0x54   : > { %1196 = vmatpush.msra.mxu3 %v1466_v6  ;;  %v232_v6 = vld [vmem:[%s1510_s7 + $0x100] sm:$0xff] }
  0x56   : > { %1197 = vmatpush.msra.mxu3 %v1477_v8  ;;  %v264_v8 = vld [vmem:[%s1510_s7 + $0x200] sm:$0xff] }
  0x58   : > { %1198 = vmatpush.msra.mxu3 %v1493_v11  ;;  %446 = vmatmul.f32.gmra.mxu0 %v215_v59  ;;  %v227_v11 = vld [vmem:[%s1510_s7 + $0xd8] sm:$0xff] }
  0x59   : > { %509 = vmatmul.f32.gmra.mxu3 %v278_v60  ;;  %v252_v60 = vld [vmem:[%s1510_s7 + $0x1a0] sm:$0xff] }
  0x5a   : > { %550 = vmatmul.f32.gmra.mxu1 %v216_v61  ;;  %v262_v61 = vld [vmem:[%s1510_s7 + $0x1f0] sm:$0xff] }
  0x5b   : > { %1129 = vmatmul.msk.f32.gmra.mxu2 %vm327_vm0, %v226_v62 }
  0x60   : > { %449 = vmatmul.f32.gmra.mxu0 %v218_v63 }
  0x61   : > { %512 = vmatmul.f32.gmra.mxu3 %v281_v0 }
  0x62   : > { %553 = vmatmul.f32.gmra.mxu1 %v219_v1 }
  0x63   : > { %1130 = vmatmul.msk.f32.gmra.mxu2 %vm327_vm0, %v229_v2 }
  0x68   : > { %452 = vmatmul.f32.gmra.mxu0 %v221_v3 }
  0x69   : > { %515 = vmatmul.f32.gmra.mxu3 %v284_v4  ;;  %v254_v4 = vld [vmem:[%s1510_s7 + $0x1b0] sm:$0xff] }
  0x6a   : > { %556 = vmatmul.f32.gmra.mxu1 %v222_v5  ;;  %v280_v5 = vld [vmem:[%s1510_s7 + $0x280] sm:$0xff] }
  0x6b   : > { %1131 = vmatmul.msk.f32.gmra.mxu2 %vm327_vm0, %v232_v6 }
  0x70   : > { %455 = vmatmul.f32.gmra.mxu0 %v224_v7 }
  0x71   : > { %598 = vmatmul.f32.vlgmr.msrb.gmra.mxu3 %v264_v8  ;;  %v255_v8 = vld [vmem:[%s1510_s7 + $0x1b8] sm:$0xff] }
  0x72   : > { %559 = vmatmul.f32.gmra.mxu1 %v225_v9  ;;  %v265_v9 = vld [vmem:[%s1510_s7 + $0x208] sm:$0xff] }
  0x73   : > { %1132 = vmatmul.msk.f32.gmra.mxu2 %vm327_vm0, %v235_v10 }
  0x78   : > { %458 = vmatmul.f32.gmra.mxu0 %v227_v11 }
  0x79   : > { %601 = vmatmul.f32.gmra.mxu3 %v267_v12 }
  0x7a   : > { %562 = vmatmul.f32.gmra.mxu1 %v228_v13 }
  0x7b   : > { %1133 = vmatmul.msk.f32.gmra.mxu2 %vm327_vm0, %v238_v14 }
  0x80   : > { %461 = vmatmul.f32.gmra.mxu0 %v230_v15 }
  0x81   : > { %604 = vmatmul.f32.gmra.mxu3 %v270_v16  ;;  %v257_v16 = vld [vmem:[%s1510_s7 + $0x1c8] sm:$0xff] }
  0x82   : > { %565 = vmatmul.f32.gmra.mxu1 %v231_v17  ;;  %v283_v17 = vld [vmem:[%s1510_s7 + $0x298] sm:$0xff] }
  0x83   : > { %1134 = vmatmul.msk.f32.gmra.mxu2 %vm327_vm0, %v241_v18 }
  0x88   : > { %464 = vmatmul.f32.gmra.mxu0 %v233_v19 }
  0x89   : > { %607 = vmatmul.f32.gmra.mxu3 %v273_v20  ;;  %v258_v20 = vld [vmem:[%s1510_s7 + $0x1d0] sm:$0xff] }
  0x8a   : > { %568 = vmatmul.f32.gmra.mxu1 %v234_v21  ;;  %v268_v21 = vld [vmem:[%s1510_s7 + $0x220] sm:$0xff] }
  0x8b   : > { %1135 = vmatmul.msk.f32.gmra.mxu2 %vm327_vm0, %v244_v22 }
  0x90   : > { %467 = vmatmul.f32.gmra.mxu0 %v236_v23 }
  0x91   : > { %610 = vmatmul.f32.gmra.mxu3 %v276_v24 }
  0x92   : > { %571 = vmatmul.f32.gmra.mxu1 %v237_v25 }
  0x93   : > { %1136 = vmatmul.msk.f32.gmra.mxu2 %vm327_vm0, %v247_v26 }
  0x98   : > { %470 = vmatmul.f32.gmra.mxu0 %v239_v27 }
  0x99   : > { %613 = vmatmul.f32.gmra.mxu3 %v279_v28  ;;  %v260_v28 = vld [vmem:[%s1510_s7 + $0x1e0] sm:$0xff] }
  0x9a   : > { %574 = vmatmul.f32.gmra.mxu1 %v240_v29  ;;  %v286_v29 = vld [vmem:[%s1510_s7 + $0x2b0] sm:$0xff] }
  0x9b   : > { %1137 = vmatmul.msk.f32.gmra.mxu2 %vm327_vm0, %v250_v30 }
  0x9d   : > { %v640_v31 = vpop.f32.mrf.mxu2 }
  0xa0   : > { %473 = vmatmul.f32.gmra.mxu0 %v242_v32  ;;  %v261_v32 = vld [vmem:[%s1510_s7 + $0x1e8] sm:$0xff] }
  0xa1   : > { %616 = vmatmul.f32.gmra.mxu3 %v282_v33  ;;  %v271_v33 = vld [vmem:[%s1510_s7 + $0x238] sm:$0xff]  ;;  %s794_s7 = ssub.s32 (%p1430_p4), 57, %s1446_s27 }
  0xa2   : > { %577 = vmatmul.f32.gmra.mxu1 %v243_v34  ;;  %p795_p8 = scmp.lt.s32.totalorder (%p1430_p4), %s794_s7, 29 }
  0xa3   : > { %1138 = vmatmul.msk.f32.gmra.mxu2 %vm327_vm0, %v253_v35 }
  0xa5   : > { %v643_v36 = vpop.f32.mrf.mxu2 }
  0xa8   : > { %476 = vmatmul.f32.gmra.mxu0 %v245_v37 }
  0xa9   : > { %619 = vmatmul.f32.gmra.mxu3 %v285_v38 }
  0xaa   : > { %580 = vmatmul.f32.gmra.mxu1 %v246_v39 }
  0xab   : > { %1139 = vmatmul.msk.f32.gmra.mxu2 %vm327_vm0, %v256_v40 }
  0xad   : > { %v432_v42 = vpop.f32.mrf.mxu0  ;;  %v646_v43 = vpop.f32.mrf.mxu2 }
  0xae   : > { %v433_v46 = vadd.f32 %v1705_v41, %v432_v42 }
  0xaf   : > { %v536_v47 = vpop.f32.mrf.mxu1 }
  0xb0   : > { %v537_v50 = vadd.f32 %v536_v47, %v433_v46  ;;  %479 = vmatmul.f32.gmra.mxu0 %v248_v44 }
  0xb1   : > { %1145 = vmatmul.msk.f32.vlgmr.msra.gmra.mxu3 %vm327_vm0, %v274_v45 }
  0xb2   : > { %v641_v51 = vadd.f32 %v640_v31, %v537_v50  ;;  %583 = vmatmul.f32.gmra.mxu1 %v249_v48 }
  0xb3   : > { %1140 = vmatmul.msk.f32.gmra.mxu2 %vm327_vm0, %v259_v49 }
  0xb4   : > { %v1715_v52 = vpop.f32.mrf.mxu3  ;;  %v727_v53 = vmax.f32 %v641_v51, 0.0 }
  0xb5   : > { %v435_v54 = vpop.f32.mrf.mxu0 }
  0xb6   : > { %v649_v55 = vpop.f32.mrf.mxu2  ;;  %757 = vst.msk [vmem:[%s1719_s12] sm:$0xff] %vm756_vm1, %v727_v53  ;;  %v436_v58 = vadd.f32 %v1705_v41, %v435_v54 }
  0xb7   : > { %v539_v59 = vpop.f32.mrf.mxu1 }
  0xb8   : > { %v540_v62 = vadd.f32 %v539_v59, %v436_v58  ;;  %482 = vmatmul.f32.gmra.mxu0 %v251_v56 }
  0xb9   : > { %1146 = vmatmul.msk.f32.gmra.mxu3 %vm327_vm0, %v277_v57 }
  0xba   : > { %v644_v63 = vadd.f32 %v643_v36, %v540_v62  ;;  %586 = vmatmul.f32.gmra.mxu1 %v252_v60 }
  0xbb   : > { %1141 = vmatmul.msk.f32.gmra.mxu2 %vm327_vm0, %v262_v61 }
  0xbc   : > { %v1728_v0 = vpop.f32.mrf.mxu3  ;;  %v728_v1 = vmax.f32 %v644_v63, 0.0 }
  0xbd   : > { %v438_v2 = vpop.f32.mrf.mxu0 }
  0xbe   : > { %v652_v3 = vpop.f32.mrf.mxu2  ;;  %758 = vst.msk [vmem:[%s1719_s12 + $0x8] sm:$0xff] %vm756_vm1, %v728_v1  ;;  %v439_v6 = vadd.f32 %v1705_v41, %v438_v2 }
  0xbf   : > { %v542_v7 = vpop.f32.mrf.mxu1 }
  0xc0   : > { %v543_v10 = vadd.f32 %v542_v7, %v439_v6  ;;  %485 = vmatmul.f32.gmra.mxu0 %v254_v4  ;;  %v496_v6 = vadd.f32 %v1705_v41, %v1715_v52 }
  0xc1   : > { %1147 = vmatmul.msk.f32.gmra.mxu3 %vm327_vm0, %v280_v5 }
  0xc2   : > { %v647_v11 = vadd.f32 %v646_v43, %v543_v10  ;;  %589 = vmatmul.f32.gmra.mxu1 %v255_v8 }
  0xc3   : > { %1142 = vmatmul.msk.f32.gmra.mxu2 %vm327_vm0, %v265_v9 }
  0xc4   : > { %v1739_v12 = vpop.f32.mrf.mxu3  ;;  %v729_v13 = vmax.f32 %v647_v11, 0.0 }
  0xc5   : > { %v441_v14 = vpop.f32.mrf.mxu0 }
  0xc6   : > { %v655_v15 = vpop.f32.mrf.mxu2  ;;  %759 = vst.msk [vmem:[%s1719_s12 + $0x10] sm:$0xff] %vm756_vm1, %v729_v13  ;;  %v442_v18 = vadd.f32 %v1705_v41, %v441_v14 }
  0xc7   : > { %v545_v19 = vpop.f32.mrf.mxu1 }
  0xc8   : > { %v546_v22 = vadd.f32 %v545_v19, %v442_v18  ;;  %488 = vmatmul.f32.gmra.mxu0 %v257_v16 }
  0xc9   : > { %1148 = vmatmul.msk.f32.gmra.mxu3 %vm327_vm0, %v283_v17  ;;  %v499_v17 = vadd.f32 %v1705_v41, %v1728_v0 }
  0xca   : > { %v650_v23 = vadd.f32 %v649_v55, %v546_v22  ;;  %592 = vmatmul.f32.gmra.mxu1 %v258_v20 }
  0xcb   : > { %1143 = vmatmul.msk.f32.gmra.mxu2 %vm327_vm0, %v268_v21 }
  0xcc   : > { %v1750_v24 = vpop.f32.mrf.mxu3  ;;  %v730_v25 = vmax.f32 %v650_v23, 0.0 }
  0xcd   : > { %v444_v26 = vpop.f32.mrf.mxu0 }
  0xce   : > { %v658_v27 = vpop.f32.mrf.mxu2  ;;  %760 = vst.msk [vmem:[%s1719_s12 + $0x18] sm:$0xff] %vm756_vm1, %v730_v25  ;;  %v445_v30 = vadd.f32 %v1705_v41, %v444_v26 }
  0xcf   : > { %v548_v31 = vpop.f32.mrf.mxu1 }
  0xd0   : > { %v549_v34 = vadd.f32 %v548_v31, %v445_v30  ;;  %491 = vmatmul.f32.gmra.mxu0 %v260_v28 }
  0xd1   : > { %1149 = vmatmul.msk.f32.gmra.mxu3 %vm327_vm0, %v286_v29 }
  0xd2   : > { %v653_v35 = vadd.f32 %v652_v3, %v549_v34  ;;  %595 = vmatmul.f32.gmra.mxu1 %v261_v32 }
  0xd3   : > { %1144 = vmatmul.msk.f32.gmra.mxu2 %vm327_vm0, %v271_v33 }
  0xd4   : > { %v1761_v36 = vpop.f32.mrf.mxu3  ;;  %v731_v37 = vmax.f32 %v653_v35, 0.0 }
  0xd5   : > { %v447_v38 = vpop.f32.mrf.mxu0 }
  0xd6   : > { %v661_v39 = vpop.f32.mrf.mxu2  ;;  %761 = vst.msk [vmem:[%s1719_s12 + $0x20] sm:$0xff] %vm756_vm1, %v731_v37  ;;  %v448_v40 = vadd.f32 %v1705_v41, %v447_v38 }
  0xd7   : > { %v551_v42 = vpop.f32.mrf.mxu1 }
  0xd8   : > { %v552_v43 = vadd.f32 %v551_v42, %v448_v40 }
  0xda   : > { %v656_v44 = vadd.f32 %v655_v15, %v552_v43 }
  0xdc   : > { %v1766_v45 = vpop.f32.mrf.mxu3  ;;  %v732_v46 = vmax.f32 %v656_v44, 0.0 }
  0xdd   : > { %v450_v47 = vpop.f32.mrf.mxu0 }
  0xde   : > { %v664_v48 = vpop.f32.mrf.mxu2  ;;  %762 = vst.msk [vmem:[%s1719_s12 + $0x28] sm:$0xff] %vm756_vm1, %v732_v46  ;;  %v451_v49 = vadd.f32 %v1705_v41, %v450_v47 }
  0xdf   : > { %v554_v50 = vpop.f32.mrf.mxu1 }
  0xe0   : > { %v555_v51 = vadd.f32 %v554_v50, %v451_v49 }
  0xe2   : > { %v659_v53 = vadd.f32 %v658_v27, %v555_v51  ;;  %v502_v27 = vadd.f32 %v1705_v41, %v1739_v12 }
  0xe4   : > { %v1771_v54 = vpop.f32.mrf.mxu3  ;;  %v733_v55 = vmax.f32 %v659_v53, 0.0 }
  0xe5   : > { %v453_v56 = vpop.f32.mrf.mxu0 }
  0xe6   : > { %v667_v57 = vpop.f32.mrf.mxu2  ;;  %763 = vst.msk [vmem:[%s1719_s12 + $0x30] sm:$0xff] %vm756_vm1, %v733_v55  ;;  %v454_v58 = vadd.f32 %v1705_v41, %v453_v56 }
  0xe7   : > { %v557_v59 = vpop.f32.mrf.mxu1 }
  0xe8   : > { %v558_v60 = vadd.f32 %v557_v59, %v454_v58 }
  0xea   : > { %v662_v61 = vadd.f32 %v661_v39, %v558_v60 }
  0xec   : > { %v1776_v62 = vpop.f32.mrf.mxu3  ;;  %v734_v63 = vmax.f32 %v662_v61, 0.0 }
  0xed   : > { %v456_v1 = vpop.f32.mrf.mxu0 }
  0xee   : > { %v670_v2 = vpop.f32.mrf.mxu2  ;;  %764 = vst.msk [vmem:[%s1719_s12 + $0x38] sm:$0xff] %vm756_vm1, %v734_v63  ;;  %v457_v3 = vadd.f32 %v1705_v41, %v456_v1 }
  0xef   : > { %v560_v4 = vpop.f32.mrf.mxu1 }
  0xf0   : > { %v561_v5 = vadd.f32 %v560_v4, %v457_v3 }
  0xf2   : > { %v665_v7 = vadd.f32 %v664_v48, %v561_v5 }
  0xf4   : > { %v599_v8 = vpop.f32.mrf.mxu3  ;;  %v735_v9 = vmax.f32 %v665_v7, 0.0 }
  0xf5   : > { %v1783_v10 = vadd.f32 %v599_v8, %v496_v6  ;;  %v459_v11 = vpop.f32.mrf.mxu0 }
  0xf6   : > { %v673_v13 = vpop.f32.mrf.mxu2  ;;  %765 = vst.msk [vmem:[%s1719_s12 + $0x40] sm:$0xff] %vm756_vm1, %v735_v9  ;;  %v460_v14 = vadd.f32 %v1705_v41, %v459_v11 }
  0xf7   : > { %v563_v15 = vpop.f32.mrf.mxu1 }
  0xf8   : > { %v564_v16 = vadd.f32 %v563_v15, %v460_v14 }
  0xfa   : > { %v668_v18 = vadd.f32 %v667_v57, %v564_v16 }
  0xfc   : > { %v602_v19 = vpop.f32.mrf.mxu3  ;;  %v736_v52 = vmax.f32 %v668_v18, 0.0 }
  0xfd   : > { %v1790_v20 = vadd.f32 %v602_v19, %v499_v17  ;;  %v462_v21 = vpop.f32.mrf.mxu0  ;;  %v505_v19 = vadd.f32 %v1705_v41, %v1750_v24 }
  0xfe   : > { %v676_v22 = vpop.f32.mrf.mxu2  ;;  %766 = vst.msk [vmem:[%s1719_s12 + $0x48] sm:$0xff] %vm756_vm1, %v736_v52  ;;  %v463_v23 = vadd.f32 %v1705_v41, %v462_v21 }
  0xff   : > { %v566_v25 = vpop.f32.mrf.mxu1 }
 0x100   : > { %v567_v26 = vadd.f32 %v566_v25, %v463_v23 }
 0x102   : > { %v671_v28 = vadd.f32 %v670_v2, %v567_v26 }
 0x104   : > { %v605_v0 = vpop.f32.mrf.mxu3  ;;  %v737_v29 = vmax.f32 %v671_v28, 0.0 }
 0x105   : > { %v1797_v30 = vadd.f32 %v605_v0, %v502_v27  ;;  %v465_v31 = vpop.f32.mrf.mxu0 }
 0x106   : > { %v679_v32 = vpop.f32.mrf.mxu2  ;;  %767 = vst.msk [vmem:[%s1719_s12 + $0x50] sm:$0xff] %vm756_vm1, %v737_v29  ;;  %v466_v33 = vadd.f32 %v1705_v41, %v465_v31 }
 0x107   : > { %v569_v34 = vpop.f32.mrf.mxu1 }
 0x108   : > { %v570_v35 = vadd.f32 %v569_v34, %v466_v33 }
 0x10a   : > { %v674_v37 = vadd.f32 %v673_v13, %v570_v35 }
 0x10c   : > { %v608_v38 = vpop.f32.mrf.mxu3  ;;  %v738_v39 = vmax.f32 %v674_v37, 0.0 }
 0x10d   : > { %v468_v40 = vpop.f32.mrf.mxu0  ;;  %v609_v21 = vadd.f32 %v608_v38, %v505_v19 }
 0x10e   : > { %v682_v12 = vpop.f32.mrf.mxu2  ;;  %768 = vst.msk [vmem:[%s1719_s12 + $0x58] sm:$0xff] %vm756_vm1, %v738_v39  ;;  %v469_v42 = vadd.f32 %v1705_v41, %v468_v40 }
 0x10f   : > { %v572_v43 = vpop.f32.mrf.mxu1 }
 0x110   : > { %v573_v44 = vadd.f32 %v572_v43, %v469_v42 }
 0x112   : > { %v677_v46 = vadd.f32 %v676_v22, %v573_v44 }
 0x114   : > { %v611_v47 = vpop.f32.mrf.mxu3  ;;  %v739_v48 = vmax.f32 %v677_v46, 0.0 }
 0x115   : > { %v471_v49 = vpop.f32.mrf.mxu0 }
 0x116   : > { %v685_v50 = vpop.f32.mrf.mxu2  ;;  %769 = vst.msk [vmem:[%s1719_s12 + $0x60] sm:$0xff] %vm756_vm1, %v739_v48  ;;  %v472_v51 = vadd.f32 %v1705_v41, %v471_v49 }
 0x117   : > { %v575_v53 = vpop.f32.mrf.mxu1 }
 0x118   : > { %v576_v55 = vadd.f32 %v575_v53, %v472_v51 }
 0x11a   : > { %v680_v56 = vadd.f32 %v679_v32, %v576_v55  ;;  %v508_v32 = vadd.f32 %v1705_v41, %v1761_v36  ;;  %v511_v36 = vadd.f32 %v1705_v41, %v1766_v45 }
 0x11c   : > { %v614_v57 = vpop.f32.mrf.mxu3  ;;  %v740_v58 = vmax.f32 %v680_v56, 0.0  ;;  %v612_v33 = vadd.f32 %v611_v47, %v508_v32 }
 0x11d   : > { %v474_v59 = vpop.f32.mrf.mxu0  ;;  %v615_v46 = vadd.f32 %v614_v57, %v511_v36 }
 0x11e   : > { %v688_v60 = vpop.f32.mrf.mxu2  ;;  %770 = vst.msk [vmem:[%s1719_s12 + $0x68] sm:$0xff] %vm756_vm1, %v740_v58  ;;  %v475_v61 = vadd.f32 %v1705_v41, %v474_v59  ;;  %v514_v59 = vadd.f32 %v1705_v41, %v1771_v54 }
 0x11f   : > { %v578_v63 = vpop.f32.mrf.mxu1 }
 0x120   : > { %v579_v1 = vadd.f32 %v578_v63, %v475_v61 }
 0x122   : > { %v683_v2 = vadd.f32 %v682_v12, %v579_v1 }
 0x124   : > { %v617_v3 = vpop.f32.mrf.mxu3  ;;  %v741_v4 = vmax.f32 %v683_v2, 0.0 }
 0x125   : > { %v477_v5 = vpop.f32.mrf.mxu0  ;;  %v618_v61 = vadd.f32 %v617_v3, %v514_v59  ;;  %v517_v3 = vadd.f32 %v1705_v41, %v1776_v62 }
 0x126   : > { %v691_v6 = vpop.f32.mrf.mxu2  ;;  %771 = vst.msk [vmem:[%s1719_s12 + $0x70] sm:$0xff] %vm756_vm1, %v741_v4  ;;  %v478_v7 = vadd.f32 %v1705_v41, %v477_v5 }
 0x127   : > { %v581_v8 = vpop.f32.mrf.mxu1 }
 0x128   : > { %v582_v9 = vadd.f32 %v581_v8, %v478_v7 }
 0x12a   : > { %v686_v11 = vadd.f32 %v685_v50, %v582_v9 }
 0x12c   : > { %v1814_v13 = vpop.f32.mrf.mxu3  ;;  %v742_v14 = vmax.f32 %v686_v11, 0.0 }
 0x12d   : > { %v480_v15 = vpop.f32.mrf.mxu0 }
 0x12e   : > { %v694_v16 = vpop.f32.mrf.mxu2  ;;  %772 = vst.msk [vmem:[%s1719_s12 + $0x78] sm:$0xff] %vm756_vm1, %v742_v14  ;;  %v481_v17 = vadd.f32 %v1705_v41, %v480_v15  ;;  %v621_v14 = vadd.f32 %v1814_v13, %v517_v3 }
 0x12f   : > { %v584_v18 = vpop.f32.mrf.mxu1 }
 0x130   : > { %v585_v52 = vadd.f32 %v584_v18, %v481_v17 }
 0x132   : > { %v689_v22 = vadd.f32 %v688_v60, %v585_v52 }
 0x134   : > { %v712_v23 = vpop.f32.mrf.mxu3  ;;  %v743_v25 = vmax.f32 %v689_v22, 0.0 }
 0x135   : > { %v713_v26 = vadd.f32 %v712_v23, %v609_v21  ;;  %v483_v27 = vpop.f32.mrf.mxu0 }
 0x136   : > { %v697_v28 = vpop.f32.mrf.mxu2  ;;  %773 = vst.msk [vmem:[%s1719_s12 + $0x80] sm:$0xff] %vm756_vm1, %v743_v25  ;;  %v484_v29 = vadd.f32 %v1705_v41, %v483_v27 }
 0x137   : > { %v751_v0 = vmax.f32 %v713_v26, 0.0  ;;  %v587_v31 = vpop.f32.mrf.mxu1 }
 0x138   : > { %v588_v24 = vadd.f32 %v587_v31, %v484_v29 }
 0x139   : > { %781 = vst.msk [vmem:[%s1719_s12 + $0xc0] sm:$0xff] %vm756_vm1, %v751_v0 }
 0x13a   : > { %v692_v34 = vadd.f32 %v691_v6, %v588_v24 }
 0x13c   : > { %v715_v35 = vpop.f32.mrf.mxu3  ;;  %v744_v37 = vmax.f32 %v692_v34, 0.0 }
 0x13d   : > { %v716_v38 = vadd.f32 %v715_v35, %v612_v33  ;;  %v486_v39 = vpop.f32.mrf.mxu0 }
 0x13e   : > { %v700_v40 = vpop.f32.mrf.mxu2  ;;  %774 = vst.msk [vmem:[%s1719_s12 + $0x88] sm:$0xff] %vm756_vm1, %v744_v37  ;;  %v487_v42 = vadd.f32 %v1705_v41, %v486_v39 }
 0x13f   : > { %v752_v12 = vmax.f32 %v716_v38, 0.0  ;;  %v590_v43 = vpop.f32.mrf.mxu1 }
 0x140   : > { %v591_v44 = vadd.f32 %v590_v43, %v487_v42 }
 0x141   : > { %782 = vst.msk [vmem:[%s1719_s12 + $0xc8] sm:$0xff] %vm756_vm1, %v752_v12 }
 0x142   : > { %v695_v47 = vadd.f32 %v694_v16, %v591_v44 }
 0x144   : > { %v718_v48 = vpop.f32.mrf.mxu3  ;;  %v745_v49 = vmax.f32 %v695_v47, 0.0 }
 0x145   : > { %v719_v50 = vadd.f32 %v718_v48, %v615_v46  ;;  %v489_v51 = vpop.f32.mrf.mxu0 }
 0x146   : > { %v703_v53 = vpop.f32.mrf.mxu2  ;;  %775 = vst.msk [vmem:[%s1719_s12 + $0x90] sm:$0xff] %vm756_vm1, %v745_v49  ;;  %v490_v56 = vadd.f32 %v1705_v41, %v489_v51 }
 0x147   : > { %v753_v55 = vmax.f32 %v719_v50, 0.0  ;;  %v704_v45 = vadd.f32 %v703_v53, %v1783_v10  ;;  %v593_v58 = vpop.f32.mrf.mxu1 }
 0x148   : > { %v594_v60 = vadd.f32 %v593_v58, %v490_v56 }
 0x149   : > { %783 = vst.msk [vmem:[%s1719_s12 + $0xd0] sm:$0xff] %vm756_vm1, %v753_v55  ;;  %v748_v57 = vmax.f32 %v704_v45, 0.0 }
 0x14a   : > { %v698_v63 = vadd.f32 %v697_v28, %v594_v60 }
 0x14b   : > { %778 = vst.msk [vmem:[%s1719_s12 + $0xa8] sm:$0xff] %vm756_vm1, %v748_v57 }
 0x14c   : > { %v721_v1 = vpop.f32.mrf.mxu3  ;;  %v746_v2 = vmax.f32 %v698_v63, 0.0 }
 0x14d   : > { %v722_v4 = vadd.f32 %v721_v1, %v618_v61  ;;  %v492_v5 = vpop.f32.mrf.mxu0 }
 0x14e   : > { %v706_v6 = vpop.f32.mrf.mxu2  ;;  %776 = vst.msk [vmem:[%s1719_s12 + $0x98] sm:$0xff] %vm756_vm1, %v746_v2  ;;  %v493_v54 = vadd.f32 %v1705_v41, %v492_v5 }
 0x14f   : > { %v754_v10 = vmax.f32 %v722_v4, 0.0  ;;  %v707_v7 = vadd.f32 %v706_v6, %v1790_v20  ;;  %v596_v8 = vpop.f32.mrf.mxu1 }
 0x150   : > { %v597_v11 = vadd.f32 %v596_v8, %v493_v54 }
 0x151   : > { %784 = vst.msk [vmem:[%s1719_s12 + $0xd8] sm:$0xff] %vm756_vm1, %v754_v10  ;;  %v749_v9 = vmax.f32 %v707_v7, 0.0 }
 0x152   : > { %v701_v15 = vadd.f32 %v700_v40, %v597_v11 }
 0x153   : > { %779 = vst.msk [vmem:[%s1719_s12 + $0xb0] sm:$0xff] %vm756_vm1, %v749_v9 }
 0x154   : > { %v724_v16 = vpop.f32.mrf.mxu3  ;;  %v747_v17 = vmax.f32 %v701_v15, 0.0 }
 0x155   : > { %v725_v18 = vadd.f32 %v724_v16, %v621_v14 }
 0x156   : > { %v709_v19 = vpop.f32.mrf.mxu2  ;;  %777 = vst.msk [vmem:[%s1719_s12 + $0xa0] sm:$0xff] %vm756_vm1, %v747_v17 }
 0x157   : > { %v755_v20 = vmax.f32 %v725_v18, 0.0  ;;  %v710_v52 = vadd.f32 %v709_v19, %v1797_v30  ;;  %792 = sbr.rel (!%p1430_p4) target bundleno = 424 (0x1a8), region = 36 }
 0x159   : > { %785 = vst.msk [vmem:[%s1719_s12 + $0xe0] sm:$0xff] %vm756_vm1, %v755_v20  ;;  %v750_v41 = vmax.f32 %v710_v52, 0.0 }
 0x15b   : > { %780 = vst.msk [vmem:[%s1719_s12 + $0xb8] sm:$0xff] %vm756_vm1, %v750_v41 }
 0x15c   : > { %s2012_s7 = smov (!%p795_p8, %s794_s7), 29 }
 0x15d   : > { %s1150_s29 = sshll.u32 %s2012_s7, 3 }
 0x15e   : > { %p1153_p9 = scmp.eq.s32.totalorder %s1150_s29, 0 }
 0x15f   : > { %1291 = sdivrem.u32 (!%p1153_p9), %s2012_s7, 29 }
 0x160   : > { %803 = sbr.rel (%p1153_p9) target bundleno = 424 (0x1a8), region = 40 }
 0x168   : > { %s1876_s20 = spop.drf %1291 }
 0x169   : > { %s1293_s30 = spop.drf %1291  ;;  %p1154_p10 = scmp.le.s32.totalorder %s1876_s20, 0 }
 0x16a   : > { %s2003_s15 = smov (!%p1154_p10), %s1870_s28  ;;  %s2004_s27 = smov (!%p1154_p10), %s1719_s12 }
 0x16b   : > { %1072 = sbr.rel (%p1154_p10) target bundleno = 398 (0x18e), region = 116  ;;  %s1885_s4 = smov (!%p1154_p10), 0  }
 0x16c   : > { %s1887_s5 = smov (!%p1154_p10), 0  }
 0x170 LB: >> { %v924_v62 = vld [vmem:[%s1359_s27] sm:$0xff]  ;;  %v926_v30 = vld [vmem:[%s1359_s27 + $0x8] sm:$0xff]  ;;  %v928_v13 = vld [vmem:[%s1359_s27 + $0x10] sm:$0xff]  ;;  %s982_s6 = sadd.s32 1, %s1363_s4  ;;  %s918_s5 = sadd.s32 1, %s1367_s5   ;;  %s1367_s5 = sphi %s1887_s5, %s918_s5   ;;  %s1363_s4 = sphi %s1885_s4, %s2007_s4   ;;  %s1359_s27 = sphi %s2004_s27, %s2006_s27   ;;  %s1355_s15 = sphi %s2003_s15, %s2005_s15  }
 0x171   : >> { %925 = vst [vmem:[%s1355_s15] sm:$0xff] %v924_v62  ;;  %v930_v21 = vld [vmem:[%s1359_s27 + $0x18] sm:$0xff]  ;;  %p983_p11 = scmp.ge.s32.totalorder %s982_s6, %s1876_s20  ;;  %v932_v22 = vld [vmem:[%s1359_s27 + $0x20] sm:$0xff]  ;;  %v934_v23 = vld [vmem:[%s1359_s27 + $0x28] sm:$0xff]  ;;  %p917_p12 = scmp.ge.s32.totalorder %s918_s5, %s1876_s20 }
 0x172   : >> { %927 = vst [vmem:[%s1355_s15 + $0x8] sm:$0xff] %v926_v30  ;;  %v936_v25 = vld [vmem:[%s1359_s27 + $0x30] sm:$0xff]  ;;  %v938_v26 = vld [vmem:[%s1359_s27 + $0x38] sm:$0xff]  ;;  %v940_v27 = vld [vmem:[%s1359_s27 + $0x40] sm:$0xff] }
 0x173   : >> { %929 = vst [vmem:[%s1355_s15 + $0x10] sm:$0xff] %v928_v13  ;;  %s2014_s6 = smov (%p983_p11, %s982_s6), 0  ;;  %v942_v28 = vld [vmem:[%s1359_s27 + $0x48] sm:$0xff]  ;;  %v944_v0 = vld [vmem:[%s1359_s27 + $0x50] sm:$0xff]  ;;  %v946_v29 = vld [vmem:[%s1359_s27 + $0x58] sm:$0xff] }
 0x174   : >> { %931 = vst [vmem:[%s1355_s15 + $0x18] sm:$0xff] %v930_v21  ;;  %s985_s8 = smul.u32 232, %s2014_s6  ;;  %v948_v31 = vld [vmem:[%s1359_s27 + $0x60] sm:$0xff]  ;;  %v950_v32 = vld [vmem:[%s1359_s27 + $0x68] sm:$0xff]  ;;  %v952_v24 = vld [vmem:[%s1359_s27 + $0x70] sm:$0xff]  ;;  %s2007_s4 = smov %s2014_s6 }
 0x175   : >> { %933 = vst [vmem:[%s1355_s15 + $0x20] sm:$0xff] %v932_v22  ;;  %v954_v33 = vld [vmem:[%s1359_s27 + $0x78] sm:$0xff]  ;;  %v956_v34 = vld [vmem:[%s1359_s27 + $0x80] sm:$0xff]  ;;  %v958_v35 = vld [vmem:[%s1359_s27 + $0x88] sm:$0xff] }
 0x176   : >> { %935 = vst [vmem:[%s1355_s15 + $0x28] sm:$0xff] %v934_v23  ;;  %s1921_s9 = scalar_lea.vmem %s1719_s12, %s985_s8 [#allocation2]   ;;  %s1924_s10 = scalar_lea.vmem %s1870_s28, %s985_s8   ;;  %v960_v37 = vld [vmem:[%s1359_s27 + $0x90] sm:$0xff]  ;;  %v962_v38 = vld [vmem:[%s1359_s27 + $0x98] sm:$0xff]  ;;  %v964_v39 = vld [vmem:[%s1359_s27 + $0xa0] sm:$0xff] }
 0x177   : >> { %937 = vst [vmem:[%s1355_s15 + $0x30] sm:$0xff] %v936_v25  ;;  %v966_v40 = vld [vmem:[%s1359_s27 + $0xa8] sm:$0xff]  ;;  %v968_v12 = vld [vmem:[%s1359_s27 + $0xb0] sm:$0xff]  ;;  %v970_v42 = vld [vmem:[%s1359_s27 + $0xb8] sm:$0xff] }
 0x178   : >> { %939 = vst [vmem:[%s1355_s15 + $0x38] sm:$0xff] %v938_v26  ;;  %v972_v43 = vld [vmem:[%s1359_s27 + $0xc0] sm:$0xff]  ;;  %v974_v36 = vld [vmem:[%s1359_s27 + $0xc8] sm:$0xff]  ;;  %v976_v44 = vld [vmem:[%s1359_s27 + $0xd0] sm:$0xff] }
 0x179   : >> { %941 = vst [vmem:[%s1355_s15 + $0x40] sm:$0xff] %v940_v27  ;;  %v978_v46 = vld [vmem:[%s1359_s27 + $0xd8] sm:$0xff]  ;;  %v980_v47 = vld [vmem:[%s1359_s27 + $0xe0] sm:$0xff]  ;;  %s2006_s27 = smov %s1921_s9 }
 0x17a   : >> { %943 = vst [vmem:[%s1355_s15 + $0x48] sm:$0xff] %v942_v28 }
 0x17b   : >> { %945 = vst [vmem:[%s1355_s15 + $0x50] sm:$0xff] %v944_v0 }
 0x17c   : >> { %947 = vst [vmem:[%s1355_s15 + $0x58] sm:$0xff] %v946_v29 }
 0x17d   : >> { %949 = vst [vmem:[%s1355_s15 + $0x60] sm:$0xff] %v948_v31 }
 0x17e   : >> { %951 = vst [vmem:[%s1355_s15 + $0x68] sm:$0xff] %v950_v32 }
 0x17f   : >> { %953 = vst [vmem:[%s1355_s15 + $0x70] sm:$0xff] %v952_v24 }
 0x180   : >> { %955 = vst [vmem:[%s1355_s15 + $0x78] sm:$0xff] %v954_v33 }
 0x181   : >> { %957 = vst [vmem:[%s1355_s15 + $0x80] sm:$0xff] %v956_v34 }
 0x182   : >> { %959 = vst [vmem:[%s1355_s15 + $0x88] sm:$0xff] %v958_v35 }
 0x183   : >> { %961 = vst [vmem:[%s1355_s15 + $0x90] sm:$0xff] %v960_v37 }
 0x184   : >> { %963 = vst [vmem:[%s1355_s15 + $0x98] sm:$0xff] %v962_v38 }
 0x185   : >> { %965 = vst [vmem:[%s1355_s15 + $0xa0] sm:$0xff] %v964_v39 }
 0x186   : >> { %967 = vst [vmem:[%s1355_s15 + $0xa8] sm:$0xff] %v966_v40 }
 0x187   : >> { %969 = vst [vmem:[%s1355_s15 + $0xb0] sm:$0xff] %v968_v12 }
 0x188   : >> { %971 = vst [vmem:[%s1355_s15 + $0xb8] sm:$0xff] %v970_v42 }
 0x189   : >> { %973 = vst [vmem:[%s1355_s15 + $0xc0] sm:$0xff] %v972_v43  ;;  %920 = sbr.rel (!%p917_p12) target bundleno = 368 (0x170), region = 122 }
 0x18a   : >> { %975 = vst [vmem:[%s1355_s15 + $0xc8] sm:$0xff] %v974_v36 }
 0x18b   : >> { %977 = vst [vmem:[%s1355_s15 + $0xd0] sm:$0xff] %v976_v44 }
 0x18c   : >> { %979 = vst [vmem:[%s1355_s15 + $0xd8] sm:$0xff] %v978_v46 }
 0x18d   : >> { %981 = vst [vmem:[%s1355_s15 + $0xe0] sm:$0xff] %v980_v47  ;;  %s2005_s15 = smov %s1924_s10 }
 0x18e PF: > { %1294 = sdivrem.u32 %s2012_s7, 29 }
 0x18f   : > { %s1155_s11 = smul.u32 232, %s1876_s20 }
 0x191   : > { %s1983_s14 = scalar_lea.vmem %s1719_s12, %s1155_s11 [#allocation2]   ;;  %s995_s17 = scalar_lea.vmem %s1870_s28, %s1155_s11  }
 0x197   : > { %s1295_s18 = spop.drf %1294 }
 0x198   : > { %s1296_s21 = spop.drf %1294 }
 0x199   : > { %p1157_p13 = scmp.le.s32.totalorder %s1296_s21, 0 }
 0x19a   : > { %s1369_s22 = smov (!%p1157_p13), %s995_s17   ;;  %s1373_s23 = smov (!%p1157_p13), %s1983_s14  }
 0x19b   : > { %1086 = sbr.rel (%p1157_p13) target bundleno = 424 (0x1a8), region = 127  ;;  %s1377_s24 = smov (!%p1157_p13), 0  }
 0x19c   : > { %s1381_s25 = smov (!%p1157_p13), 0  }
 0x1a0 LB: >> { %v1005_v48 = vld [vmem:[%s1375_s23] sm:$0xff]  ;;  %s1007_s12 = sadd.s32 1, %s1379_s24  ;;  %s999_s25 = sadd.s32 1, %s1383_s25   ;;  %s1383_s25 = sphi %s1381_s25, %s999_s25   ;;  %s1379_s24 = sphi %s1377_s24, %s1378_s24   ;;  %s1375_s23 = sphi %s1373_s23, %s1012_s23   ;;  %s1371_s22 = sphi %s1369_s22, %s1013_s22  }
 0x1a1   : >> { %1006 = vst [vmem:[%s1371_s22] sm:$0xff] %v1005_v48  ;;  %p1008_p0 = scmp.ge.s32.totalorder %s1007_s12, %s1296_s21  ;;  %p998_p1 = scmp.ge.s32.totalorder %s999_s25, %s1296_s21 }
 0x1a3   : >> { %s2016_s12 = smov (%p1008_p0, %s1007_s12), 0  ;;  %1001 = sbr.rel (!%p998_p1) target bundleno = 416 (0x1a0), region = 133 }
 0x1a4   : >> { %s1158_s7 = sshll.u32 %s2016_s12, 3  ;;  %s1378_s24 = smov %s2016_s12  }
 0x1a5   : >> { %s1012_s23 = scalar_lea.vmem %s1983_s14, %s1158_s7 [#allocation2]   ;;  %s1013_s22 = scalar_lea.vmem %s995_s17, %s1158_s7  }
 0x1a8 PF: > { %p10_p2 = scmp.ge.s32.totalorder %s1420_s16, 4   ;;  %s2008_s12 = smov %s1347_s13 }
 0x1a9   : > { %s2009_s13 = smov %s1428_s19  ;;  %s2010_s14 = smov %s1420_s16 }
 0x1aa   :  { %12 = sbr.rel (!%p10_p2) target bundleno = 2 (0x2), region = 144 }

// kernel: coinrun_actor_forward.5
= control target key start
LH: loop header
LB: loop body
LE: loop exit
PB: predicated region body
PF: predicated region fallthrough
CT: control target
= control target key end

     0   :  { %s2692_s0 = inlined_call_operand.vmem [shape: f32[50,576], index: 0, kind: input, shape index: {}]   ;;  %s2693_s1 = inlined_call_operand.vmem [shape: f32[576,64], index: 1, kind: input, shape index: {}]   ;;  %s2694_s2 = inlined_call_operand.vmem [shape: f32[1,64], index: 2, kind: input, shape index: {}]   ;;  %s2695_s3 = inlined_call_operand.vmem [shape: f32[25,64,128], index: 3, kind: input, shape index: {}]   ;;  %s2696_s4 = inlined_call_operand.vmem [shape: f32[1,128], index: 4, kind: input, shape index: {}]   ;;  %s2697_s5 = inlined_call_operand.vmem [shape: f32[1,128], index: 5, kind: input, shape index: {}]   ;;  %s2698_s6 = inlined_call_operand.vmem [shape: f32[1,128], index: 6, kind: input, shape index: {}]   ;;  %s2699_s7 = inlined_call_operand.vmem [shape: f32[128,15], index: 7, kind: input, shape index: {}]   ;;  %s2700_s8 = inlined_call_operand.vmem [shape: f32[1,15], index: 8, kind: input, shape index: {}]   ;;  %s2701_s9 = inlined_call_operand.hbm [shape: f32[2,15], index: 9, kind: output, shape index: {}]  }
   0x1   :  { %v83_v0 = vld [vmem:[%s2693_s1 + $0x78] sm:$0xff]  ;;  %v82_v2 = vld [vmem:[%s2693_s1 + $0x70] sm:$0xff]  ;;  %v81_v6 = vld [vmem:[%s2693_s1 + $0x68] sm:$0xff] }
   0x2   :  { %v115_v1 = vld [vmem:[%s2693_s1 + $0x178] sm:$0xff]  ;;  %166 = vmatpush.msra.mxu0 %v83_v0  ;;  %v114_v4 = vld [vmem:[%s2693_s1 + $0x170] sm:$0xff]  ;;  %v113_v8 = vld [vmem:[%s2693_s1 + $0x168] sm:$0xff] }
   0x3   :  { %242 = vmatpush.msra.mxu2 %v115_v1  ;;  %v99_v3 = vld [vmem:[%s2693_s1 + $0xf8] sm:$0xff]  ;;  %v98_v7 = vld [vmem:[%s2693_s1 + $0xf0] sm:$0xff]  ;;  %v97_v10 = vld [vmem:[%s2693_s1 + $0xe8] sm:$0xff] }
   0x4   :  { %v131_v5 = vld [vmem:[%s2693_s1 + $0x1f8] sm:$0xff]  ;;  %204 = vmatpush.msra.mxu1 %v99_v3  ;;  %167 = vmatpush.msra.mxu0 %v82_v2  ;;  %v130_v9 = vld [vmem:[%s2693_s1 + $0x1f0] sm:$0xff]  ;;  %v80_v11 = vld [vmem:[%s2693_s1 + $0x60] sm:$0xff] }
   0x5   :  { %280 = vmatpush.msra.mxu3 %v131_v5  ;;  %243 = vmatpush.msra.mxu2 %v114_v4  ;;  %v112_v12 = vld [vmem:[%s2693_s1 + $0x160] sm:$0xff]  ;;  %v129_v13 = vld [vmem:[%s2693_s1 + $0x1e8] sm:$0xff]  ;;  %v79_v16 = vld [vmem:[%s2693_s1 + $0x58] sm:$0xff] }
   0x6   :  { %205 = vmatpush.msra.mxu1 %v98_v7  ;;  %168 = vmatpush.msra.mxu0 %v81_v6  ;;  %v96_v14 = vld [vmem:[%s2693_s1 + $0xe0] sm:$0xff]  ;;  %v111_v17 = vld [vmem:[%s2693_s1 + $0x158] sm:$0xff]  ;;  %v78_v20 = vld [vmem:[%s2693_s1 + $0x50] sm:$0xff] }
   0x7   :  { %281 = vmatpush.msra.mxu3 %v130_v9  ;;  %244 = vmatpush.msra.mxu2 %v113_v8  ;;  %v128_v15 = vld [vmem:[%s2693_s1 + $0x1e0] sm:$0xff]  ;;  %v95_v18 = vld [vmem:[%s2693_s1 + $0xd8] sm:$0xff]  ;;  %v110_v21 = vld [vmem:[%s2693_s1 + $0x150] sm:$0xff] }
   0x8   :  { %206 = vmatpush.msra.mxu1 %v97_v10  ;;  %169 = vmatpush.msra.mxu0 %v80_v11  ;;  %v127_v19 = vld [vmem:[%s2693_s1 + $0x1d8] sm:$0xff]  ;;  %v94_v22 = vld [vmem:[%s2693_s1 + $0xd0] sm:$0xff]  ;;  %v77_v24 = vld [vmem:[%s2693_s1 + $0x48] sm:$0xff] }
   0x9   :  { %282 = vmatpush.msra.mxu3 %v129_v13  ;;  %245 = vmatpush.msra.mxu2 %v112_v12  ;;  %v126_v23 = vld [vmem:[%s2693_s1 + $0x1d0] sm:$0xff]  ;;  %v109_v25 = vld [vmem:[%s2693_s1 + $0x148] sm:$0xff]  ;;  %v76_v28 = vld [vmem:[%s2693_s1 + $0x40] sm:$0xff] }
   0xa   :  { %207 = vmatpush.msra.mxu1 %v96_v14  ;;  %170 = vmatpush.msra.mxu0 %v79_v16  ;;  %v93_v26 = vld [vmem:[%s2693_s1 + $0xc8] sm:$0xff]  ;;  %v108_v29 = vld [vmem:[%s2693_s1 + $0x140] sm:$0xff]  ;;  %v75_v32 = vld [vmem:[%s2693_s1 + $0x38] sm:$0xff] }
   0xb   :  { %283 = vmatpush.msra.mxu3 %v128_v15  ;;  %246 = vmatpush.msra.mxu2 %v111_v17  ;;  %v125_v27 = vld [vmem:[%s2693_s1 + $0x1c8] sm:$0xff]  ;;  %v92_v30 = vld [vmem:[%s2693_s1 + $0xc0] sm:$0xff]  ;;  %v107_v33 = vld [vmem:[%s2693_s1 + $0x138] sm:$0xff] }
   0xc   :  { %208 = vmatpush.msra.mxu1 %v95_v18  ;;  %171 = vmatpush.msra.mxu0 %v78_v20  ;;  %v124_v31 = vld [vmem:[%s2693_s1 + $0x1c0] sm:$0xff]  ;;  %v91_v34 = vld [vmem:[%s2693_s1 + $0xb8] sm:$0xff]  ;;  %v74_v36 = vld [vmem:[%s2693_s1 + $0x30] sm:$0xff] }
   0xd   :  { %284 = vmatpush.msra.mxu3 %v127_v19  ;;  %247 = vmatpush.msra.mxu2 %v110_v21  ;;  %v123_v35 = vld [vmem:[%s2693_s1 + $0x1b8] sm:$0xff]  ;;  %v106_v37 = vld [vmem:[%s2693_s1 + $0x130] sm:$0xff]  ;;  %v73_v40 = vld [vmem:[%s2693_s1 + $0x28] sm:$0xff] }
   0xe   :  { %209 = vmatpush.msra.mxu1 %v94_v22  ;;  %172 = vmatpush.msra.mxu0 %v77_v24  ;;  %v90_v38 = vld [vmem:[%s2693_s1 + $0xb0] sm:$0xff]  ;;  %v105_v41 = vld [vmem:[%s2693_s1 + $0x128] sm:$0xff]  ;;  %v72_v44 = vld [vmem:[%s2693_s1 + $0x20] sm:$0xff] }
   0xf   :  { %285 = vmatpush.msra.mxu3 %v126_v23  ;;  %248 = vmatpush.msra.mxu2 %v109_v25  ;;  %v122_v39 = vld [vmem:[%s2693_s1 + $0x1b0] sm:$0xff]  ;;  %v89_v42 = vld [vmem:[%s2693_s1 + $0xa8] sm:$0xff]  ;;  %v104_v45 = vld [vmem:[%s2693_s1 + $0x120] sm:$0xff] }
  0x10   :  { %210 = vmatpush.msra.mxu1 %v93_v26  ;;  %173 = vmatpush.msra.mxu0 %v76_v28  ;;  %v121_v43 = vld [vmem:[%s2693_s1 + $0x1a8] sm:$0xff]  ;;  %v88_v46 = vld [vmem:[%s2693_s1 + $0xa0] sm:$0xff]  ;;  %v71_v48 = vld [vmem:[%s2693_s1 + $0x18] sm:$0xff] }
  0x11   :  { %286 = vmatpush.msra.mxu3 %v125_v27  ;;  %249 = vmatpush.msra.mxu2 %v108_v29  ;;  %v120_v47 = vld [vmem:[%s2693_s1 + $0x1a0] sm:$0xff]  ;;  %v103_v49 = vld [vmem:[%s2693_s1 + $0x118] sm:$0xff]  ;;  %v70_v52 = vld [vmem:[%s2693_s1 + $0x10] sm:$0xff] }
  0x12   :  { %211 = vmatpush.msra.mxu1 %v92_v30  ;;  %174 = vmatpush.msra.mxu0 %v75_v32  ;;  %v87_v50 = vld [vmem:[%s2693_s1 + $0x98] sm:$0xff]  ;;  %v102_v53 = vld [vmem:[%s2693_s1 + $0x110] sm:$0xff]  ;;  %v69_v54 = vld [vmem:[%s2693_s1 + $0x8] sm:$0xff] }
  0x13   :  { %287 = vmatpush.msra.mxu3 %v124_v31  ;;  %250 = vmatpush.msra.mxu2 %v107_v33  ;;  %v119_v51 = vld [vmem:[%s2693_s1 + $0x198] sm:$0xff]  ;;  %v86_v55 = vld [vmem:[%s2693_s1 + $0x90] sm:$0xff]  ;;  %v101_v56 = vld [vmem:[%s2693_s1 + $0x108] sm:$0xff] }
  0x14   :  { %212 = vmatpush.msra.mxu1 %v91_v34  ;;  %175 = vmatpush.msra.mxu0 %v74_v36  ;;  %v118_v57 = vld [vmem:[%s2693_s1 + $0x190] sm:$0xff]  ;;  %v68_v58 = vld [vmem:[%s2693_s1] sm:$0xff]  ;;  %v85_v59 = vld [vmem:[%s2693_s1 + $0x88] sm:$0xff] }
  0x15   :  { %288 = vmatpush.msra.mxu3 %v123_v35  ;;  %251 = vmatpush.msra.mxu2 %v106_v37  ;;  %v100_v60 = vld [vmem:[%s2693_s1 + $0x100] sm:$0xff]  ;;  %v117_v61 = vld [vmem:[%s2693_s1 + $0x188] sm:$0xff] }
  0x16   :  { %213 = vmatpush.msra.mxu1 %v90_v38  ;;  %176 = vmatpush.msra.mxu0 %v73_v40 }
  0x17   :  { %289 = vmatpush.msra.mxu3 %v122_v39  ;;  %252 = vmatpush.msra.mxu2 %v105_v41 }
  0x18   :  { %214 = vmatpush.msra.mxu1 %v89_v42  ;;  %177 = vmatpush.msra.mxu0 %v72_v44 }
  0x19   :  { %290 = vmatpush.msra.mxu3 %v121_v43  ;;  %253 = vmatpush.msra.mxu2 %v104_v45 }
  0x1a   :  { %215 = vmatpush.msra.mxu1 %v88_v46  ;;  %178 = vmatpush.msra.mxu0 %v71_v48 }
  0x1b   :  { %291 = vmatpush.msra.mxu3 %v120_v47  ;;  %254 = vmatpush.msra.mxu2 %v103_v49 }
  0x1c   :  { %216 = vmatpush.msra.mxu1 %v87_v50  ;;  %179 = vmatpush.msra.mxu0 %v70_v52 }
  0x1d   :  { %292 = vmatpush.msra.mxu3 %v119_v51  ;;  %255 = vmatpush.msra.mxu2 %v102_v53 }
  0x1e   :  { %217 = vmatpush.msra.mxu1 %v86_v55 }
  0x1f   :  { %293 = vmatpush.msra.mxu3 %v118_v57 }
  0x20   :  { %14 = vsyncpa [#allocation4], 0  ;;  %180 = vmatpush.msra.mxu0 %v69_v54  ;;  %256 = vmatpush.msra.mxu2 %v101_v56  ;;  %v33_v62 = vld [vmem:[%s2692_s0] sm:$0xff]  ;;  %v35_v63 = vld [vmem:[%s2692_s0 + $0x10] sm:$0xff]  ;;  %vm144_vm0 = vcmask 523264   ;;  %vm369_vm1 = vcmask 517120  }
  0x21   :  { %218 = vmatpush.msra.mxu1 %v85_v59  ;;  %294 = vmatpush.msra.mxu3 %v117_v61  ;;  %v84_v0 = vld [vmem:[%s2693_s1 + $0x80] sm:$0xff]  ;;  %v34_v2 = vld [vmem:[%s2692_s0 + $0x8] sm:$0xff]  ;;  %v36_v3 = vld [vmem:[%s2692_s0 + $0x18] sm:$0xff]  ;;  %vm1224_vm2 = vcmask 1041408   ;;  %s1584_s18 = smov [#allocation3]   ;;  %s1313_s22 = sshll.u32 %s2701_s9, 4  ;;  %s1314_s22 = int_to_ptr.hbm [resolvable:$true] %s1313_s22 }
  0x22   :  { %v116_v1 = vld [vmem:[%s2693_s1 + $0x180] sm:$0xff]  ;;  %181 = vmatpush.msra.mxu0 %v68_v58  ;;  %257 = vmatpush.msra.mxu2 %v100_v60  ;;  %v139_v4 = vld [vmem:[%s2693_s1 + $0x238] sm:$0xff]  ;;  %v38_v5 = vld [vmem:[%s2692_s0 + $0x28] sm:$0xff]  ;;  %s1311_s19 = sshll.u32 %s1584_s18, 4  ;;  %vm1304_vm7 = vcmask 115712   ;;  %s1312_s19 = int_to_ptr.vmem [resolvable:$true] %s1311_s19 }
  0x23   :  { %182 = vmatmul.f32.vlgmr.msra.gmra.mxu0 %v33_v62  ;;  %258 = vmatmul.f32.vlgmr.msra.gmra.mxu2 %v35_v63  ;;  %v40_v6 = vld [vmem:[%s2692_s0 + $0x38] sm:$0xff]  ;;  %v39_v7 = vld [vmem:[%s2692_s0 + $0x30] sm:$0xff]  ;;  %v41_v8 = vld [vmem:[%s2692_s0 + $0x40] sm:$0xff] }
  0x24   :  { %219 = vmatpush.msra.mxu1 %v84_v0  ;;  %295 = vmatpush.msra.mxu3 %v116_v1  ;;  %v138_v9 = vld [vmem:[%s2693_s1 + $0x230] sm:$0xff]  ;;  %v137_v10 = vld [vmem:[%s2693_s1 + $0x228] sm:$0xff]  ;;  %v136_v11 = vld [vmem:[%s2693_s1 + $0x220] sm:$0xff] }
  0x25   :  { %220 = vmatmul.f32.vlgmr.msra.gmra.mxu1 %v34_v2  ;;  %296 = vmatmul.f32.vlgmr.msra.gmra.mxu3 %v36_v3  ;;  %v43_v12 = vld [vmem:[%s2692_s0 + $0x50] sm:$0xff]  ;;  %v45_v13 = vld [vmem:[%s2692_s0 + $0x60] sm:$0xff]  ;;  %v44_v14 = vld [vmem:[%s2692_s0 + $0x58] sm:$0xff] }
  0x26   :  { %326 = vmatpush.msrb.mxu0 %v139_v4  ;;  %v46_v15 = vld [vmem:[%s2692_s0 + $0x68] sm:$0xff]  ;;  %v135_v16 = vld [vmem:[%s2693_s1 + $0x218] sm:$0xff]  ;;  %v134_v17 = vld [vmem:[%s2693_s1 + $0x210] sm:$0xff] }
  0x27   :  { %v133_v18 = vld [vmem:[%s2693_s1 + $0x208] sm:$0xff]  ;;  %v132_v19 = vld [vmem:[%s2693_s1 + $0x200] sm:$0xff]  ;;  %v48_v20 = vld [vmem:[%s2692_s0 + $0x78] sm:$0xff] }
  0x28   :  { %327 = vmatpush.msrb.mxu0 %v138_v9  ;;  %v50_v21 = vld [vmem:[%s2692_s0 + $0x88] sm:$0xff]  ;;  %v49_v22 = vld [vmem:[%s2692_s0 + $0x80] sm:$0xff]  ;;  %v51_v23 = vld [vmem:[%s2692_s0 + $0x90] sm:$0xff] }
  0x29   :  { %v53_v24 = vld [vmem:[%s2692_s0 + $0xa0] sm:$0xff]  ;;  %v55_v25 = vld [vmem:[%s2692_s0 + $0xb0] sm:$0xff]  ;;  %v54_v26 = vld [vmem:[%s2692_s0 + $0xa8] sm:$0xff] }
  0x2a   :  { %328 = vmatpush.msrb.mxu0 %v137_v10  ;;  %v56_v27 = vld [vmem:[%s2692_s0 + $0xb8] sm:$0xff]  ;;  %v58_v28 = vld [vmem:[%s2692_s0 + $0xc8] sm:$0xff]  ;;  %v59_v30 = vld [vmem:[%s2692_s0 + $0xd0] sm:$0xff] }
  0x2b   :  { %185 = vmatmul.f32.gmra.mxu0 %v38_v5  ;;  %261 = vmatmul.f32.gmra.mxu2 %v40_v6  ;;  %v60_v29 = vld [vmem:[%s2692_s0 + $0xd8] sm:$0xff]  ;;  %v61_v31 = vld [vmem:[%s2692_s0 + $0xe0] sm:$0xff]  ;;  %v63_v32 = vld [vmem:[%s2692_s0 + $0xf0] sm:$0x3] }
  0x2c   :  { %329 = vmatpush.msrb.mxu0 %v136_v11  ;;  %v65_v33 = vld [vmem:[%s2692_s0 + $0x100] sm:$0x3]  ;;  %v64_v34 = vld [vmem:[%s2692_s0 + $0xf8] sm:$0x3]  ;;  %v66_v35 = vld [vmem:[%s2692_s0 + $0x108] sm:$0x3] }
  0x2d   :  { %223 = vmatmul.f32.gmra.mxu1 %v39_v7  ;;  %299 = vmatmul.f32.gmra.mxu3 %v41_v8  ;;  %v37_v36 = vld [vmem:[%s2692_s0 + $0x20] sm:$0xff]  ;;  %v42_v37 = vld [vmem:[%s2692_s0 + $0x48] sm:$0xff]  ;;  %v47_v38 = vld [vmem:[%s2692_s0 + $0x70] sm:$0xff] }
  0x2e   :  { %330 = vmatpush.msrb.mxu0 %v135_v16  ;;  %v52_v39 = vld [vmem:[%s2692_s0 + $0x98] sm:$0xff]  ;;  %v57_v40 = vld [vmem:[%s2692_s0 + $0xc0] sm:$0xff]  ;;  %v62_v41 = vld [vmem:[%s2692_s0 + $0xe8] sm:$0xff] }
  0x2f   :  { %v67_v42 = vld [vmem:[%s2692_s0 + $0x110] sm:$0x3]  ;;  %v1336_v44 = vld [vmem:[%s2695_s3 + $0x78] sm:$0xff]  ;;  %v1334_v51 = vld [vmem:[%s2695_s3 + $0x68] sm:$0xff] }
  0x30   :  { %331 = vmatpush.msrb.mxu0 %v134_v17  ;;  %v1346_v45 = vld [vmem:[%s2695_s3 + $0xb8] sm:$0xff]  ;;  %401 = vmatpush.msrb.mxu2 %v1336_v44  ;;  %v1335_v48 = vld [vmem:[%s2695_s3 + $0x70] sm:$0xff]  ;;  %v1344_v52 = vld [vmem:[%s2695_s3 + $0xa8] sm:$0xff] }
  0x31   :  { %v1355_v46 = vld [vmem:[%s2695_s3 + $0xf8] sm:$0xff]  ;;  %457 = vmatpush.msrb.mxu3 %v1346_v45  ;;  %v1345_v49 = vld [vmem:[%s2695_s3 + $0xb0] sm:$0xff]  ;;  %v1353_v53 = vld [vmem:[%s2695_s3 + $0xe8] sm:$0xff] }
  0x32   :  { %332 = vmatpush.msrb.mxu0 %v133_v18  ;;  %491 = vmatpush.msrb.mxu1 %v1355_v46  ;;  %v1354_v50 = vld [vmem:[%s2695_s3 + $0xf0] sm:$0xff]  ;;  %v1333_v54 = vld [vmem:[%s2695_s3 + $0x60] sm:$0xff]  ;;  %v1332_v57 = vld [vmem:[%s2695_s3 + $0x58] sm:$0xff] }
  0x33   :  { %188 = vmatmul.f32.gmra.mxu0 %v43_v12  ;;  %264 = vmatmul.f32.gmra.mxu2 %v45_v13  ;;  %v1343_v55 = vld [vmem:[%s2695_s3 + $0xa0] sm:$0xff]  ;;  %v1342_v58 = vld [vmem:[%s2695_s3 + $0x98] sm:$0xff]  ;;  %v1331_v61 = vld [vmem:[%s2695_s3 + $0x50] sm:$0xff] }
  0x34   :  { %333 = vmatpush.msrb.mxu0 %v132_v19  ;;  %402 = vmatpush.msrb.mxu2 %v1335_v48  ;;  %v1352_v56 = vld [vmem:[%s2695_s3 + $0xe0] sm:$0xff]  ;;  %v1351_v59 = vld [vmem:[%s2695_s3 + $0xd8] sm:$0xff]  ;;  %v1341_v62 = vld [vmem:[%s2695_s3 + $0x90] sm:$0xff] }
  0x35   :  { %226 = vmatmul.f32.gmra.mxu1 %v44_v14  ;;  %302 = vmatmul.f32.gmra.mxu3 %v46_v15  ;;  %v1350_v63 = vld [vmem:[%s2695_s3 + $0xd0] sm:$0xff]  ;;  %v1330_v0 = vld [vmem:[%s2695_s3 + $0x48] sm:$0xff]  ;;  %v1329_v3 = vld [vmem:[%s2695_s3 + $0x40] sm:$0xff] }
  0x36   :  { %458 = vmatpush.msrb.mxu3 %v1345_v49  ;;  %492 = vmatpush.msrb.mxu1 %v1354_v50  ;;  %v1340_v1 = vld [vmem:[%s2695_s3 + $0x88] sm:$0xff]  ;;  %v1339_v4 = vld [vmem:[%s2695_s3 + $0x80] sm:$0xff]  ;;  %v379_v6 = vld [vmem:[%s2695_s3 + $0x38] sm:$0xff] }
  0x37   :  { %403 = vmatpush.msrb.mxu2 %v1334_v51  ;;  %v1349_v2 = vld [vmem:[%s2695_s3 + $0xc8] sm:$0xff]  ;;  %v1348_v5 = vld [vmem:[%s2695_s3 + $0xc0] sm:$0xff]  ;;  %v1373_v7 = vld [vmem:[%s2695_s3 + $0x178] sm:$0xff] }
  0x38   :  { %459 = vmatpush.msrb.mxu3 %v1344_v52  ;;  %493 = vmatpush.msrb.mxu1 %v1353_v53  ;;  %v1382_v8 = vld [vmem:[%s2695_s3 + $0x1b8] sm:$0xff]  ;;  %v378_v9 = vld [vmem:[%s2695_s3 + $0x30] sm:$0xff]  ;;  %v377_v13 = vld [vmem:[%s2695_s3 + $0x28] sm:$0xff] }
  0x39   :  { %404 = vmatpush.msrb.mxu2 %v1333_v54  ;;  %v1372_v10 = vld [vmem:[%s2695_s3 + $0x170] sm:$0xff]  ;;  %v1371_v14 = vld [vmem:[%s2695_s3 + $0x168] sm:$0xff]  ;;  %v376_v16 = vld [vmem:[%s2695_s3 + $0x20] sm:$0xff] }
  0x3a   :  { %460 = vmatpush.msrb.mxu3 %v1343_v55  ;;  %494 = vmatpush.msrb.mxu1 %v1352_v56  ;;  %v1381_v11 = vld [vmem:[%s2695_s3 + $0x1b0] sm:$0xff]  ;;  %v1380_v15 = vld [vmem:[%s2695_s3 + $0x1a8] sm:$0xff]  ;;  %v1370_v17 = vld [vmem:[%s2695_s3 + $0x160] sm:$0xff] }
  0x3b   :  { %191 = vmatmul.f32.gmra.mxu0 %v48_v20  ;;  %267 = vmatmul.f32.gmra.mxu2 %v50_v21  ;;  %v1379_v18 = vld [vmem:[%s2695_s3 + $0x1a0] sm:$0xff]  ;;  %v375_v19 = vld [vmem:[%s2695_s3 + $0x18] sm:$0xff]  ;;  %v1430_v46 = vld [vmem:[%s2695_s3 + $0x308] sm:$0xff] }
  0x3c   :  { %405 = vmatpush.msrb.mxu2 %v1332_v57  ;;  %461 = vmatpush.msrb.mxu3 %v1342_v58  ;;  %v1369_v20 = vld [vmem:[%s2695_s3 + $0x158] sm:$0xff]  ;;  %v1429_v49 = vld [vmem:[%s2695_s3 + $0x300] sm:$0xff]  ;;  %v1471_v53 = vld [vmem:[%s2695_s3 + $0x430] sm:$0xff] }
  0x3d   :  { %229 = vmatmul.f32.gmra.mxu1 %v49_v22  ;;  %305 = vmatmul.f32.gmra.mxu3 %v51_v23  ;;  %v1378_v21 = vld [vmem:[%s2695_s3 + $0x198] sm:$0xff]  ;;  %v374_v23 = vld [vmem:[%s2695_s3 + $0x10] sm:$0xff]  ;;  %v1470_v55 = vld [vmem:[%s2695_s3 + $0x428] sm:$0xff] }
  0x3e   :  { %495 = vmatpush.msrb.mxu1 %v1351_v59  ;;  %406 = vmatpush.msrb.mxu2 %v1331_v61  ;;  %v1436_v22 = vld [vmem:[%s2695_s3 + $0x338] sm:$0xff]  ;;  %v1469_v59 = vld [vmem:[%s2695_s3 + $0x420] sm:$0xff] }
  0x3f   :  { %462 = vmatpush.msrb.mxu3 %v1341_v62  ;;  %797 = vmatpush.msra.mxu0 %v1436_v22  ;;  %v1472_v51 = vld [vmem:[%s2695_s3 + $0x438] sm:$0xff] }
  0x40   :  { %496 = vmatpush.msrb.mxu1 %v1350_v63  ;;  %407 = vmatpush.msrb.mxu2 %v1330_v0 }
  0x41   :  { %463 = vmatpush.msrb.mxu3 %v1340_v1  ;;  %v1468_v1 = vld [vmem:[%s2695_s3 + $0x418] sm:$0xff] }
  0x42   :  { %497 = vmatpush.msrb.mxu1 %v1349_v2  ;;  %408 = vmatpush.msrb.mxu2 %v1329_v3 }
  0x43   :  { %194 = vmatmul.f32.gmra.mxu0 %v53_v24  ;;  %270 = vmatmul.f32.gmra.mxu2 %v55_v25  ;;  %v1368_v24 = vld [vmem:[%s2695_s3 + $0x150] sm:$0xff] }
  0x44   :  { %464 = vmatpush.msrb.mxu3 %v1339_v4  ;;  %498 = vmatpush.msrb.mxu1 %v1348_v5  ;;  %v1377_v25 = vld [vmem:[%s2695_s3 + $0x190] sm:$0xff] }
  0x45   :  { %232 = vmatmul.f32.gmra.mxu1 %v54_v26  ;;  %308 = vmatmul.f32.gmra.mxu3 %v56_v27  ;;  %v1435_v27 = vld [vmem:[%s2695_s3 + $0x330] sm:$0xff] }
  0x46   :  { %424 = vmatpush.msra.mxu2 %v379_v6  ;;  %559 = vmatpush.msra.mxu3 %v1373_v7  ;;  %v1467_v5 = vld [vmem:[%s2695_s3 + $0x410] sm:$0xff]  ;;  %v1466_v6 = vld [vmem:[%s2695_s3 + $0x408] sm:$0xff] }
  0x47   :  { %593 = vmatpush.msra.mxu1 %v1382_v8  ;;  %798 = vmatpush.msra.mxu0 %v1435_v27 }
  0x48   :  { %425 = vmatpush.msra.mxu2 %v378_v9  ;;  %560 = vmatpush.msra.mxu3 %v1372_v10  ;;  %v1465_v10 = vld [vmem:[%s2695_s3 + $0x400] sm:$0xff] }
  0x49   :  { %594 = vmatpush.msra.mxu1 %v1381_v11 }
  0x4a   :  { %426 = vmatpush.msra.mxu2 %v377_v13  ;;  %561 = vmatpush.msra.mxu3 %v1371_v14 }
  0x4b   :  { %197 = vmatmul.f32.gmra.mxu0 %v58_v28  ;;  %273 = vmatmul.f32.gmra.mxu2 %v60_v29  ;;  %v373_v28 = vld [vmem:[%s2695_s3 + $0x8] sm:$0xff] }
  0x4c   :  { %595 = vmatpush.msra.mxu1 %v1380_v15  ;;  %427 = vmatpush.msra.mxu2 %v376_v16  ;;  %v1367_v29 = vld [vmem:[%s2695_s3 + $0x148] sm:$0xff]  ;;  %v1364_v16 = vld [vmem:[%s2695_s3 + $0x138] sm:$0xff] }
  0x4d   :  { %235 = vmatmul.f32.gmra.mxu1 %v59_v30  ;;  %311 = vmatmul.f32.gmra.mxu3 %v61_v31  ;;  %v1376_v30 = vld [vmem:[%s2695_s3 + $0x188] sm:$0xff] }
  0x4e   :  { %562 = vmatpush.msra.mxu3 %v1370_v17  ;;  %596 = vmatpush.msra.mxu1 %v1379_v18  ;;  %v1400_v17 = vld [vmem:[%s2695_s3 + $0x238] sm:$0xff] }
  0x4f   :  { %428 = vmatpush.msra.mxu2 %v375_v19  ;;  %v1409_v18 = vld [vmem:[%s2695_s3 + $0x278] sm:$0xff] }
  0x50   :  { %563 = vmatpush.msra.mxu3 %v1369_v20  ;;  %597 = vmatpush.msra.mxu1 %v1378_v21 }
  0x51   :  { %429 = vmatpush.msra.mxu2 %v374_v23  ;;  %v1363_v23 = vld [vmem:[%s2695_s3 + $0x130] sm:$0xff] }
  0x52   :  { %564 = vmatpush.msra.mxu3 %v1368_v24  ;;  %598 = vmatpush.msra.mxu1 %v1377_v25  ;;  %v1399_v25 = vld [vmem:[%s2695_s3 + $0x230] sm:$0xff] }
  0x53   :  { %200 = vmatmul.f32.gmra.mxu0 %v63_v32  ;;  %276 = vmatmul.f32.gmra.mxu2 %v65_v33  ;;  %v1434_v32 = vld [vmem:[%s2695_s3 + $0x328] sm:$0xff]  ;;  %v372_v33 = vld [vmem:[%s2695_s3] sm:$0xff] }
  0x54   :  { %430 = vmatpush.msra.mxu2 %v373_v28  ;;  %565 = vmatpush.msra.mxu3 %v1367_v29  ;;  %v1362_v28 = vld [vmem:[%s2695_s3 + $0x128] sm:$0xff] }
  0x55   :  { %238 = vmatmul.f32.gmra.mxu1 %v64_v34  ;;  %314 = vmatmul.f32.gmra.mxu3 %v66_v35  ;;  %v1366_v34 = vld [vmem:[%s2695_s3 + $0x140] sm:$0xff] }
  0x56   :  { %599 = vmatpush.msra.mxu1 %v1376_v30  ;;  %v1375_v35 = vld [vmem:[%s2695_s3 + $0x180] sm:$0xff]  ;;  %799 = vmatpush.msra.mxu0 %v1434_v32  ;;  %v1398_v30 = vld [vmem:[%s2695_s3 + $0x228] sm:$0xff] }
  0x57   :  { %431 = vmatpush.msra.mxu2 %v372_v33  ;;  %566 = vmatpush.msra.mxu3 %v1366_v34  ;;  %v1361_v34 = vld [vmem:[%s2695_s3 + $0x120] sm:$0xff] }
  0x58   :  { %600 = vmatpush.msra.mxu1 %v1375_v35 }
  0x5b   :  { %1322 = vmatmul.msk.f32.vlgmr.msrb.gmra.mxu0 %vm144_vm0, %v37_v36 }
  0x63   :  { %1323 = vmatmul.msk.f32.gmra.mxu0 %vm144_vm0, %v42_v37  ;;  %v1433_v37 = vld [vmem:[%s2695_s3 + $0x320] sm:$0xff] }
  0x64   :  { %800 = vmatpush.msra.mxu0 %v1433_v37  ;;  %v1406_v37 = vld [vmem:[%s2695_s3 + $0x260] sm:$0xff] }
  0x6b   :  { %1324 = vmatmul.msk.f32.gmra.mxu0 %vm144_vm0, %v47_v38 }
  0x73   :  { %1325 = vmatmul.msk.f32.gmra.mxu0 %vm144_vm0, %v52_v39 }
  0x7b   :  { %1326 = vmatmul.msk.f32.gmra.mxu0 %vm144_vm0, %v57_v40  ;;  %v1432_v40 = vld [vmem:[%s2695_s3 + $0x318] sm:$0xff] }
  0x7c   :  { %801 = vmatpush.msra.mxu0 %v1432_v40 }
  0x83   :  { %1327 = vmatmul.msk.f32.gmra.mxu0 %vm144_vm0, %v62_v41  ;;  %v2137_v41 = vld [vmem:[%s2694_s2] ss:$0 sm:$0xff] }
  0x8b   :  { %1328 = vmatmul.msk.f32.gmra.mxu0 %vm144_vm0, %v67_v42  ;;  %v1431_v42 = vld [vmem:[%s2695_s3 + $0x310] sm:$0xff] }
  0x8c   :  { %802 = vmatpush.msra.mxu0 %v1431_v42 }
  0x8e   :  { %803 = vmatpush.msra.mxu0 %v1430_v46 }
  0x90   :  { %804 = vmatpush.msra.mxu0 %v1429_v49 }
  0x92   :  { %933 = vmatpush.msrb.mxu0 %v1472_v51  ;;  %v1396_v51 = vld [vmem:[%s2695_s3 + $0x218] sm:$0xff] }
  0x94   :  { %934 = vmatpush.msrb.mxu0 %v1471_v53  ;;  %v1395_v53 = vld [vmem:[%s2695_s3 + $0x210] sm:$0xff] }
  0x96   :  { %935 = vmatpush.msrb.mxu0 %v1470_v55 }
  0x98   :  { %936 = vmatpush.msrb.mxu0 %v1469_v59 }
  0x9a   :  { %937 = vmatpush.msrb.mxu0 %v1468_v1 }
  0x9c   :  { %938 = vmatpush.msrb.mxu0 %v1467_v5  ;;  %v1427_v5 = vld [vmem:[%s2695_s3 + $0x2f8] sm:$0xff] }
  0x9e   :  { %939 = vmatpush.msrb.mxu0 %v1466_v6 }
  0xa0   :  { %v1963_v43 = vpop.f32.mrf.mxu0  ;;  %940 = vmatpush.msrb.mxu0 %v1465_v10 }
  0xa1   :  { %v184_v45 = vadd.f32 %v2137_v41, %v1963_v43 }
  0xa2   :  { %v221_v31 = vpop.f32.mrf.mxu1 }
  0xa3   :  { %v222_v52 = vadd.f32 %v221_v31, %v184_v45  ;;  %v1407_v31 = vld [vmem:[%s2695_s3 + $0x268] sm:$0xff] }
  0xa6   :  { %v259_v36 = vpop.f32.mrf.mxu2 }
  0xa7   :  { %v260_v54 = vadd.f32 %v259_v36, %v222_v52  ;;  %v1397_v36 = vld [vmem:[%s2695_s3 + $0x220] sm:$0xff]  ;;  %v1405_v52 = vld [vmem:[%s2695_s3 + $0x258] sm:$0xff] }
  0xa8   :  { %v1974_v47 = vpop.f32.mrf.mxu0  ;;  %v297_v38 = vpop.f32.mrf.mxu3 }
  0xa9   :  { %v187_v56 = vadd.f32 %v2137_v41, %v1974_v47  ;;  %v298_v58 = vadd.f32 %v297_v38, %v260_v54  ;;  %v1404_v54 = vld [vmem:[%s2695_s3 + $0x250] sm:$0xff] }
  0xaa   :  { %v224_v44 = vpop.f32.mrf.mxu1 }
  0xab   :  { %v225_v63 = vadd.f32 %v224_v44, %v187_v56  ;;  %v1360_v44 = vld [vmem:[%s2695_s3 + $0x118] sm:$0xff] }
  0xae   :  { %v262_v48 = vpop.f32.mrf.mxu2 }
  0xaf   :  { %v263_v2 = vadd.f32 %v262_v48, %v225_v63  ;;  %v1357_v63 = vld [vmem:[%s2695_s3 + $0x100] sm:$0xff] }
  0xb0   :  { %v2012_v60 = vpop.f32.mrf.mxu0  ;;  %v300_v43 = vpop.f32.mrf.mxu3 }
  0xb1   :  { %v190_v4 = vadd.f32 %v2137_v41, %v2012_v60  ;;  %v301_v7 = vadd.f32 %v300_v43, %v263_v2  ;;  %v1393_v2 = vld [vmem:[%s2695_s3 + $0x200] sm:$0xff] }
  0xb2   :  { %v227_v57 = vpop.f32.mrf.mxu1 }
  0xb3   :  { %v228_v60 = vadd.f32 %v227_v57, %v190_v4  ;;  %v1358_v57 = vld [vmem:[%s2695_s3 + $0x108] sm:$0xff]  ;;  %v1391_v4 = vld [vmem:[%s2695_s3 + $0x1f8] sm:$0xff] }
  0xb6   :  { %v265_v61 = vpop.f32.mrf.mxu2 }
  0xb7   :  { %v266_v14 = vadd.f32 %v265_v61, %v228_v60  ;;  %v1394_v61 = vld [vmem:[%s2695_s3 + $0x208] sm:$0xff] }
  0xb8   :  { %v2059_v12 = vpop.f32.mrf.mxu0  ;;  %v303_v47 = vpop.f32.mrf.mxu3 }
  0xb9   :  { %v193_v22 = vadd.f32 %v2137_v41, %v2059_v12  ;;  %v1408_v12 = vld [vmem:[%s2695_s3 + $0x270] sm:$0xff]  ;;  %v304_v27 = vadd.f32 %v303_v47, %v266_v14 }
  0xba   :  { %v230_v8 = vpop.f32.mrf.mxu1  ;;  %v1444_v14 = vld [vmem:[%s2695_s3 + $0x370] sm:$0xff] }
  0xbb   :  { %v231_v32 = vadd.f32 %v230_v8, %v193_v22 }
  0xbe   :  { %v268_v13 = vpop.f32.mrf.mxu2 }
  0xbf   :  { %v269_v38 = vadd.f32 %v268_v13, %v231_v32  ;;  %v1426_v13 = vld [vmem:[%s2695_s3 + $0x2f0] sm:$0xff] }
  0xc0   :  { %v2100_v26 = vpop.f32.mrf.mxu0  ;;  %v306_v24 = vpop.f32.mrf.mxu3 }
  0xc1   :  { %v196_v48 = vadd.f32 %v2137_v41, %v2100_v26  ;;  %v1359_v26 = vld [vmem:[%s2695_s3 + $0x110] sm:$0xff]  ;;  %v307_v43 = vadd.f32 %v306_v24, %v269_v38  ;;  %v1388_v24 = vld [vmem:[%s2695_s3 + $0x1e0] sm:$0xff] }
  0xc2   :  { %v233_v35 = vpop.f32.mrf.mxu1 }
  0xc6   :  { %v271_v42 = vpop.f32.mrf.mxu2 }
  0xc8   :  { %v2129_v39 = vpop.f32.mrf.mxu0  ;;  %v309_v55 = vpop.f32.mrf.mxu3 }
  0xc9   :  { %v199_v6 = vadd.f32 %v2137_v41, %v2129_v39  ;;  %v1390_v39 = vld [vmem:[%s2695_s3 + $0x1f0] sm:$0xff] }
  0xca   :  { %v236_v47 = vpop.f32.mrf.mxu1 }
  0xce   :  { %v274_v8 = vpop.f32.mrf.mxu2 }
  0xd0   :  { %v2150_v50 = vpop.f32.mrf.mxu0 }
  0xd2   :  { %v239_v32 = vpop.f32.mrf.mxu1 }
  0xd8   :  { %v335_v62 = vpop.f32.mrf.mxu0 }
  0xd9   :  { %v336_v0 = vadd.f32 %v335_v62, %v298_v58  ;;  %v234_v58 = vadd.f32 %v233_v35, %v196_v48  ;;  %v1403_v62 = vld [vmem:[%s2695_s3 + $0x248] sm:$0xff]  ;;  %v1422_v35 = vld [vmem:[%s2695_s3 + $0x2d0] sm:$0xff] }
  0xda   :  { %v1439_v48 = vld [vmem:[%s2695_s3 + $0x348] sm:$0xff] }
  0xdb   :  { %v356_v3 = vmax.f32 %v336_v0, 0.0  ;;  %v272_v0 = vadd.f32 %v271_v42, %v234_v58 }
  0xdd   :  { %363 = vst.msk [vmem:[#allocation2] sm:$0xff] %vm144_vm0, %v356_v3  ;;  %v1402_v3 = vld [vmem:[%s2695_s3 + $0x240] sm:$0xff]  ;;  %v310_v60 = vadd.f32 %v309_v55, %v272_v0  ;;  %v1418_v55 = vld [vmem:[%s2695_s3 + $0x2b8] sm:$0xff]  ;;  %v1462_v0 = vld [vmem:[%s2695_s3 + $0x3f0] sm:$0xff] }
  0xe0   :  { %v338_v9 = vpop.f32.mrf.mxu0 }
  0xe1   :  { %v339_v11 = vadd.f32 %v338_v9, %v301_v7  ;;  %v1445_v7 = vld [vmem:[%s2695_s3 + $0x378] sm:$0xff] }
  0xe3   :  { %v357_v15 = vmax.f32 %v339_v11, 0.0 }
  0xe4   :  { %v380_v19 = vld [vmem:[#allocation2 + $0x2] sm:$0x3]  ;;  %v436_v20 = vld [vmem:[#allocation2 + $0x4] sm:$0x3]  ;;  %v470_v21 = vld [vmem:[#allocation2 + $0x6] sm:$0x3] }
  0xe5   :  { %364 = vst.msk [vmem:[#allocation2 + $0x8] sm:$0xff] %vm144_vm0, %v357_v15  ;;  %1337 = vmatmul.msk.f32.vlgmr.msrb.gmra.mxu2 %vm144_vm0, %v380_v19  ;;  %1347 = vmatmul.msk.f32.vlgmr.msrb.gmra.mxu3 %vm144_vm0, %v436_v20  ;;  %v371_v49 = vld [vmem:[#allocation2] sm:$0x3]  ;;  %v1425_v19 = vld [vmem:[%s2695_s3 + $0x2e8] sm:$0xff]  ;;  %v312_v20 = vpop.f32.mrf.mxu3 }
  0xe6   :  { %1356 = vmatmul.msk.f32.vlgmr.msrb.gmra.mxu1 %vm144_vm0, %v470_v21  ;;  %525 = vmatpush.msrb.mxu2 %v1364_v16  ;;  %v237_v16 = vadd.f32 %v236_v47, %v199_v6  ;;  %v1443_v21 = vld [vmem:[%s2695_s3 + $0x368] sm:$0xff]  ;;  %v1504_v47 = vld [vmem:[%s2695_s3 + $0x518] sm:$0xff] }
  0xe7   :  { %661 = vmatpush.msrb.mxu3 %v1400_v17  ;;  %695 = vmatpush.msrb.mxu1 %v1409_v18  ;;  %v1389_v18 = vld [vmem:[%s2695_s3 + $0x1e8] sm:$0xff] }
  0xe8   :  { %526 = vmatpush.msrb.mxu2 %v1363_v23  ;;  %v341_v29 = vpop.f32.mrf.mxu0  ;;  %v275_v22 = vadd.f32 %v274_v8, %v237_v16  ;;  %v1461_v6 = vld [vmem:[%s2695_s3 + $0x3e8] sm:$0xff]  ;;  %v1503_v8 = vld [vmem:[%s2695_s3 + $0x510] sm:$0xff]  ;;  %v1501_v16 = vld [vmem:[%s2695_s3 + $0x500] sm:$0xff] }
  0xe9   :  { %662 = vmatpush.msrb.mxu3 %v1399_v25  ;;  %696 = vmatpush.msrb.mxu1 %v1408_v12  ;;  %v342_v33 = vadd.f32 %v341_v29, %v304_v27  ;;  %v1424_v25 = vld [vmem:[%s2695_s3 + $0x2e0] sm:$0xff]  ;;  %v202_v29 = vadd.f32 %v2137_v41, %v2150_v50  ;;  %v1441_v41 = vld [vmem:[%s2695_s3 + $0x358] sm:$0xff]  ;;  %v1507_v50 = vld [vmem:[%s2695_s3 + $0x530] sm:$0xff] }
  0xea   :  { %527 = vmatpush.msrb.mxu2 %v1362_v28  ;;  %v1442_v12 = vld [vmem:[%s2695_s3 + $0x360] sm:$0xff]  ;;  %v1508_v28 = vld [vmem:[%s2695_s3 + $0x538] sm:$0xff] }
  0xeb   :  { %v358_v40 = vmax.f32 %v342_v33, 0.0  ;;  %663 = vmatpush.msrb.mxu3 %v1398_v30  ;;  %697 = vmatpush.msrb.mxu1 %v1407_v31  ;;  %v1387_v30 = vld [vmem:[%s2695_s3 + $0x1d8] sm:$0xff]  ;;  %v313_v33 = vadd.f32 %v312_v20, %v275_v22  ;;  %v240_v42 = vadd.f32 %v239_v32, %v202_v29  ;;  %v1476_v20 = vld [vmem:[%s2695_s3 + $0x450] sm:$0xff]  ;;  %v1412_v22 = vld [vmem:[%s2695_s3 + $0x288] sm:$0xff] }
  0xec   :  { %528 = vmatpush.msrb.mxu2 %v1361_v34  ;;  %v538_v45 = vld [vmem:[#allocation2 + $0xa] sm:$0x3]  ;;  %v572_v46 = vld [vmem:[#allocation2 + $0xc] sm:$0x3]  ;;  %v504_v11 = vld [vmem:[#allocation2 + $0x8] sm:$0x3] }
  0xed   :  { %365 = vst.msk [vmem:[#allocation2 + $0x10] sm:$0xff] %vm144_vm0, %v358_v40  ;;  %664 = vmatpush.msrb.mxu3 %v1397_v36  ;;  %698 = vmatpush.msrb.mxu1 %v1406_v37  ;;  %v1423_v31 = vld [vmem:[%s2695_s3 + $0x2d8] sm:$0xff]  ;;  %v1386_v34 = vld [vmem:[%s2695_s3 + $0x1d0] sm:$0xff]  ;;  %v277_v36 = vpop.f32.mrf.mxu2  ;;  %v1506_v40 = vld [vmem:[%s2695_s3 + $0x528] sm:$0xff] }
  0xee   :  { %1338 = vmatmul.msk.f32.vlgmr.msra.gmra.mxu2 %vm144_vm0, %v371_v49  ;;  %1374 = vmatmul.msk.f32.vlgmr.msra.gmra.mxu3 %vm144_vm0, %v538_v45  ;;  %v1440_v37 = vld [vmem:[%s2695_s3 + $0x350] sm:$0xff]  ;;  %v1385_v45 = vld [vmem:[%s2695_s3 + $0x1c8] sm:$0xff]  ;;  %v1505_v49 = vld [vmem:[%s2695_s3 + $0x520] sm:$0xff] }
  0xef   :  { %529 = vmatpush.msrb.mxu2 %v1360_v44  ;;  %1383 = vmatmul.msk.f32.vlgmr.msra.gmra.mxu1 %vm144_vm0, %v572_v46  ;;  %v1421_v46 = vld [vmem:[%s2695_s3 + $0x2c8] sm:$0xff]  ;;  %v1474_v29 = vld [vmem:[%s2695_s3 + $0x440] sm:$0xff]  ;;  %v1499_v32 = vld [vmem:[%s2695_s3 + $0x4f8] sm:$0xff] }
  0xf0   :  { %665 = vmatpush.msrb.mxu3 %v1396_v51  ;;  %699 = vmatpush.msrb.mxu1 %v1405_v52  ;;  %v344_v56 = vpop.f32.mrf.mxu0  ;;  %v278_v51 = vadd.f32 %v277_v36, %v240_v42  ;;  %v1498_v36 = vld [vmem:[%s2695_s3 + $0x4f0] sm:$0xff]  ;;  %v1497_v42 = vld [vmem:[%s2695_s3 + $0x4e8] sm:$0xff] }
  0xf1   :  { %530 = vmatpush.msrb.mxu2 %v1359_v26  ;;  %v345_v59 = vadd.f32 %v344_v56, %v307_v43  ;;  %v1384_v26 = vld [vmem:[%s2695_s3 + $0x1c0] sm:$0xff]  ;;  %v606_v56 = vld [vmem:[#allocation2 + $0xe] sm:$0x3] }
  0xf2   :  { %666 = vmatpush.msrb.mxu3 %v1395_v53  ;;  %700 = vmatpush.msrb.mxu1 %v1404_v54  ;;  %v1420_v43 = vld [vmem:[%s2695_s3 + $0x2c0] sm:$0xff]  ;;  %v315_v53 = vpop.f32.mrf.mxu3 }
  0xf3   :  { %v359_v1 = vmax.f32 %v345_v59, 0.0  ;;  %531 = vmatpush.msrb.mxu2 %v1358_v57  ;;  %v1438_v54 = vld [vmem:[%s2695_s3 + $0x340] sm:$0xff]  ;;  %v1463_v57 = vld [vmem:[%s2695_s3 + $0x3f8] sm:$0xff]  ;;  %v316_v58 = vadd.f32 %v315_v53, %v278_v51  ;;  %v1538_v51 = vld [vmem:[%s2695_s3 + $0x608] sm:$0xff] }
  0xf4   :  { %667 = vmatpush.msrb.mxu3 %v1394_v61  ;;  %701 = vmatpush.msrb.mxu1 %v1403_v62  ;;  %v640_v9 = vld [vmem:[#allocation2 + $0x10] sm:$0x3]  ;;  %v674_v10 = vld [vmem:[#allocation2 + $0x12] sm:$0x3]  ;;  %v742_v59 = vld [vmem:[#allocation2 + $0x16] sm:$0x3] }
  0xf5   :  { %366 = vst.msk [vmem:[#allocation2 + $0x18] sm:$0xff] %vm144_vm0, %v359_v1  ;;  %532 = vmatpush.msrb.mxu2 %v1357_v63  ;;  %v1481_v61 = vld [vmem:[%s2695_s3 + $0x478] sm:$0xff]  ;;  %v1417_v62 = vld [vmem:[%s2695_s3 + $0x2b0] sm:$0xff]  ;;  %v1537_v53 = vld [vmem:[%s2695_s3 + $0x600] sm:$0xff] }
  0xf6   :  { %668 = vmatpush.msrb.mxu3 %v1393_v2  ;;  %702 = vmatpush.msrb.mxu1 %v1402_v3  ;;  %v1480_v3 = vld [vmem:[%s2695_s3 + $0x470] sm:$0xff] }
  0xf7   :  { %627 = vmatpush.msra.mxu2 %v1391_v4  ;;  %1401 = vmatmul.msk.f32.vlgmr.msrb.gmra.mxu3 %vm144_vm0, %v640_v9 }
  0xf8   :  { %763 = vmatpush.msra.mxu3 %v1427_v5  ;;  %831 = vmatpush.msra.mxu1 %v1445_v7  ;;  %v347_v15 = vpop.f32.mrf.mxu0  ;;  %v1416_v5 = vld [vmem:[%s2695_s3 + $0x2a8] sm:$0xff] }
  0xf9   :  { %1365 = vmatmul.msk.f32.vlgmr.msrb.gmra.mxu2 %vm144_vm0, %v504_v11  ;;  %1410 = vmatmul.msk.f32.vlgmr.msrb.gmra.mxu1 %vm144_vm0, %v674_v10  ;;  %v348_v17 = vadd.f32 %v347_v15, %v310_v60  ;;  %v1479_v7 = vld [vmem:[%s2695_s3 + $0x468] sm:$0xff]  ;;  %v1415_v10 = vld [vmem:[%s2695_s3 + $0x2a0] sm:$0xff]  ;;  %v1477_v15 = vld [vmem:[%s2695_s3 + $0x458] sm:$0xff] }
  0xfa   :  { %628 = vmatpush.msra.mxu2 %v1390_v39  ;;  %764 = vmatpush.msra.mxu3 %v1426_v13  ;;  %v1460_v60 = vld [vmem:[%s2695_s3 + $0x3e0] sm:$0xff]  ;;  %v1502_v39 = vld [vmem:[%s2695_s3 + $0x508] sm:$0xff]  ;;  %v1414_v13 = vld [vmem:[%s2695_s3 + $0x298] sm:$0xff] }
  0xfb   :  { %832 = vmatpush.msra.mxu1 %v1444_v14  ;;  %v360_v23 = vmax.f32 %v348_v17, 0.0  ;;  %v1478_v11 = vld [vmem:[%s2695_s3 + $0x460] sm:$0xff]  ;;  %v1459_v14 = vld [vmem:[%s2695_s3 + $0x3d8] sm:$0xff] }
  0xfc   :  { %629 = vmatpush.msra.mxu2 %v1389_v18  ;;  %765 = vmatpush.msra.mxu3 %v1425_v19  ;;  %v776_v27 = vld [vmem:[#allocation2 + $0x18] sm:$0x3]  ;;  %v810_v63 = vld [vmem:[#allocation2 + $0x1a] sm:$0x3]  ;;  %v1413_v18 = vld [vmem:[%s2695_s3 + $0x290] sm:$0xff] }
  0xfd   :  { %367 = vst.msk [vmem:[#allocation2 + $0x20] sm:$0xff] %vm144_vm0, %v360_v23  ;;  %833 = vmatpush.msra.mxu1 %v1443_v21  ;;  %1437 = vmatmul.msk.f32.vlgmr.msra.gmra.mxu0 %vm144_vm0, %v776_v27  ;;  %v1544_v17 = vld [vmem:[%s2695_s3 + $0x638] sm:$0xff]  ;;  %v1458_v19 = vld [vmem:[%s2695_s3 + $0x3d0] sm:$0xff]  ;;  %v1542_v27 = vld [vmem:[%s2695_s3 + $0x628] sm:$0xff] }
  0xfe   :  { %630 = vmatpush.msra.mxu2 %v1388_v24  ;;  %766 = vmatpush.msra.mxu3 %v1424_v25  ;;  %v1543_v23 = vld [vmem:[%s2695_s3 + $0x630] sm:$0xff]  ;;  %v1457_v24 = vld [vmem:[%s2695_s3 + $0x3c8] sm:$0xff] }
  0xff   :  { %834 = vmatpush.msra.mxu1 %v1442_v12  ;;  %1069 = vmatpush.msra.mxu0 %v1508_v28  ;;  %v1475_v25 = vld [vmem:[%s2695_s3 + $0x448] sm:$0xff]  ;;  %v1411_v12 = vld [vmem:[%s2695_s3 + $0x280] sm:$0xff] }
 0x100   :  { %631 = vmatpush.msra.mxu2 %v1387_v30  ;;  %767 = vmatpush.msra.mxu3 %v1423_v31  ;;  %v350_v38 = vpop.f32.mrf.mxu0  ;;  %v1456_v28 = vld [vmem:[%s2695_s3 + $0x3c0] sm:$0xff]  ;;  %v1454_v30 = vld [vmem:[%s2695_s3 + $0x3b8] sm:$0xff]  ;;  %v708_v31 = vld [vmem:[#allocation2 + $0x14] sm:$0x3] }
 0x101   :  { %835 = vmatpush.msra.mxu1 %v1441_v41  ;;  %1070 = vmatpush.msra.mxu0 %v1507_v50  ;;  %v351_v44 = vadd.f32 %v350_v38, %v313_v33  ;;  %v878_v41 = vld [vmem:[#allocation2 + $0x1e] sm:$0x3]  ;;  %v1541_v33 = vld [vmem:[%s2695_s3 + $0x620] sm:$0xff] }
 0x102   :  { %632 = vmatpush.msra.mxu2 %v1386_v34  ;;  %768 = vmatpush.msra.mxu3 %v1422_v35  ;;  %v1517_v50 = vld [vmem:[%s2695_s3 + $0x578] sm:$0xff]  ;;  %v1453_v35 = vld [vmem:[%s2695_s3 + $0x3b0] sm:$0xff] }
 0x103   :  { %836 = vmatpush.msra.mxu1 %v1440_v37  ;;  %v361_v52 = vmax.f32 %v351_v44, 0.0  ;;  %1071 = vmatpush.msra.mxu0 %v1506_v40  ;;  %v1516_v37 = vld [vmem:[%s2695_s3 + $0x570] sm:$0xff]  ;;  %v1540_v38 = vld [vmem:[%s2695_s3 + $0x618] sm:$0xff]  ;;  %v1452_v40 = vld [vmem:[%s2695_s3 + $0x3a8] sm:$0xff] }
 0x104   :  { %633 = vmatpush.msra.mxu2 %v1385_v45  ;;  %769 = vmatpush.msra.mxu3 %v1421_v46  ;;  %v912_v1 = vld [vmem:[#allocation2 + $0x20] sm:$0x3]  ;;  %v946_v34 = vld [vmem:[#allocation2 + $0x22] sm:$0x3]  ;;  %v1515_v44 = vld [vmem:[%s2695_s3 + $0x568] sm:$0xff] }
 0x105   :  { %368 = vst.msk [vmem:[#allocation2 + $0x28] sm:$0xff] %vm144_vm0, %v361_v52  ;;  %837 = vmatpush.msra.mxu1 %v1439_v48  ;;  %1072 = vmatpush.msra.mxu0 %v1505_v49  ;;  %v1539_v45 = vld [vmem:[%s2695_s3 + $0x610] sm:$0xff]  ;;  %v1451_v46 = vld [vmem:[%s2695_s3 + $0x3a0] sm:$0xff]  ;;  %v1450_v52 = vld [vmem:[%s2695_s3 + $0x398] sm:$0xff] }
 0x106   :  { %634 = vmatpush.msra.mxu2 %v1384_v26  ;;  %770 = vmatpush.msra.mxu3 %v1420_v43  ;;  %v1496_v48 = vld [vmem:[%s2695_s3 + $0x4e0] sm:$0xff]  ;;  %v1495_v26 = vld [vmem:[%s2695_s3 + $0x4d8] sm:$0xff] }
 0x107   :  { %838 = vmatpush.msra.mxu1 %v1438_v54  ;;  %1392 = vmatmul.msk.f32.vlgmr.msra.gmra.mxu2 %vm144_vm0, %v606_v56  ;;  %v1514_v49 = vld [vmem:[%s2695_s3 + $0x560] sm:$0xff]  ;;  %v1513_v43 = vld [vmem:[%s2695_s3 + $0x558] sm:$0xff]  ;;  %v1449_v54 = vld [vmem:[%s2695_s3 + $0x390] sm:$0xff] }
 0x108   :  { %729 = vmatpush.msrb.mxu2 %v1418_v55  ;;  %1428 = vmatmul.msk.f32.vlgmr.msra.gmra.mxu3 %vm144_vm0, %v742_v59  ;;  %v353_v2 = vpop.f32.mrf.mxu0  ;;  %v1494_v55 = vld [vmem:[%s2695_s3 + $0x4d0] sm:$0xff]  ;;  %v1493_v59 = vld [vmem:[%s2695_s3 + $0x4c8] sm:$0xff] }
 0x109   :  { %1446 = vmatmul.msk.f32.vlgmr.msra.gmra.mxu1 %vm144_vm0, %v810_v63  ;;  %899 = vmatpush.msrb.mxu3 %v1463_v57  ;;  %v354_v4 = vadd.f32 %v353_v2, %v316_v58  ;;  %v1512_v56 = vld [vmem:[%s2695_s3 + $0x550] sm:$0xff]  ;;  %v1448_v58 = vld [vmem:[%s2695_s3 + $0x388] sm:$0xff]  ;;  %v1492_v63 = vld [vmem:[%s2695_s3 + $0x4c0] sm:$0xff] }
 0x10a   :  { %967 = vmatpush.msrb.mxu1 %v1481_v61  ;;  %730 = vmatpush.msrb.mxu2 %v1417_v62  ;;  %v1511_v61 = vld [vmem:[%s2695_s3 + $0x548] sm:$0xff]  ;;  %v1447_v62 = vld [vmem:[%s2695_s3 + $0x380] sm:$0xff]  ;;  %v844_v2 = vld [vmem:[#allocation2 + $0x1c] sm:$0x3] }
 0x10b   :  { %900 = vmatpush.msrb.mxu3 %v1462_v0  ;;  %1473 = vmatmul.msk.f32.vlgmr.msrb.gmra.mxu0 %vm144_vm0, %v912_v1  ;;  %v362_v9 = vmax.f32 %v354_v4, 0.0  ;;  %v1510_v0 = vld [vmem:[%s2695_s3 + $0x540] sm:$0xff]  ;;  %v1490_v1 = vld [vmem:[%s2695_s3 + $0x4b8] sm:$0xff] }
 0x10c   :  { %968 = vmatpush.msrb.mxu1 %v1480_v3  ;;  %1073 = vmatpush.msra.mxu0 %v1504_v47  ;;  %v1048_v21 = vld [vmem:[#allocation2 + $0x28] sm:$0x3]  ;;  %v1014_v3 = vld [vmem:[#allocation2 + $0x26] sm:$0x3]  ;;  %v1535_v47 = vld [vmem:[%s2695_s3 + $0x5f8] sm:$0xff] }
 0x10d   :  { %731 = vmatpush.msrb.mxu2 %v1416_v5  ;;  %901 = vmatpush.msrb.mxu3 %v1461_v6  ;;  %370 = vst.msk [vmem:[#allocation2 + $0x30] sm:$0x3] %vm369_vm1, %v362_v9  ;;  %v1082_v4 = vld [vmem:[#allocation2 + $0x2a] sm:$0x3]  ;;  %v1489_v5 = vld [vmem:[%s2695_s3 + $0x4b0] sm:$0xff]  ;;  %v1487_v9 = vld [vmem:[%s2695_s3 + $0x4a0] sm:$0xff] }
 0x10e   :  { %969 = vmatpush.msrb.mxu1 %v1479_v7  ;;  %1074 = vmatpush.msra.mxu0 %v1503_v8  ;;  %v1534_v6 = vld [vmem:[%s2695_s3 + $0x5f0] sm:$0xff]  ;;  %v1488_v7 = vld [vmem:[%s2695_s3 + $0x4a8] sm:$0xff] }
 0x10f   :  { %732 = vmatpush.msrb.mxu2 %v1415_v10  ;;  %902 = vmatpush.msrb.mxu3 %v1460_v60  ;;  %v1533_v8 = vld [vmem:[%s2695_s3 + $0x5e8] sm:$0xff]  ;;  %v1532_v10 = vld [vmem:[%s2695_s3 + $0x5e0] sm:$0xff]  ;;  %v1486_v60 = vld [vmem:[%s2695_s3 + $0x498] sm:$0xff] }
 0x110   :  { %970 = vmatpush.msrb.mxu1 %v1478_v11  ;;  %1075 = vmatpush.msra.mxu0 %v1502_v39  ;;  %v1531_v11 = vld [vmem:[%s2695_s3 + $0x5d8] sm:$0xff]  ;;  %v1485_v39 = vld [vmem:[%s2695_s3 + $0x490] sm:$0xff] }
 0x111   :  { %733 = vmatpush.msrb.mxu2 %v1414_v13  ;;  %903 = vmatpush.msrb.mxu3 %v1459_v14  ;;  %v1530_v13 = vld [vmem:[%s2695_s3 + $0x5d0] sm:$0xff]  ;;  %v1484_v14 = vld [vmem:[%s2695_s3 + $0x488] sm:$0xff] }
 0x112   :  { %971 = vmatpush.msrb.mxu1 %v1477_v15  ;;  %1076 = vmatpush.msra.mxu0 %v1501_v16  ;;  %v1529_v15 = vld [vmem:[%s2695_s3 + $0x5c8] sm:$0xff]  ;;  %v1483_v16 = vld [vmem:[%s2695_s3 + $0x480] sm:$0xff] }
 0x113   :  { %734 = vmatpush.msrb.mxu2 %v1413_v18  ;;  %904 = vmatpush.msrb.mxu3 %v1458_v19  ;;  %v1526_v18 = vld [vmem:[%s2695_s3 + $0x5b8] sm:$0xff]  ;;  %v980_v19 = vld [vmem:[#allocation2 + $0x24] sm:$0x3] }
 0x114   :  { %1205 = vmatpush.msrb.mxu0 %v1544_v17  ;;  %972 = vmatpush.msrb.mxu1 %v1476_v20  ;;  %v1184_v57 = vld [vmem:[#allocation2 + $0x30] sm:$0x3]  ;;  %v1528_v17 = vld [vmem:[%s2695_s3 + $0x5c0] sm:$0xff]  ;;  %v1150_v20 = vld [vmem:[#allocation2 + $0x2e] sm:$0x3] }
 0x115   :  { %1509 = vmatmul.msk.f32.vlgmr.msra.gmra.mxu0 %vm144_vm0, %v1048_v21  ;;  %735 = vmatpush.msrb.mxu2 %v1412_v22  ;;  %v1525_v21 = vld [vmem:[%s2695_s3 + $0x5b0] sm:$0xff]  ;;  %v1524_v22 = vld [vmem:[%s2695_s3 + $0x5a8] sm:$0xff] }
 0x116   :  { %1206 = vmatpush.msrb.mxu0 %v1543_v23  ;;  %905 = vmatpush.msrb.mxu3 %v1457_v24  ;;  %v1523_v23 = vld [vmem:[%s2695_s3 + $0x5a0] sm:$0xff]  ;;  %v1522_v24 = vld [vmem:[%s2695_s3 + $0x598] sm:$0xff] }
 0x117   :  { %973 = vmatpush.msrb.mxu1 %v1475_v25  ;;  %736 = vmatpush.msrb.mxu2 %v1411_v12  ;;  %v1521_v25 = vld [vmem:[%s2695_s3 + $0x590] sm:$0xff]  ;;  %v1520_v12 = vld [vmem:[%s2695_s3 + $0x588] sm:$0xff] }
 0x118   :  { %1207 = vmatpush.msrb.mxu0 %v1542_v27  ;;  %906 = vmatpush.msrb.mxu3 %v1456_v28  ;;  %v1519_v27 = vld [vmem:[%s2695_s3 + $0x580] sm:$0xff]  ;;  %v1116_v28 = vld [vmem:[#allocation2 + $0x2c] sm:$0x3] }
 0x119   :  { %974 = vmatpush.msrb.mxu1 %v1474_v29  ;;  %1419 = vmatmul.msk.f32.vlgmr.msrb.gmra.mxu2 %vm144_vm0, %v708_v31 }
 0x11a   :  { %865 = vmatpush.msra.mxu2 %v1454_v30  ;;  %1464 = vmatmul.msk.f32.vlgmr.msrb.gmra.mxu3 %vm144_vm0, %v878_v41 }
 0x11b   :  { %1482 = vmatmul.msk.f32.vlgmr.msrb.gmra.mxu1 %vm144_vm0, %v946_v34  ;;  %1035 = vmatpush.msra.mxu3 %v1499_v32 }
 0x11c   :  { %1103 = vmatpush.msra.mxu1 %v1517_v50  ;;  %1208 = vmatpush.msrb.mxu0 %v1541_v33 }
 0x11d   :  { %866 = vmatpush.msra.mxu2 %v1453_v35  ;;  %1036 = vmatpush.msra.mxu3 %v1498_v36 }
 0x11e   :  { %1104 = vmatpush.msra.mxu1 %v1516_v37  ;;  %1209 = vmatpush.msrb.mxu0 %v1540_v38 }
 0x11f   :  { %867 = vmatpush.msra.mxu2 %v1452_v40  ;;  %1037 = vmatpush.msra.mxu3 %v1497_v42 }
 0x120   :  { %1105 = vmatpush.msra.mxu1 %v1515_v44  ;;  %1210 = vmatpush.msrb.mxu0 %v1539_v45 }
 0x121   :  { %868 = vmatpush.msra.mxu2 %v1451_v46  ;;  %1038 = vmatpush.msra.mxu3 %v1496_v48 }
 0x122   :  { %1106 = vmatpush.msra.mxu1 %v1514_v49  ;;  %1211 = vmatpush.msrb.mxu0 %v1538_v51 }
 0x123   :  { %869 = vmatpush.msra.mxu2 %v1450_v52  ;;  %1039 = vmatpush.msra.mxu3 %v1495_v26 }
 0x124   :  { %1107 = vmatpush.msra.mxu1 %v1513_v43  ;;  %1212 = vmatpush.msrb.mxu0 %v1537_v53 }
 0x125   :  { %1545 = vmatmul.msk.f32.vlgmr.msrb.gmra.mxu0 %vm144_vm0, %v1184_v57  ;;  %870 = vmatpush.msra.mxu2 %v1449_v54 }
 0x126   :  { %1040 = vmatpush.msra.mxu3 %v1494_v55  ;;  %1108 = vmatpush.msra.mxu1 %v1512_v56 }
 0x127   :  { %871 = vmatpush.msra.mxu2 %v1448_v58 }
 0x128   :  { %1041 = vmatpush.msra.mxu3 %v1493_v59  ;;  %1109 = vmatpush.msra.mxu1 %v1511_v61 }
 0x129   :  { %872 = vmatpush.msra.mxu2 %v1447_v62 }
 0x12a   :  { %1042 = vmatpush.msra.mxu3 %v1492_v63  ;;  %1110 = vmatpush.msra.mxu1 %v1510_v0 }
 0x12b   :  { %1455 = vmatmul.msk.f32.vlgmr.msra.gmra.mxu2 %vm144_vm0, %v844_v2  ;;  %1500 = vmatmul.msk.f32.vlgmr.msra.gmra.mxu3 %vm144_vm0, %v1014_v3 }
 0x12c   :  { %1001 = vmatpush.msrb.mxu2 %v1490_v1  ;;  %1518 = vmatmul.msk.f32.vlgmr.msra.gmra.mxu1 %vm144_vm0, %v1082_v4 }
 0x12d   :  { %1171 = vmatpush.msrb.mxu3 %v1535_v47 }
 0x12e   :  { %1002 = vmatpush.msrb.mxu2 %v1489_v5 }
 0x12f   :  { %1172 = vmatpush.msrb.mxu3 %v1534_v6 }
 0x130   :  { %1003 = vmatpush.msrb.mxu2 %v1488_v7 }
 0x131   :  { %1173 = vmatpush.msrb.mxu3 %v1533_v8 }
 0x132   :  { %1004 = vmatpush.msrb.mxu2 %v1487_v9 }
 0x133   :  { %1174 = vmatpush.msrb.mxu3 %v1532_v10 }
 0x134   :  { %1005 = vmatpush.msrb.mxu2 %v1486_v60 }
 0x135   :  { %1175 = vmatpush.msrb.mxu3 %v1531_v11 }
 0x136   :  { %1006 = vmatpush.msrb.mxu2 %v1485_v39  ;;  %v1549_v39 = vld [vmem:[%s2696_s4] ss:$0 sm:$0xff] }
 0x137   :  { %1176 = vmatpush.msrb.mxu3 %v1530_v13 }
 0x138   :  { %1007 = vmatpush.msrb.mxu2 %v1484_v14 }
 0x139   :  { %1177 = vmatpush.msrb.mxu3 %v1529_v15 }
 0x13a   :  { %1008 = vmatpush.msrb.mxu2 %v1483_v16 }
 0x13b   :  { %1178 = vmatpush.msrb.mxu3 %v1528_v17  ;;  %1491 = vmatmul.msk.f32.vlgmr.msrb.gmra.mxu2 %vm144_vm0, %v980_v19  ;;  %v1279_v19 = vld [vmem:[%s2699_s7 + $0x78] sm:$0xff] }
 0x13c   :  { %1137 = vmatpush.msra.mxu2 %v1526_v18  ;;  %1536 = vmatmul.msk.f32.vlgmr.msrb.gmra.mxu3 %vm144_vm0, %v1150_v20  ;;  %v1583_v18 = vmov 128.0   ;;  %v1278_v20 = vld [vmem:[%s2699_s7 + $0x70] sm:$0xff] }
 0x13d   :  { %1553 = vrcp.f32 %v1583_v18  ;;  %1284 = vmatpush.msrb.mxu1 %v1279_v19 }
 0x13e   :  { %1138 = vmatpush.msra.mxu2 %v1525_v21 }
 0x13f   :  { %1285 = vmatpush.msrb.mxu1 %v1278_v20 }
 0x140   :  { %1139 = vmatpush.msra.mxu2 %v1524_v22 }
 0x142   :  { %1140 = vmatpush.msra.mxu2 %v1523_v23 }
 0x143   :  { %v1554_v21 = vpop.eup %1553 }
 0x144   :  { %1141 = vmatpush.msra.mxu2 %v1522_v24  ;;  %v1229_v22 = vmul.f32 128.0, %v1554_v21  ;;  %vm1233_vm3 = vweird.f32 %v1554_v21 }
 0x146   :  { %1142 = vmatpush.msra.mxu2 %v1521_v25  ;;  %v1230_v23 = vsub.f32 1.0, %v1229_v22 }
 0x148   :  { %1143 = vmatpush.msra.mxu2 %v1520_v12  ;;  %v1231_v24 = vmul.f32 %v1554_v21, %v1230_v23 }
 0x14a   :  { %1144 = vmatpush.msra.mxu2 %v1519_v27  ;;  %v1232_v25 = vadd.f32 %v1554_v21, %v1231_v24 }
 0x14b   :  { %1527 = vmatmul.msk.f32.vlgmr.msra.gmra.mxu2 %vm144_vm0, %v1116_v28 }
 0x14c   :  { %v1234_v12 = vsel %vm1233_vm3, %v1554_v21, %v1232_v25 }
 0x163   :  { %v500_v50 = vpop.f32.mrf.mxu1 }
 0x168   :  { %v410_v29 = vpop.f32.mrf.mxu2  ;;  %v466_v32 = vpop.f32.mrf.mxu3 }
 0x16c   :  { %v602_v38 = vpop.f32.mrf.mxu1 }
 0x171   :  { %v433_v30 = vpop.f32.mrf.mxu2  ;;  %v568_v36 = vpop.f32.mrf.mxu3 }
 0x172   :  { %v434_v31 = vadd.f32 %v433_v30, %v410_v29 }
 0x174   :  { %v469_v41 = vadd.f32 %v466_v32, %v434_v31  ;;  %v1277_v32 = vld [vmem:[%s2699_s7 + $0x68] sm:$0xff] }
 0x175   :  { %1286 = vmatpush.msrb.mxu1 %v1277_v32 }
 0x176   :  { %v503_v34 = vadd.f32 %v500_v50, %v469_v41  ;;  %v704_v48 = vpop.f32.mrf.mxu1  ;;  %v1276_v41 = vld [vmem:[%s2699_s7 + $0x60] sm:$0xff]  ;;  %v1275_v50 = vld [vmem:[%s2699_s7 + $0x58] sm:$0xff] }
 0x177   :  { %1287 = vmatpush.msrb.mxu1 %v1276_v41 }
 0x179   :  { %1288 = vmatpush.msrb.mxu1 %v1275_v50 }
 0x17a   :  { %v670_v45 = vpop.f32.mrf.mxu3  ;;  %v806_v53 = vpop.f32.mrf.mxu0 }
 0x17c   :  { %v534_v33 = vpop.f32.mrf.mxu2 }
 0x17d   :  { %v537_v35 = vadd.f32 %v534_v33, %v503_v34  ;;  %v1274_v33 = vld [vmem:[%s2699_s7 + $0x50] sm:$0xff]  ;;  %v1273_v34 = vld [vmem:[%s2699_s7 + $0x48] sm:$0xff] }
 0x17e   :  { %1289 = vmatpush.msrb.mxu1 %v1274_v33 }
 0x17f   :  { %v571_v37 = vadd.f32 %v568_v36, %v537_v35  ;;  %v1272_v35 = vld [vmem:[%s2699_s7 + $0x40] sm:$0xff]  ;;  %v1271_v36 = vld [vmem:[%s2699_s7 + $0x38] sm:$0xff] }
 0x180   :  { %1290 = vmatpush.msrb.mxu1 %v1273_v34 }
 0x181   :  { %v605_v42 = vadd.f32 %v602_v38, %v571_v37  ;;  %v1270_v37 = vld [vmem:[%s2699_s7 + $0x30] sm:$0xff]  ;;  %v1269_v38 = vld [vmem:[%s2699_s7 + $0x28] sm:$0xff] }
 0x182   :  { %1291 = vmatpush.msrb.mxu1 %v1272_v35 }
 0x184   :  { %1292 = vmatpush.msrb.mxu1 %v1271_v36 }
 0x186   :  { %v840_v55 = vpop.f32.mrf.mxu1  ;;  %1293 = vmatpush.msrb.mxu1 %v1270_v37 }
 0x188   :  { %v942_v62 = vpop.f32.mrf.mxu0  ;;  %1294 = vmatpush.msrb.mxu1 %v1269_v38 }
 0x18a   :  { %v636_v40 = vpop.f32.mrf.mxu2 }
 0x18b   :  { %v639_v44 = vadd.f32 %v636_v40, %v605_v42  ;;  %v772_v26 = vpop.f32.mrf.mxu3  ;;  %v1268_v40 = vld [vmem:[%s2699_s7 + $0x20] sm:$0xff]  ;;  %v1267_v42 = vld [vmem:[%s2699_s7 + $0x18] sm:$0xff] }
 0x18c   :  { %1295 = vmatpush.msrb.mxu1 %v1268_v40 }
 0x18d   :  { %v673_v46 = vadd.f32 %v670_v45, %v639_v44  ;;  %v1266_v44 = vld [vmem:[%s2699_s7 + $0x10] sm:$0xff]  ;;  %v1265_v45 = vld [vmem:[%s2699_s7 + $0x8] sm:$0xff] }
 0x18e   :  { %1296 = vmatpush.msrb.mxu1 %v1267_v42 }
 0x18f   :  { %v707_v51 = vadd.f32 %v704_v48, %v673_v46  ;;  %v1264_v46 = vld [vmem:[%s2699_s7] sm:$0xff] }
 0x190   :  { %1297 = vmatpush.msrb.mxu1 %v1266_v44 }
 0x192   :  { %v1078_v5 = vpop.f32.mrf.mxu0  ;;  %1298 = vmatpush.msrb.mxu1 %v1265_v45 }
 0x194   :  { %1299 = vmatpush.msrb.mxu1 %v1264_v46 }
 0x198   :  { %v976_v0 = vpop.f32.mrf.mxu1 }
 0x19c   :  { %v738_v49 = vpop.f32.mrf.mxu2 }
 0x19d   :  { %v741_v52 = vadd.f32 %v738_v49, %v707_v51  ;;  %v908_v59 = vpop.f32.mrf.mxu3 }
 0x19f   :  { %v775_v43 = vadd.f32 %v772_v26, %v741_v52 }
 0x1a1   :  { %v809_v54 = vadd.f32 %v806_v53, %v775_v43 }
 0x1a2   :  { %v1214_v13 = vpop.f32.mrf.mxu0 }
 0x1a3   :  { %v843_v57 = vadd.f32 %v840_v55, %v809_v54 }
 0x1a9   :  { %v1112_v7 = vpop.f32.mrf.mxu1 }
 0x1ae   :  { %v874_v56 = vpop.f32.mrf.mxu2  ;;  %v1044_v47 = vpop.f32.mrf.mxu3 }
 0x1af   :  { %v877_v58 = vadd.f32 %v874_v56, %v843_v57  ;;  %v1550_v56 = vld [vmem:[%s2697_s5] ss:$0 sm:$0xff] }
 0x1b1   :  { %v911_v61 = vadd.f32 %v908_v59, %v877_v58  ;;  %v1551_v59 = vld [vmem:[%s2698_s6] ss:$0 sm:$0xff] }
 0x1b3   :  { %v945_v63 = vadd.f32 %v942_v62, %v911_v61 }
 0x1b5   :  { %v979_v2 = vadd.f32 %v976_v0, %v945_v63  ;;  %v1552_v63 = vld [vmem:[%s2700_s8] ss:$0 sm:$0xff] }
 0x1be   :  { %v1010_v1 = vpop.f32.mrf.mxu2 }
 0x1bf   :  { %v1013_v3 = vadd.f32 %v1010_v1, %v979_v2  ;;  %v1180_v60 = vpop.f32.mrf.mxu3 }
 0x1c1   :  { %v1047_v4 = vadd.f32 %v1044_v47, %v1013_v3 }
 0x1c3   :  { %v1081_v6 = vadd.f32 %v1078_v5, %v1047_v4 }
 0x1c5   :  { %v1115_v8 = vadd.f32 %v1112_v7, %v1081_v6 }
 0x1ce   :  { %v1146_v9 = vpop.f32.mrf.mxu2 }
 0x1cf   :  { %v1149_v10 = vadd.f32 %v1146_v9, %v1115_v8 }
 0x1d1   :  { %v1183_v11 = vadd.f32 %v1180_v60, %v1149_v10 }
 0x1d3   :  { %v1217_v14 = vadd.f32 %v1214_v13, %v1183_v11 }
 0x1d5   :  { %v1222_v15 = vadd.f32 %v1549_v39, %v1217_v14 }
 0x1d7   :  { %v1223_v16 = vmax.f32 %v1222_v15, 0.0 }
 0x1d9   :  { %v1225_v17 = vsel %vm1224_vm2, %v1223_v16, 0.0 }
 0x1da   :  { %1226 = vadd.xlane.f32.xlu0 %v1225_v17 }
 0x24d   :  { %v1227_v27 = vpop.xlane.xlu0 %1226 }
 0x24e   :  { %v1235_v28 = vmul.f32 %v1234_v12, %v1227_v27 }
 0x250   :  { %v1236_v29 = vsub.f32 %v1223_v16, %v1235_v28 }
 0x252   :  { %v1237_v30 = vmul.f32 %v1236_v29, %v1236_v29 }
 0x254   :  { %v1238_v31 = vsel %vm1224_vm2, %v1237_v30, 0.0 }
 0x255   :  { %1239 = vadd.xlane.f32.xlu0 %v1238_v31 }
 0x2c8   :  { %v1240_v48 = vpop.xlane.xlu0 %1239 }
 0x2c9   :  { %v1241_v49 = vmul.f32 %v1240_v48, %v1234_v12 }
 0x2cb   :  { %v1242_v51 = vadd.f32 1e-05, %v1241_v49 }
 0x2cd   :  { %1555 = vrsqrt.f32 %v1242_v51  ;;  %vm1249_vm5 = vweird.f32 %v1242_v51 }
 0x2d3   :  { %v1556_v52 = vpop.eup %1555 }
 0x2d4   :  { %v1244_v26 = vmul.f32 %v1556_v52, %v1242_v51  ;;  %vm1250_vm4 = vweird.f32 %v1556_v52 }
 0x2d5   :  { %vm1251_vm6 = vmor %vm1249_vm5, %vm1250_vm4 }
 0x2d6   :  { %v1245_v43 = vmul.f32 %v1556_v52, %v1244_v26 }
 0x2d8   :  { %v1246_v53 = vmul.f32 0.5, %v1245_v43 }
 0x2da   :  { %v1247_v54 = vsub.f32 1.5, %v1246_v53 }
 0x2dc   :  { %v1248_v55 = vmul.f32 %v1556_v52, %v1247_v54 }
 0x2de   :  { %v1252_v57 = vsel %vm1251_vm6, %v1556_v52, %v1248_v55 }
 0x2df   :  { %v1253_v58 = vmul.f32 %v1252_v57, %v1236_v29 }
 0x2e1   :  { %v1258_v61 = vmul.f32 %v1550_v56, %v1253_v58 }
 0x2e3   :  { %v1263_v62 = vadd.f32 %v1551_v59, %v1258_v61 }
 0x2e5   :  { %1300 = vmatmul.f32.vlgmr.msrb.gmra.mxu1 %v1263_v62 }
 0x362   :  { %v1301_v0 = vpop.f32.mrf.mxu1 }
 0x363   :  { %v1302_v1 = vadd.f32 %v1552_v63, %v1301_v0 }
 0x365   :  { %1305 = vst.msk [vmem:[#allocation3] sm:$0x3] %vm1304_vm7, %v1302_v1 }
 0x366   :  { %1316 = dma.vmem_to_hbm [thread:$0]  %s1312_s19, 32, %s1314_s22, [#allocation4]  }
 0x367   :  { %1581 = dma.done.wait [#allocation4], 32  }
 0x368   :  { %1582 = vsyncadd [#allocation4], 4294967264 }
 0x369   :  { %1321 = vsyncpa [#allocation4], 1 }

</bundles_post_ra>
